<compile_context>
chip_gen: v6e
topology: v6e:2x2x1
jax: 0.10.0
libtpu: 0.0.40
codegen_flags: <defaults>
</compile_context>

<pallas_src>
import numpy as np
import jax
import jax.numpy as jnp
from jax.experimental import pallas as pl
from jax.experimental.pallas import tpu as pltpu

EPS = 1e-5
H1 = W1 = 16          # input spatial size
H2 = W2 = 8           # after first 2x2 maxpool
H3 = W3 = 4           # after second 2x2 maxpool
C1_OUT = 4
C2_IN = 4
C2_OUT = 4


def _maxpool2x2(x, h_out, w_out):
    """2x2 / stride-2 max pool of a (C, 2*h_out, 2*w_out) register value.

    Done fully in vregs with stride-1 slices, jnp.maximum and concatenates
    (no scratch buffers, no masked partial stores)."""
    # sublane (H) direction first, then lane (W) direction.
    x = jnp.concatenate(
        [jnp.maximum(x[:, 2 * i:2 * i + 1, :], x[:, 2 * i + 1:2 * i + 2, :])
         for i in range(h_out)], axis=1)
    x = jnp.concatenate(
        [jnp.maximum(x[:, :, 2 * j:2 * j + 1], x[:, :, 2 * j + 1:2 * j + 2])
         for j in range(w_out)], axis=2)
    return x


def _batchnorm_relu(acc, gamma, beta, n):
    """Training-mode BN (biased variance over H,W per channel) + ReLU, vectorized."""
    s = jnp.sum(acc, axis=2, keepdims=True)
    mu = jnp.sum(s, axis=1, keepdims=True) / n                  # (C,1,1)
    xc = acc - mu
    s2 = jnp.sum(xc * xc, axis=2, keepdims=True)
    var = jnp.sum(s2, axis=1, keepdims=True) / n                # (C,1,1)
    y = gamma * xc * jax.lax.rsqrt(var + EPS) + beta
    return jnp.maximum(y, 0.0)


def feature_detector_kernel(x_ref, w1_ref, b1_ref, g1_ref, be1_ref,
                            w2_ref, b2_ref, g2_ref, be2_ref,
                            out_ref, pad1, pad2):
    f32 = jnp.float32

    # ---- hoist all parameters out of the MAC loops (one VMEM load each) ----
    w1 = w1_ref[...]                       # (4, 3, 3)
    w2 = w2_ref[...]                       # (4, 4, 3, 3)
    b1, g1, be1 = b1_ref[...], g1_ref[...], be1_ref[...]   # (4,1,1) each
    b2, g2, be2 = b2_ref[...], g2_ref[...], be2_ref[...]   # (4,1,1) each

    # ---- conv1: zero-pad (1,16,16) -> (1,18,18) in scratch (2 stores total) ----
    pad1[...] = jnp.zeros(pad1.shape, f32)
    pad1[0, 1:H1 + 1, 1:W1 + 1] = x_ref[0]

    # conv1 (1->4, 3x3, pad 1), vectorized over output channels: 9 window MACs.
    acc1 = jnp.zeros((C1_OUT, H1, W1), f32)
    for kh in range(3):
        for kw in range(3):
            win = pad1[0, kh:kh + H1, kw:kw + W1]                     # (16,16)
            acc1 = acc1 + w1[:, kh:kh + 1, kw:kw + 1] * win[None, :, :]
    acc1 = acc1 + b1
    act1 = _batchnorm_relu(acc1, g1, be1, float(H1 * W1))             # (4,16,16)

    # ---- maxpool1 in registers, then zero-pad for conv2 (2 stores total) ----
    pooled1 = _maxpool2x2(act1, H2, W2)                               # (4,8,8)
    pad2[...] = jnp.zeros(pad2.shape, f32)
    pad2[:, 1:H2 + 1, 1:W2 + 1] = pooled1

    # ---- conv2 (4->4, 3x3, pad 1), vectorized over output channels: 36 MACs ----
    acc2 = jnp.zeros((C2_OUT, H2, W2), f32)
    for ci in range(C2_IN):
        for kh in range(3):
            for kw in range(3):
                win = pad2[ci, kh:kh + H2, kw:kw + W2]                # (8,8)
                acc2 = acc2 + w2[:, ci, kh:kh + 1, kw:kw + 1] * win[None, :, :]
    acc2 = acc2 + b2
    act2 = _batchnorm_relu(acc2, g2, be2, float(H2 * W2))             # (4,8,8)

    # ---- maxpool2 in registers + single full store of the (4,4,4) result ----
    out_ref[...] = _maxpool2x2(act2, H3, W3)


def feature_detector_forward(x, params):
    """x: (1, 16, 16) float32 (channel, H, W) -> (1, 64) float32."""
    w1, b1, g1, be1, w2, b2, g2, be2 = params
    vmem = pl.BlockSpec(memory_space=pltpu.MemorySpace.VMEM)

    out = pl.pallas_call(
        feature_detector_kernel,
        out_shape=jax.ShapeDtypeStruct((C2_OUT, H3, W3), jnp.float32),
        in_specs=[vmem] * 9,
        out_specs=vmem,
        scratch_shapes=[
            pltpu.VMEM((1, H1 + 2, W1 + 2), jnp.float32),      # pad1 (conv1 halo)
            pltpu.VMEM((C2_IN, H2 + 2, W2 + 2), jnp.float32),  # pad2 (conv2 halo)
        ],
    )(x,
      w1.reshape(C1_OUT, 3, 3),
      b1.reshape(C1_OUT, 1, 1), g1.reshape(C1_OUT, 1, 1), be1.reshape(C1_OUT, 1, 1),
      w2,
      b2.reshape(C2_OUT, 1, 1), g2.reshape(C2_OUT, 1, 1), be2.reshape(C2_OUT, 1, 1))

    # torch: x.view(x.size(0), -1) on (1, C, H, W)  ==  row-major flatten of (C, H, W).
    # Pure glue: a zero-cost bitcast reshape of a 256-byte tensor.
    return out.reshape(1, -1)


def ref_forward(x, params):
    """Pure-JAX reference mirroring the PyTorch module (training-mode BatchNorm)."""
    w1, b1, g1, be1, w2, b2, g2, be2 = params
    xb = x[None]  # unsqueeze(0): (1, 1, 16, 16)

    def conv(inp, w, b):
        y = jax.lax.conv_general_dilated(
            inp, w, window_strides=(1, 1), padding=((1, 1), (1, 1)),
            dimension_numbers=("NCHW", "OIHW", "NCHW"),
            precision=jax.lax.Precision.HIGHEST)
        return y + b[None, :, None, None]

    def bn(inp, g, be):
        mu = jnp.mean(inp, axis=(0, 2, 3), keepdims=True)
        var = jnp.mean((inp - mu) ** 2, axis=(0, 2, 3), keepdims=True)
        return (g[None, :, None, None] * (inp - mu) / jnp.sqrt(var + EPS)
                + be[None, :, None, None])

    def pool(inp):
        return jax.lax.reduce_window(inp, -jnp.inf, jax.lax.max,
                                     (1, 1, 2, 2), (1, 1, 2, 2), "VALID")

    y = pool(jnp.maximum(bn(conv(xb, w1, b1), g1, be1), 0.0))
    y = pool(jnp.maximum(bn(conv(y, w2, b2), g2, be2), 0.0))
    return y.reshape(1, -1)


if __name__ == "__main__":
    key = jax.random.PRNGKey(0)
    ks = jax.random.split(key, 9)

    # Deterministic synthetic parameters (shapes match the nn.Module's layers).
    w1 = 0.2 * jax.random.normal(ks[0], (4, 1, 3, 3), jnp.float32)
    b1 = 0.1 * jax.random.normal(ks[1], (4,), jnp.float32)
    g1 = 1.0 + 0.1 * jax.random.normal(ks[2], (4,), jnp.float32)
    be1 = 0.1 * jax.random.normal(ks[3], (4,), jnp.float32)
    w2 = 0.2 * jax.random.normal(ks[4], (4, 4, 3, 3), jnp.float32)
    b2 = 0.1 * jax.random.normal(ks[5], (4,), jnp.float32)
    g2 = 1.0 + 0.1 * jax.random.normal(ks[6], (4,), jnp.float32)
    be2 = 0.1 * jax.random.normal(ks[7], (4,), jnp.float32)
    params = (w1, b1, g1, be1, w2, b2, g2, be2)

    # Input: single-channel 16x16 image (module unsqueezes a batch dim of 1).
    x = jax.random.normal(ks[8], (1, 16, 16), jnp.float32)

    out = feature_detector_forward(x, params)
    out = jax.block_until_ready(out)

    ref = ref_forward(x, params)
    assert out.shape == (1, 64), out.shape
    np.testing.assert_allclose(np.asarray(out), np.asarray(ref),
                               rtol=1e-3, atol=1e-3)
    print("KERNEL_OK")
</pallas_src>

<mosaic_0001>
module attributes {stable_mosaic.version = 11 : i64} {
  func.func @feature_detector_kernel(%arg0: memref<1x16x16xf32, #tpu.memory_space<vmem>>, %arg1: memref<4x3x3xf32, #tpu.memory_space<vmem>>, %arg2: memref<4x1x1xf32, #tpu.memory_space<vmem>>, %arg3: memref<4x1x1xf32, #tpu.memory_space<vmem>>, %arg4: memref<4x1x1xf32, #tpu.memory_space<vmem>>, %arg5: memref<4x4x3x3xf32, #tpu.memory_space<vmem>>, %arg6: memref<4x1x1xf32, #tpu.memory_space<vmem>>, %arg7: memref<4x1x1xf32, #tpu.memory_space<vmem>>, %arg8: memref<4x1x1xf32, #tpu.memory_space<vmem>>, %arg9: memref<4x4x4xf32, #tpu.memory_space<vmem>>, %arg10: memref<1x18x18xf32, #tpu.memory_space<vmem>>, %arg11: memref<4x10x10xf32, #tpu.memory_space<vmem>>) attributes {dimension_semantics = [], scalar_prefetch = 0 : i64, scratch_operands = 2 : i64, tpu.core_type = #tpu.core_type<tc>} {
    %c0 = arith.constant 0 : index
    %c0_0 = arith.constant 0 : index
    %c0_1 = arith.constant 0 : index
    %0 = vector.load %arg1[%c0, %c0_0, %c0_1] : memref<4x3x3xf32, #tpu.memory_space<vmem>>, vector<4x3x3xf32>
    %c0_2 = arith.constant 0 : index
    %c0_3 = arith.constant 0 : index
    %c0_4 = arith.constant 0 : index
    %c0_5 = arith.constant 0 : index
    %1 = vector.load %arg5[%c0_2, %c0_3, %c0_4, %c0_5] : memref<4x4x3x3xf32, #tpu.memory_space<vmem>>, vector<4x4x3x3xf32>
    %c0_6 = arith.constant 0 : index
    %c0_7 = arith.constant 0 : index
    %c0_8 = arith.constant 0 : index
    %2 = vector.load %arg2[%c0_6, %c0_7, %c0_8] : memref<4x1x1xf32, #tpu.memory_space<vmem>>, vector<4x1x1xf32>
    %c0_9 = arith.constant 0 : index
    %c0_10 = arith.constant 0 : index
    %c0_11 = arith.constant 0 : index
    %3 = vector.load %arg3[%c0_9, %c0_10, %c0_11] : memref<4x1x1xf32, #tpu.memory_space<vmem>>, vector<4x1x1xf32>
    %c0_12 = arith.constant 0 : index
    %c0_13 = arith.constant 0 : index
    %c0_14 = arith.constant 0 : index
    %4 = vector.load %arg4[%c0_12, %c0_13, %c0_14] : memref<4x1x1xf32, #tpu.memory_space<vmem>>, vector<4x1x1xf32>
    %c0_15 = arith.constant 0 : index
    %c0_16 = arith.constant 0 : index
    %c0_17 = arith.constant 0 : index
    %5 = vector.load %arg6[%c0_15, %c0_16, %c0_17] : memref<4x1x1xf32, #tpu.memory_space<vmem>>, vector<4x1x1xf32>
    %c0_18 = arith.constant 0 : index
    %c0_19 = arith.constant 0 : index
    %c0_20 = arith.constant 0 : index
    %6 = vector.load %arg7[%c0_18, %c0_19, %c0_20] : memref<4x1x1xf32, #tpu.memory_space<vmem>>, vector<4x1x1xf32>
    %c0_21 = arith.constant 0 : index
    %c0_22 = arith.constant 0 : index
    %c0_23 = arith.constant 0 : index
    %7 = vector.load %arg8[%c0_21, %c0_22, %c0_23] : memref<4x1x1xf32, #tpu.memory_space<vmem>>, vector<4x1x1xf32>
    %cst = arith.constant 0.000000e+00 : f32
    %8 = vector.broadcast %cst : f32 to vector<1x18x18xf32>
    %c0_24 = arith.constant 0 : index
    %c0_25 = arith.constant 0 : index
    %c0_26 = arith.constant 0 : index
    %9 = vector.load %arg10[%c0_24, %c0_25, %c0_26] : memref<1x18x18xf32, #tpu.memory_space<vmem>>, vector<1x18x18xf32>
    tpu.vector_store %arg10[%c0_24, %c0_25, %c0_26], %8 {strides = array<i32>} : memref<1x18x18xf32, #tpu.memory_space<vmem>>, vector<1x18x18xf32>,
    %c0_27 = arith.constant 0 : index
    %c0_28 = arith.constant 0 : index
    %c0_29 = arith.constant 0 : index
    %10 = vector.load %arg0[%c0_27, %c0_28, %c0_29] : memref<1x16x16xf32, #tpu.memory_space<vmem>>, vector<1x16x16xf32>
    %11 = vector.shape_cast %10 : vector<1x16x16xf32> to vector<16x16xf32>
    %c0_30 = arith.constant 0 : index
    %c1 = arith.constant 1 : index
    %c1_31 = arith.constant 1 : index
    %12 = vector.load %arg10[%c0_30, %c1, %c1_31] : memref<1x18x18xf32, #tpu.memory_space<vmem>>, vector<1x16x16xf32>
    %13 = vector.shape_cast %12 : vector<1x16x16xf32> to vector<16x16xf32>
    %14 = vector.shape_cast %11 : vector<16x16xf32> to vector<1x16x16xf32>
    tpu.vector_store %arg10[%c0_30, %c1, %c1_31], %14 {strides = array<i32>} : memref<1x18x18xf32, #tpu.memory_space<vmem>>, vector<1x16x16xf32>,
    %cst_32 = arith.constant 0.000000e+00 : f32
    %15 = vector.broadcast %cst_32 : f32 to vector<4x16x16xf32>
    %c0_33 = arith.constant 0 : index
    %c0_34 = arith.constant 0 : index
    %c0_35 = arith.constant 0 : index
    %16 = vector.load %arg10[%c0_33, %c0_34, %c0_35] : memref<1x18x18xf32, #tpu.memory_space<vmem>>, vector<1x16x16xf32>
    %17 = vector.shape_cast %16 : vector<1x16x16xf32> to vector<16x16xf32>
    %18 = vector.extract_strided_slice %0 {offsets = [0, 0, 0], sizes = [4, 1, 1], strides = [1, 1, 1]} : vector<4x3x3xf32> to vector<4x1x1xf32>
    %19 = vector.shape_cast %17 : vector<16x16xf32> to vector<1x16x16xf32>
    %20 = vector.broadcast %18 : vector<4x1x1xf32> to vector<4x16x16xf32>
    %21 = vector.broadcast %19 : vector<1x16x16xf32> to vector<4x16x16xf32>
    %22 = arith.mulf %20, %21 : vector<4x16x16xf32>
    %23 = arith.addf %15, %22 : vector<4x16x16xf32>
    %c0_36 = arith.constant 0 : index
    %c0_37 = arith.constant 0 : index
    %c1_38 = arith.constant 1 : index
    %24 = vector.load %arg10[%c0_36, %c0_37, %c1_38] : memref<1x18x18xf32, #tpu.memory_space<vmem>>, vector<1x16x16xf32>
    %25 = vector.shape_cast %24 : vector<1x16x16xf32> to vector<16x16xf32>
    %26 = vector.extract_strided_slice %0 {offsets = [0, 0, 1], sizes = [4, 1, 1], strides = [1, 1, 1]} : vector<4x3x3xf32> to vector<4x1x1xf32>
    %27 = vector.shape_cast %25 : vector<16x16xf32> to vector<1x16x16xf32>
    %28 = vector.broadcast %26 : vector<4x1x1xf32> to vector<4x16x16xf32>
    %29 = vector.broadcast %27 : vector<1x16x16xf32> to vector<4x16x16xf32>
    %30 = arith.mulf %28, %29 : vector<4x16x16xf32>
    %31 = arith.addf %23, %30 : vector<4x16x16xf32>
    %c0_39 = arith.constant 0 : index
    %c0_40 = arith.constant 0 : index
    %c2 = arith.constant 2 : index
    %32 = vector.load %arg10[%c0_39, %c0_40, %c2] : memref<1x18x18xf32, #tpu.memory_space<vmem>>, vector<1x16x16xf32>
    %33 = vector.shape_cast %32 : vector<1x16x16xf32> to vector<16x16xf32>
    %34 = vector.extract_strided_slice %0 {offsets = [0, 0, 2], sizes = [4, 1, 1], strides = [1, 1, 1]} : vector<4x3x3xf32> to vector<4x1x1xf32>
    %35 = vector.shape_cast %33 : vector<16x16xf32> to vector<1x16x16xf32>
    %36 = vector.broadcast %34 : vector<4x1x1xf32> to vector<4x16x16xf32>
    %37 = vector.broadcast %35 : vector<1x16x16xf32> to vector<4x16x16xf32>
    %38 = arith.mulf %36, %37 : vector<4x16x16xf32>
    %39 = arith.addf %31, %38 : vector<4x16x16xf32>
    %c0_41 = arith.constant 0 : index
    %c1_42 = arith.constant 1 : index
    %c0_43 = arith.constant 0 : index
    %40 = vector.load %arg10[%c0_41, %c1_42, %c0_43] : memref<1x18x18xf32, #tpu.memory_space<vmem>>, vector<1x16x16xf32>
    %41 = vector.shape_cast %40 : vector<1x16x16xf32> to vector<16x16xf32>
    %42 = vector.extract_strided_slice %0 {offsets = [0, 1, 0], sizes = [4, 1, 1], strides = [1, 1, 1]} : vector<4x3x3xf32> to vector<4x1x1xf32>
    %43 = vector.shape_cast %41 : vector<16x16xf32> to vector<1x16x16xf32>
    %44 = vector.broadcast %42 : vector<4x1x1xf32> to vector<4x16x16xf32>
    %45 = vector.broadcast %43 : vector<1x16x16xf32> to vector<4x16x16xf32>
    %46 = arith.mulf %44, %45 : vector<4x16x16xf32>
    %47 = arith.addf %39, %46 : vector<4x16x16xf32>
    %c0_44 = arith.constant 0 : index
    %c1_45 = arith.constant 1 : index
    %c1_46 = arith.constant 1 : index
    %48 = vector.load %arg10[%c0_44, %c1_45, %c1_46] : memref<1x18x18xf32, #tpu.memory_space<vmem>>, vector<1x16x16xf32>
    %49 = vector.shape_cast %48 : vector<1x16x16xf32> to vector<16x16xf32>
    %50 = vector.extract_strided_slice %0 {offsets = [0, 1, 1], sizes = [4, 1, 1], strides = [1, 1, 1]} : vector<4x3x3xf32> to vector<4x1x1xf32>
    %51 = vector.shape_cast %49 : vector<16x16xf32> to vector<1x16x16xf32>
    %52 = vector.broadcast %50 : vector<4x1x1xf32> to vector<4x16x16xf32>
    %53 = vector.broadcast %51 : vector<1x16x16xf32> to vector<4x16x16xf32>
    %54 = arith.mulf %52, %53 : vector<4x16x16xf32>
    %55 = arith.addf %47, %54 : vector<4x16x16xf32>
    %c0_47 = arith.constant 0 : index
    %c1_48 = arith.constant 1 : index
    %c2_49 = arith.constant 2 : index
    %56 = vector.load %arg10[%c0_47, %c1_48, %c2_49] : memref<1x18x18xf32, #tpu.memory_space<vmem>>, vector<1x16x16xf32>
    %57 = vector.shape_cast %56 : vector<1x16x16xf32> to vector<16x16xf32>
    %58 = vector.extract_strided_slice %0 {offsets = [0, 1, 2], sizes = [4, 1, 1], strides = [1, 1, 1]} : vector<4x3x3xf32> to vector<4x1x1xf32>
    %59 = vector.shape_cast %57 : vector<16x16xf32> to vector<1x16x16xf32>
    %60 = vector.broadcast %58 : vector<4x1x1xf32> to vector<4x16x16xf32>
    %61 = vector.broadcast %59 : vector<1x16x16xf32> to vector<4x16x16xf32>
    %62 = arith.mulf %60, %61 : vector<4x16x16xf32>
    %63 = arith.addf %55, %62 : vector<4x16x16xf32>
    %c0_50 = arith.constant 0 : index
    %c2_51 = arith.constant 2 : index
    %c0_52 = arith.constant 0 : index
    %64 = vector.load %arg10[%c0_50, %c2_51, %c0_52] : memref<1x18x18xf32, #tpu.memory_space<vmem>>, vector<1x16x16xf32>
    %65 = vector.shape_cast %64 : vector<1x16x16xf32> to vector<16x16xf32>
    %66 = vector.extract_strided_slice %0 {offsets = [0, 2, 0], sizes = [4, 1, 1], strides = [1, 1, 1]} : vector<4x3x3xf32> to vector<4x1x1xf32>
    %67 = vector.shape_cast %65 : vector<16x16xf32> to vector<1x16x16xf32>
    %68 = vector.broadcast %66 : vector<4x1x1xf32> to vector<4x16x16xf32>
    %69 = vector.broadcast %67 : vector<1x16x16xf32> to vector<4x16x16xf32>
    %70 = arith.mulf %68, %69 : vector<4x16x16xf32>
    %71 = arith.addf %63, %70 : vector<4x16x16xf32>
    %c0_53 = arith.constant 0 : index
    %c2_54 = arith.constant 2 : index
    %c1_55 = arith.constant 1 : index
    %72 = vector.load %arg10[%c0_53, %c2_54, %c1_55] : memref<1x18x18xf32, #tpu.memory_space<vmem>>, vector<1x16x16xf32>
    %73 = vector.shape_cast %72 : vector<1x16x16xf32> to vector<16x16xf32>
    %74 = vector.extract_strided_slice %0 {offsets = [0, 2, 1], sizes = [4, 1, 1], strides = [1, 1, 1]} : vector<4x3x3xf32> to vector<4x1x1xf32>
    %75 = vector.shape_cast %73 : vector<16x16xf32> to vector<1x16x16xf32>
    %76 = vector.broadcast %74 : vector<4x1x1xf32> to vector<4x16x16xf32>
    %77 = vector.broadcast %75 : vector<1x16x16xf32> to vector<4x16x16xf32>
    %78 = arith.mulf %76, %77 : vector<4x16x16xf32>
    %79 = arith.addf %71, %78 : vector<4x16x16xf32>
    %c0_56 = arith.constant 0 : index
    %c2_57 = arith.constant 2 : index
    %c2_58 = arith.constant 2 : index
    %80 = vector.load %arg10[%c0_56, %c2_57, %c2_58] : memref<1x18x18xf32, #tpu.memory_space<vmem>>, vector<1x16x16xf32>
    %81 = vector.shape_cast %80 : vector<1x16x16xf32> to vector<16x16xf32>
    %82 = vector.extract_strided_slice %0 {offsets = [0, 2, 2], sizes = [4, 1, 1], strides = [1, 1, 1]} : vector<4x3x3xf32> to vector<4x1x1xf32>
    %83 = vector.shape_cast %81 : vector<16x16xf32> to vector<1x16x16xf32>
    %84 = vector.broadcast %82 : vector<4x1x1xf32> to vector<4x16x16xf32>
    %85 = vector.broadcast %83 : vector<1x16x16xf32> to vector<4x16x16xf32>
    %86 = arith.mulf %84, %85 : vector<4x16x16xf32>
    %87 = arith.addf %79, %86 : vector<4x16x16xf32>
    %88 = vector.broadcast %2 : vector<4x1x1xf32> to vector<4x16x16xf32>
    %89 = arith.addf %87, %88 : vector<4x16x16xf32>
    %cst_59 = arith.constant dense<0.000000e+00> : vector<4x16xf32>
    %90 = vector.multi_reduction <add>, %89, %cst_59 [2] : vector<4x16x16xf32> to vector<4x16xf32>
    %91 = vector.shape_cast %90 : vector<4x16xf32> to vector<4x16x1xf32>
    %cst_60 = arith.constant dense<0.000000e+00> : vector<4x1xf32>
    %92 = vector.multi_reduction <add>, %91, %cst_60 [1] : vector<4x16x1xf32> to vector<4x1xf32>
    %93 = vector.shape_cast %92 : vector<4x1xf32> to vector<4x1x1xf32>
    %cst_61 = arith.constant 2.560000e+02 : f32
    %94 = vector.broadcast %cst_61 : f32 to vector<4x1x1xf32>
    %95 = arith.divf %93, %94 : vector<4x1x1xf32>
    %96 = vector.broadcast %95 : vector<4x1x1xf32> to vector<4x16x16xf32>
    %97 = arith.subf %89, %96 : vector<4x16x16xf32>
    %98 = arith.mulf %97, %97 : vector<4x16x16xf32>
    %cst_62 = arith.constant dense<0.000000e+00> : vector<4x16xf32>
    %99 = vector.multi_reduction <add>, %98, %cst_62 [2] : vector<4x16x16xf32> to vector<4x16xf32>
    %100 = vector.shape_cast %99 : vector<4x16xf32> to vector<4x16x1xf32>
    %cst_63 = arith.constant dense<0.000000e+00> : vector<4x1xf32>
    %101 = vector.multi_reduction <add>, %100, %cst_63 [1] : vector<4x16x1xf32> to vector<4x1xf32>
    %102 = vector.shape_cast %101 : vector<4x1xf32> to vector<4x1x1xf32>
    %cst_64 = arith.constant 2.560000e+02 : f32
    %103 = vector.broadcast %cst_64 : f32 to vector<4x1x1xf32>
    %104 = arith.divf %102, %103 : vector<4x1x1xf32>
    %105 = vector.broadcast %3 : vector<4x1x1xf32> to vector<4x16x16xf32>
    %106 = arith.mulf %105, %97 : vector<4x16x16xf32>
    %cst_65 = arith.constant 9.99999974E-6 : f32
    %107 = vector.broadcast %cst_65 : f32 to vector<4x1x1xf32>
    %108 = arith.addf %104, %107 : vector<4x1x1xf32>
    %109 = math.rsqrt %108 : vector<4x1x1xf32>
    %110 = vector.broadcast %109 : vector<4x1x1xf32> to vector<4x16x16xf32>
    %111 = arith.mulf %106, %110 : vector<4x16x16xf32>
    %112 = vector.broadcast %4 : vector<4x1x1xf32> to vector<4x16x16xf32>
    %113 = arith.addf %111, %112 : vector<4x16x16xf32>
    %cst_66 = arith.constant 0.000000e+00 : f32
    %114 = vector.broadcast %cst_66 : f32 to vector<4x16x16xf32>
    %115 = arith.maximumf %113, %114 : vector<4x16x16xf32>
    %116 = vector.extract_strided_slice %115 {offsets = [0, 0, 0], sizes = [4, 1, 16], strides = [1, 1, 1]} : vector<4x16x16xf32> to vector<4x1x16xf32>
    %117 = vector.extract_strided_slice %115 {offsets = [0, 1, 0], sizes = [4, 1, 16], strides = [1, 1, 1]} : vector<4x16x16xf32> to vector<4x1x16xf32>
    %118 = arith.maximumf %116, %117 : vector<4x1x16xf32>
    %119 = vector.extract_strided_slice %115 {offsets = [0, 2, 0], sizes = [4, 1, 16], strides = [1, 1, 1]} : vector<4x16x16xf32> to vector<4x1x16xf32>
    %120 = vector.extract_strided_slice %115 {offsets = [0, 3, 0], sizes = [4, 1, 16], strides = [1, 1, 1]} : vector<4x16x16xf32> to vector<4x1x16xf32>
    %121 = arith.maximumf %119, %120 : vector<4x1x16xf32>
    %122 = vector.extract_strided_slice %115 {offsets = [0, 4, 0], sizes = [4, 1, 16], strides = [1, 1, 1]} : vector<4x16x16xf32> to vector<4x1x16xf32>
    %123 = vector.extract_strided_slice %115 {offsets = [0, 5, 0], sizes = [4, 1, 16], strides = [1, 1, 1]} : vector<4x16x16xf32> to vector<4x1x16xf32>
    %124 = arith.maximumf %122, %123 : vector<4x1x16xf32>
    %125 = vector.extract_strided_slice %115 {offsets = [0, 6, 0], sizes = [4, 1, 16], strides = [1, 1, 1]} : vector<4x16x16xf32> to vector<4x1x16xf32>
    %126 = vector.extract_strided_slice %115 {offsets = [0, 7, 0], sizes = [4, 1, 16], strides = [1, 1, 1]} : vector<4x16x16xf32> to vector<4x1x16xf32>
    %127 = arith.maximumf %125, %126 : vector<4x1x16xf32>
    %128 = vector.extract_strided_slice %115 {offsets = [0, 8, 0], sizes = [4, 1, 16], strides = [1, 1, 1]} : vector<4x16x16xf32> to vector<4x1x16xf32>
    %129 = vector.extract_strided_slice %115 {offsets = [0, 9, 0], sizes = [4, 1, 16], strides = [1, 1, 1]} : vector<4x16x16xf32> to vector<4x1x16xf32>
    %130 = arith.maximumf %128, %129 : vector<4x1x16xf32>
    %131 = vector.extract_strided_slice %115 {offsets = [0, 10, 0], sizes = [4, 1, 16], strides = [1, 1, 1]} : vector<4x16x16xf32> to vector<4x1x16xf32>
    %132 = vector.extract_strided_slice %115 {offsets = [0, 11, 0], sizes = [4, 1, 16], strides = [1, 1, 1]} : vector<4x16x16xf32> to vector<4x1x16xf32>
    %133 = arith.maximumf %131, %132 : vector<4x1x16xf32>
    %134 = vector.extract_strided_slice %115 {offsets = [0, 12, 0], sizes = [4, 1, 16], strides = [1, 1, 1]} : vector<4x16x16xf32> to vector<4x1x16xf32>
    %135 = vector.extract_strided_slice %115 {offsets = [0, 13, 0], sizes = [4, 1, 16], strides = [1, 1, 1]} : vector<4x16x16xf32> to vector<4x1x16xf32>
    %136 = arith.maximumf %134, %135 : vector<4x1x16xf32>
    %137 = vector.extract_strided_slice %115 {offsets = [0, 14, 0], sizes = [4, 1, 16], strides = [1, 1, 1]} : vector<4x16x16xf32> to vector<4x1x16xf32>
    %138 = vector.extract_strided_slice %115 {offsets = [0, 15, 0], sizes = [4, 1, 16], strides = [1, 1, 1]} : vector<4x16x16xf32> to vector<4x1x16xf32>
    %139 = arith.maximumf %137, %138 : vector<4x1x16xf32>
    %140 = tpu.concatenate %118, %121, %124, %127, %130, %133, %136, %139 in 1 : vector<4x1x16xf32>, vector<4x1x16xf32>, vector<4x1x16xf32>, vector<4x1x16xf32>, vector<4x1x16xf32>, vector<4x1x16xf32>, vector<4x1x16xf32>, vector<4x1x16xf32> -> vector<4x8x16xf32>
    %141 = vector.extract_strided_slice %140 {offsets = [0, 0, 0], sizes = [4, 8, 1], strides = [1, 1, 1]} : vector<4x8x16xf32> to vector<4x8x1xf32>
    %142 = vector.extract_strided_slice %140 {offsets = [0, 0, 1], sizes = [4, 8, 1], strides = [1, 1, 1]} : vector<4x8x16xf32> to vector<4x8x1xf32>
    %143 = arith.maximumf %141, %142 : vector<4x8x1xf32>
    %144 = vector.extract_strided_slice %140 {offsets = [0, 0, 2], sizes = [4, 8, 1], strides = [1, 1, 1]} : vector<4x8x16xf32> to vector<4x8x1xf32>
    %145 = vector.extract_strided_slice %140 {offsets = [0, 0, 3], sizes = [4, 8, 1], strides = [1, 1, 1]} : vector<4x8x16xf32> to vector<4x8x1xf32>
    %146 = arith.maximumf %144, %145 : vector<4x8x1xf32>
    %147 = vector.extract_strided_slice %140 {offsets = [0, 0, 4], sizes = [4, 8, 1], strides = [1, 1, 1]} : vector<4x8x16xf32> to vector<4x8x1xf32>
    %148 = vector.extract_strided_slice %140 {offsets = [0, 0, 5], sizes = [4, 8, 1], strides = [1, 1, 1]} : vector<4x8x16xf32> to vector<4x8x1xf32>
    %149 = arith.maximumf %147, %148 : vector<4x8x1xf32>
    %150 = vector.extract_strided_slice %140 {offsets = [0, 0, 6], sizes = [4, 8, 1], strides = [1, 1, 1]} : vector<4x8x16xf32> to vector<4x8x1xf32>
    %151 = vector.extract_strided_slice %140 {offsets = [0, 0, 7], sizes = [4, 8, 1], strides = [1, 1, 1]} : vector<4x8x16xf32> to vector<4x8x1xf32>
    %152 = arith.maximumf %150, %151 : vector<4x8x1xf32>
    %153 = vector.extract_strided_slice %140 {offsets = [0, 0, 8], sizes = [4, 8, 1], strides = [1, 1, 1]} : vector<4x8x16xf32> to vector<4x8x1xf32>
    %154 = vector.extract_strided_slice %140 {offsets = [0, 0, 9], sizes = [4, 8, 1], strides = [1, 1, 1]} : vector<4x8x16xf32> to vector<4x8x1xf32>
    %155 = arith.maximumf %153, %154 : vector<4x8x1xf32>
    %156 = vector.extract_strided_slice %140 {offsets = [0, 0, 10], sizes = [4, 8, 1], strides = [1, 1, 1]} : vector<4x8x16xf32> to vector<4x8x1xf32>
    %157 = vector.extract_strided_slice %140 {offsets = [0, 0, 11], sizes = [4, 8, 1], strides = [1, 1, 1]} : vector<4x8x16xf32> to vector<4x8x1xf32>
    %158 = arith.maximumf %156, %157 : vector<4x8x1xf32>
    %159 = vector.extract_strided_slice %140 {offsets = [0, 0, 12], sizes = [4, 8, 1], strides = [1, 1, 1]} : vector<4x8x16xf32> to vector<4x8x1xf32>
    %160 = vector.extract_strided_slice %140 {offsets = [0, 0, 13], sizes = [4, 8, 1], strides = [1, 1, 1]} : vector<4x8x16xf32> to vector<4x8x1xf32>
    %161 = arith.maximumf %159, %160 : vector<4x8x1xf32>
    %162 = vector.extract_strided_slice %140 {offsets = [0, 0, 14], sizes = [4, 8, 1], strides = [1, 1, 1]} : vector<4x8x16xf32> to vector<4x8x1xf32>
    %163 = vector.extract_strided_slice %140 {offsets = [0, 0, 15], sizes = [4, 8, 1], strides = [1, 1, 1]} : vector<4x8x16xf32> to vector<4x8x1xf32>
    %164 = arith.maximumf %162, %163 : vector<4x8x1xf32>
    %165 = tpu.concatenate %143, %146, %149, %152, %155, %158, %161, %164 in 2 : vector<4x8x1xf32>, vector<4x8x1xf32>, vector<4x8x1xf32>, vector<4x8x1xf32>, vector<4x8x1xf32>, vector<4x8x1xf32>, vector<4x8x1xf32>, vector<4x8x1xf32> -> vector<4x8x8xf32>
    %cst_67 = arith.constant 0.000000e+00 : f32
    %166 = vector.broadcast %cst_67 : f32 to vector<4x10x10xf32>
    %c0_68 = arith.constant 0 : index
    %c0_69 = arith.constant 0 : index
    %c0_70 = arith.constant 0 : index
    %167 = vector.load %arg11[%c0_68, %c0_69, %c0_70] : memref<4x10x10xf32, #tpu.memory_space<vmem>>, vector<4x10x10xf32>
    tpu.vector_store %arg11[%c0_68, %c0_69, %c0_70], %166 {strides = array<i32>} : memref<4x10x10xf32, #tpu.memory_space<vmem>>, vector<4x10x10xf32>,
    %c0_71 = arith.constant 0 : index
    %c1_72 = arith.constant 1 : index
    %c1_73 = arith.constant 1 : index
    %168 = vector.load %arg11[%c0_71, %c1_72, %c1_73] : memref<4x10x10xf32, #tpu.memory_space<vmem>>, vector<4x8x8xf32>
    tpu.vector_store %arg11[%c0_71, %c1_72, %c1_73], %165 {strides = array<i32>} : memref<4x10x10xf32, #tpu.memory_space<vmem>>, vector<4x8x8xf32>,
    %cst_74 = arith.constant 0.000000e+00 : f32
    %169 = vector.broadcast %cst_74 : f32 to vector<4x8x8xf32>
    %c0_75 = arith.constant 0 : index
    %c0_76 = arith.constant 0 : index
    %c0_77 = arith.constant 0 : index
    %170 = vector.load %arg11[%c0_75, %c0_76, %c0_77] : memref<4x10x10xf32, #tpu.memory_space<vmem>>, vector<1x8x8xf32>
    %171 = vector.shape_cast %170 : vector<1x8x8xf32> to vector<8x8xf32>
    %172 = vector.extract_strided_slice %1 {offsets = [0, 0, 0, 0], sizes = [4, 1, 1, 1], strides = [1, 1, 1, 1]} : vector<4x4x3x3xf32> to vector<4x1x1x1xf32>
    %173 = vector.shape_cast %172 : vector<4x1x1x1xf32> to vector<4x1x1xf32>
    %174 = vector.shape_cast %171 : vector<8x8xf32> to vector<1x8x8xf32>
    %175 = vector.broadcast %173 : vector<4x1x1xf32> to vector<4x8x8xf32>
    %176 = vector.broadcast %174 : vector<1x8x8xf32> to vector<4x8x8xf32>
    %177 = arith.mulf %175, %176 : vector<4x8x8xf32>
    %178 = arith.addf %169, %177 : vector<4x8x8xf32>
    %c0_78 = arith.constant 0 : index
    %c0_79 = arith.constant 0 : index
    %c1_80 = arith.constant 1 : index
    %179 = vector.load %arg11[%c0_78, %c0_79, %c1_80] : memref<4x10x10xf32, #tpu.memory_space<vmem>>, vector<1x8x8xf32>
    %180 = vector.shape_cast %179 : vector<1x8x8xf32> to vector<8x8xf32>
    %181 = vector.extract_strided_slice %1 {offsets = [0, 0, 0, 1], sizes = [4, 1, 1, 1], strides = [1, 1, 1, 1]} : vector<4x4x3x3xf32> to vector<4x1x1x1xf32>
    %182 = vector.shape_cast %181 : vector<4x1x1x1xf32> to vector<4x1x1xf32>
    %183 = vector.shape_cast %180 : vector<8x8xf32> to vector<1x8x8xf32>
    %184 = vector.broadcast %182 : vector<4x1x1xf32> to vector<4x8x8xf32>
    %185 = vector.broadcast %183 : vector<1x8x8xf32> to vector<4x8x8xf32>
    %186 = arith.mulf %184, %185 : vector<4x8x8xf32>
    %187 = arith.addf %178, %186 : vector<4x8x8xf32>
    %c0_81 = arith.constant 0 : index
    %c0_82 = arith.constant 0 : index
    %c2_83 = arith.constant 2 : index
    %188 = vector.load %arg11[%c0_81, %c0_82, %c2_83] : memref<4x10x10xf32, #tpu.memory_space<vmem>>, vector<1x8x8xf32>
    %189 = vector.shape_cast %188 : vector<1x8x8xf32> to vector<8x8xf32>
    %190 = vector.extract_strided_slice %1 {offsets = [0, 0, 0, 2], sizes = [4, 1, 1, 1], strides = [1, 1, 1, 1]} : vector<4x4x3x3xf32> to vector<4x1x1x1xf32>
    %191 = vector.shape_cast %190 : vector<4x1x1x1xf32> to vector<4x1x1xf32>
    %192 = vector.shape_cast %189 : vector<8x8xf32> to vector<1x8x8xf32>
    %193 = vector.broadcast %191 : vector<4x1x1xf32> to vector<4x8x8xf32>
    %194 = vector.broadcast %192 : vector<1x8x8xf32> to vector<4x8x8xf32>
    %195 = arith.mulf %193, %194 : vector<4x8x8xf32>
    %196 = arith.addf %187, %195 : vector<4x8x8xf32>
    %c0_84 = arith.constant 0 : index
    %c1_85 = arith.constant 1 : index
    %c0_86 = arith.constant 0 : index
    %197 = vector.load %arg11[%c0_84, %c1_85, %c0_86] : memref<4x10x10xf32, #tpu.memory_space<vmem>>, vector<1x8x8xf32>
    %198 = vector.shape_cast %197 : vector<1x8x8xf32> to vector<8x8xf32>
    %199 = vector.extract_strided_slice %1 {offsets = [0, 0, 1, 0], sizes = [4, 1, 1, 1], strides = [1, 1, 1, 1]} : vector<4x4x3x3xf32> to vector<4x1x1x1xf32>
    %200 = vector.shape_cast %199 : vector<4x1x1x1xf32> to vector<4x1x1xf32>
    %201 = vector.shape_cast %198 : vector<8x8xf32> to vector<1x8x8xf32>
    %202 = vector.broadcast %200 : vector<4x1x1xf32> to vector<4x8x8xf32>
    %203 = vector.broadcast %201 : vector<1x8x8xf32> to vector<4x8x8xf32>
    %204 = arith.mulf %202, %203 : vector<4x8x8xf32>
    %205 = arith.addf %196, %204 : vector<4x8x8xf32>
    %c0_87 = arith.constant 0 : index
    %c1_88 = arith.constant 1 : index
    %c1_89 = arith.constant 1 : index
    %206 = vector.load %arg11[%c0_87, %c1_88, %c1_89] : memref<4x10x10xf32, #tpu.memory_space<vmem>>, vector<1x8x8xf32>
    %207 = vector.shape_cast %206 : vector<1x8x8xf32> to vector<8x8xf32>
    %208 = vector.extract_strided_slice %1 {offsets = [0, 0, 1, 1], sizes = [4, 1, 1, 1], strides = [1, 1, 1, 1]} : vector<4x4x3x3xf32> to vector<4x1x1x1xf32>
    %209 = vector.shape_cast %208 : vector<4x1x1x1xf32> to vector<4x1x1xf32>
    %210 = vector.shape_cast %207 : vector<8x8xf32> to vector<1x8x8xf32>
    %211 = vector.broadcast %209 : vector<4x1x1xf32> to vector<4x8x8xf32>
    %212 = vector.broadcast %210 : vector<1x8x8xf32> to vector<4x8x8xf32>
    %213 = arith.mulf %211, %212 : vector<4x8x8xf32>
    %214 = arith.addf %205, %213 : vector<4x8x8xf32>
    %c0_90 = arith.constant 0 : index
    %c1_91 = arith.constant 1 : index
    %c2_92 = arith.constant 2 : index
    %215 = vector.load %arg11[%c0_90, %c1_91, %c2_92] : memref<4x10x10xf32, #tpu.memory_space<vmem>>, vector<1x8x8xf32>
    %216 = vector.shape_cast %215 : vector<1x8x8xf32> to vector<8x8xf32>
    %217 = vector.extract_strided_slice %1 {offsets = [0, 0, 1, 2], sizes = [4, 1, 1, 1], strides = [1, 1, 1, 1]} : vector<4x4x3x3xf32> to vector<4x1x1x1xf32>
    %218 = vector.shape_cast %217 : vector<4x1x1x1xf32> to vector<4x1x1xf32>
    %219 = vector.shape_cast %216 : vector<8x8xf32> to vector<1x8x8xf32>
    %220 = vector.broadcast %218 : vector<4x1x1xf32> to vector<4x8x8xf32>
    %221 = vector.broadcast %219 : vector<1x8x8xf32> to vector<4x8x8xf32>
    %222 = arith.mulf %220, %221 : vector<4x8x8xf32>
    %223 = arith.addf %214, %222 : vector<4x8x8xf32>
    %c0_93 = arith.constant 0 : index
    %c2_94 = arith.constant 2 : index
    %c0_95 = arith.constant 0 : index
    %224 = vector.load %arg11[%c0_93, %c2_94, %c0_95] : memref<4x10x10xf32, #tpu.memory_space<vmem>>, vector<1x8x8xf32>
    %225 = vector.shape_cast %224 : vector<1x8x8xf32> to vector<8x8xf32>
    %226 = vector.extract_strided_slice %1 {offsets = [0, 0, 2, 0], sizes = [4, 1, 1, 1], strides = [1, 1, 1, 1]} : vector<4x4x3x3xf32> to vector<4x1x1x1xf32>
    %227 = vector.shape_cast %226 : vector<4x1x1x1xf32> to vector<4x1x1xf32>
    %228 = vector.shape_cast %225 : vector<8x8xf32> to vector<1x8x8xf32>
    %229 = vector.broadcast %227 : vector<4x1x1xf32> to vector<4x8x8xf32>
    %230 = vector.broadcast %228 : vector<1x8x8xf32> to vector<4x8x8xf32>
    %231 = arith.mulf %229, %230 : vector<4x8x8xf32>
    %232 = arith.addf %223, %231 : vector<4x8x8xf32>
    %c0_96 = arith.constant 0 : index
    %c2_97 = arith.constant 2 : index
    %c1_98 = arith.constant 1 : index
    %233 = vector.load %arg11[%c0_96, %c2_97, %c1_98] : memref<4x10x10xf32, #tpu.memory_space<vmem>>, vector<1x8x8xf32>
    %234 = vector.shape_cast %233 : vector<1x8x8xf32> to vector<8x8xf32>
    %235 = vector.extract_strided_slice %1 {offsets = [0, 0, 2, 1], sizes = [4, 1, 1, 1], strides = [1, 1, 1, 1]} : vector<4x4x3x3xf32> to vector<4x1x1x1xf32>
    %236 = vector.shape_cast %235 : vector<4x1x1x1xf32> to vector<4x1x1xf32>
    %237 = vector.shape_cast %234 : vector<8x8xf32> to vector<1x8x8xf32>
    %238 = vector.broadcast %236 : vector<4x1x1xf32> to vector<4x8x8xf32>
    %239 = vector.broadcast %237 : vector<1x8x8xf32> to vector<4x8x8xf32>
    %240 = arith.mulf %238, %239 : vector<4x8x8xf32>
    %241 = arith.addf %232, %240 : vector<4x8x8xf32>
    %c0_99 = arith.constant 0 : index
    %c2_100 = arith.constant 2 : index
    %c2_101 = arith.constant 2 : index
    %242 = vector.load %arg11[%c0_99, %c2_100, %c2_101] : memref<4x10x10xf32, #tpu.memory_space<vmem>>, vector<1x8x8xf32>
    %243 = vector.shape_cast %242 : vector<1x8x8xf32> to vector<8x8xf32>
    %244 = vector.extract_strided_slice %1 {offsets = [0, 0, 2, 2], sizes = [4, 1, 1, 1], strides = [1, 1, 1, 1]} : vector<4x4x3x3xf32> to vector<4x1x1x1xf32>
    %245 = vector.shape_cast %244 : vector<4x1x1x1xf32> to vector<4x1x1xf32>
    %246 = vector.shape_cast %243 : vector<8x8xf32> to vector<1x8x8xf32>
    %247 = vector.broadcast %245 : vector<4x1x1xf32> to vector<4x8x8xf32>
    %248 = vector.broadcast %246 : vector<1x8x8xf32> to vector<4x8x8xf32>
    %249 = arith.mulf %247, %248 : vector<4x8x8xf32>
    %250 = arith.addf %241, %249 : vector<4x8x8xf32>
    %c1_102 = arith.constant 1 : index
    %c0_103 = arith.constant 0 : index
    %c0_104 = arith.constant 0 : index
    %251 = vector.load %arg11[%c1_102, %c0_103, %c0_104] : memref<4x10x10xf32, #tpu.memory_space<vmem>>, vector<1x8x8xf32>
    %252 = vector.shape_cast %251 : vector<1x8x8xf32> to vector<8x8xf32>
    %253 = vector.extract_strided_slice %1 {offsets = [0, 1, 0, 0], sizes = [4, 1, 1, 1], strides = [1, 1, 1, 1]} : vector<4x4x3x3xf32> to vector<4x1x1x1xf32>
    %254 = vector.shape_cast %253 : vector<4x1x1x1xf32> to vector<4x1x1xf32>
    %255 = vector.shape_cast %252 : vector<8x8xf32> to vector<1x8x8xf32>
    %256 = vector.broadcast %254 : vector<4x1x1xf32> to vector<4x8x8xf32>
    %257 = vector.broadcast %255 : vector<1x8x8xf32> to vector<4x8x8xf32>
    %258 = arith.mulf %256, %257 : vector<4x8x8xf32>
    %259 = arith.addf %250, %258 : vector<4x8x8xf32>
    %c1_105 = arith.constant 1 : index
    %c0_106 = arith.constant 0 : index
    %c1_107 = arith.constant 1 : index
    %260 = vector.load %arg11[%c1_105, %c0_106, %c1_107] : memref<4x10x10xf32, #tpu.memory_space<vmem>>, vector<1x8x8xf32>
    %261 = vector.shape_cast %260 : vector<1x8x8xf32> to vector<8x8xf32>
    %262 = vector.extract_strided_slice %1 {offsets = [0, 1, 0, 1], sizes = [4, 1, 1, 1], strides = [1, 1, 1, 1]} : vector<4x4x3x3xf32> to vector<4x1x1x1xf32>
    %263 = vector.shape_cast %262 : vector<4x1x1x1xf32> to vector<4x1x1xf32>
    %264 = vector.shape_cast %261 : vector<8x8xf32> to vector<1x8x8xf32>
    %265 = vector.broadcast %263 : vector<4x1x1xf32> to vector<4x8x8xf32>
    %266 = vector.broadcast %264 : vector<1x8x8xf32> to vector<4x8x8xf32>
    %267 = arith.mulf %265, %266 : vector<4x8x8xf32>
    %268 = arith.addf %259, %267 : vector<4x8x8xf32>
    %c1_108 = arith.constant 1 : index
    %c0_109 = arith.constant 0 : index
    %c2_110 = arith.constant 2 : index
    %269 = vector.load %arg11[%c1_108, %c0_109, %c2_110] : memref<4x10x10xf32, #tpu.memory_space<vmem>>, vector<1x8x8xf32>
    %270 = vector.shape_cast %269 : vector<1x8x8xf32> to vector<8x8xf32>
    %271 = vector.extract_strided_slice %1 {offsets = [0, 1, 0, 2], sizes = [4, 1, 1, 1], strides = [1, 1, 1, 1]} : vector<4x4x3x3xf32> to vector<4x1x1x1xf32>
    %272 = vector.shape_cast %271 : vector<4x1x1x1xf32> to vector<4x1x1xf32>
    %273 = vector.shape_cast %270 : vector<8x8xf32> to vector<1x8x8xf32>
    %274 = vector.broadcast %272 : vector<4x1x1xf32> to vector<4x8x8xf32>
    %275 = vector.broadcast %273 : vector<1x8x8xf32> to vector<4x8x8xf32>
    %276 = arith.mulf %274, %275 : vector<4x8x8xf32>
    %277 = arith.addf %268, %276 : vector<4x8x8xf32>
    %c1_111 = arith.constant 1 : index
    %c1_112 = arith.constant 1 : index
    %c0_113 = arith.constant 0 : index
    %278 = vector.load %arg11[%c1_111, %c1_112, %c0_113] : memref<4x10x10xf32, #tpu.memory_space<vmem>>, vector<1x8x8xf32>
    %279 = vector.shape_cast %278 : vector<1x8x8xf32> to vector<8x8xf32>
    %280 = vector.extract_strided_slice %1 {offsets = [0, 1, 1, 0], sizes = [4, 1, 1, 1], strides = [1, 1, 1, 1]} : vector<4x4x3x3xf32> to vector<4x1x1x1xf32>
    %281 = vector.shape_cast %280 : vector<4x1x1x1xf32> to vector<4x1x1xf32>
    %282 = vector.shape_cast %279 : vector<8x8xf32> to vector<1x8x8xf32>
    %283 = vector.broadcast %281 : vector<4x1x1xf32> to vector<4x8x8xf32>
    %284 = vector.broadcast %282 : vector<1x8x8xf32> to vector<4x8x8xf32>
    %285 = arith.mulf %283, %284 : vector<4x8x8xf32>
    %286 = arith.addf %277, %285 : vector<4x8x8xf32>
    %c1_114 = arith.constant 1 : index
    %c1_115 = arith.constant 1 : index
    %c1_116 = arith.constant 1 : index
    %287 = vector.load %arg11[%c1_114, %c1_115, %c1_116] : memref<4x10x10xf32, #tpu.memory_space<vmem>>, vector<1x8x8xf32>
    %288 = vector.shape_cast %287 : vector<1x8x8xf32> to vector<8x8xf32>
    %289 = vector.extract_strided_slice %1 {offsets = [0, 1, 1, 1], sizes = [4, 1, 1, 1], strides = [1, 1, 1, 1]} : vector<4x4x3x3xf32> to vector<4x1x1x1xf32>
    %290 = vector.shape_cast %289 : vector<4x1x1x1xf32> to vector<4x1x1xf32>
    %291 = vector.shape_cast %288 : vector<8x8xf32> to vector<1x8x8xf32>
    %292 = vector.broadcast %290 : vector<4x1x1xf32> to vector<4x8x8xf32>
    %293 = vector.broadcast %291 : vector<1x8x8xf32> to vector<4x8x8xf32>
    %294 = arith.mulf %292, %293 : vector<4x8x8xf32>
    %295 = arith.addf %286, %294 : vector<4x8x8xf32>
    %c1_117 = arith.constant 1 : index
    %c1_118 = arith.constant 1 : index
    %c2_119 = arith.constant 2 : index
    %296 = vector.load %arg11[%c1_117, %c1_118, %c2_119] : memref<4x10x10xf32, #tpu.memory_space<vmem>>, vector<1x8x8xf32>
    %297 = vector.shape_cast %296 : vector<1x8x8xf32> to vector<8x8xf32>
    %298 = vector.extract_strided_slice %1 {offsets = [0, 1, 1, 2], sizes = [4, 1, 1, 1], strides = [1, 1, 1, 1]} : vector<4x4x3x3xf32> to vector<4x1x1x1xf32>
    %299 = vector.shape_cast %298 : vector<4x1x1x1xf32> to vector<4x1x1xf32>
    %300 = vector.shape_cast %297 : vector<8x8xf32> to vector<1x8x8xf32>
    %301 = vector.broadcast %299 : vector<4x1x1xf32> to vector<4x8x8xf32>
    %302 = vector.broadcast %300 : vector<1x8x8xf32> to vector<4x8x8xf32>
    %303 = arith.mulf %301, %302 : vector<4x8x8xf32>
    %304 = arith.addf %295, %303 : vector<4x8x8xf32>
    %c1_120 = arith.constant 1 : index
    %c2_121 = arith.constant 2 : index
    %c0_122 = arith.constant 0 : index
    %305 = vector.load %arg11[%c1_120, %c2_121, %c0_122] : memref<4x10x10xf32, #tpu.memory_space<vmem>>, vector<1x8x8xf32>
    %306 = vector.shape_cast %305 : vector<1x8x8xf32> to vector<8x8xf32>
    %307 = vector.extract_strided_slice %1 {offsets = [0, 1, 2, 0], sizes = [4, 1, 1, 1], strides = [1, 1, 1, 1]} : vector<4x4x3x3xf32> to vector<4x1x1x1xf32>
    %308 = vector.shape_cast %307 : vector<4x1x1x1xf32> to vector<4x1x1xf32>
    %309 = vector.shape_cast %306 : vector<8x8xf32> to vector<1x8x8xf32>
    %310 = vector.broadcast %308 : vector<4x1x1xf32> to vector<4x8x8xf32>
    %311 = vector.broadcast %309 : vector<1x8x8xf32> to vector<4x8x8xf32>
    %312 = arith.mulf %310, %311 : vector<4x8x8xf32>
    %313 = arith.addf %304, %312 : vector<4x8x8xf32>
    %c1_123 = arith.constant 1 : index
    %c2_124 = arith.constant 2 : index
    %c1_125 = arith.constant 1 : index
    %314 = vector.load %arg11[%c1_123, %c2_124, %c1_125] : memref<4x10x10xf32, #tpu.memory_space<vmem>>, vector<1x8x8xf32>
    %315 = vector.shape_cast %314 : vector<1x8x8xf32> to vector<8x8xf32>
    %316 = vector.extract_strided_slice %1 {offsets = [0, 1, 2, 1], sizes = [4, 1, 1, 1], strides = [1, 1, 1, 1]} : vector<4x4x3x3xf32> to vector<4x1x1x1xf32>
    %317 = vector.shape_cast %316 : vector<4x1x1x1xf32> to vector<4x1x1xf32>
    %318 = vector.shape_cast %315 : vector<8x8xf32> to vector<1x8x8xf32>
    %319 = vector.broadcast %317 : vector<4x1x1xf32> to vector<4x8x8xf32>
    %320 = vector.broadcast %318 : vector<1x8x8xf32> to vector<4x8x8xf32>
    %321 = arith.mulf %319, %320 : vector<4x8x8xf32>
    %322 = arith.addf %313, %321 : vector<4x8x8xf32>
    %c1_126 = arith.constant 1 : index
    %c2_127 = arith.constant 2 : index
    %c2_128 = arith.constant 2 : index
    %323 = vector.load %arg11[%c1_126, %c2_127, %c2_128] : memref<4x10x10xf32, #tpu.memory_space<vmem>>, vector<1x8x8xf32>
    %324 = vector.shape_cast %323 : vector<1x8x8xf32> to vector<8x8xf32>
    %325 = vector.extract_strided_slice %1 {offsets = [0, 1, 2, 2], sizes = [4, 1, 1, 1], strides = [1, 1, 1, 1]} : vector<4x4x3x3xf32> to vector<4x1x1x1xf32>
    %326 = vector.shape_cast %325 : vector<4x1x1x1xf32> to vector<4x1x1xf32>
    %327 = vector.shape_cast %324 : vector<8x8xf32> to vector<1x8x8xf32>
    %328 = vector.broadcast %326 : vector<4x1x1xf32> to vector<4x8x8xf32>
    %329 = vector.broadcast %327 : vector<1x8x8xf32> to vector<4x8x8xf32>
    %330 = arith.mulf %328, %329 : vector<4x8x8xf32>
    %331 = arith.addf %322, %330 : vector<4x8x8xf32>
    %c2_129 = arith.constant 2 : index
    %c0_130 = arith.constant 0 : index
    %c0_131 = arith.constant 0 : index
    %332 = vector.load %arg11[%c2_129, %c0_130, %c0_131] : memref<4x10x10xf32, #tpu.memory_space<vmem>>, vector<1x8x8xf32>
    %333 = vector.shape_cast %332 : vector<1x8x8xf32> to vector<8x8xf32>
    %334 = vector.extract_strided_slice %1 {offsets = [0, 2, 0, 0], sizes = [4, 1, 1, 1], strides = [1, 1, 1, 1]} : vector<4x4x3x3xf32> to vector<4x1x1x1xf32>
    %335 = vector.shape_cast %334 : vector<4x1x1x1xf32> to vector<4x1x1xf32>
    %336 = vector.shape_cast %333 : vector<8x8xf32> to vector<1x8x8xf32>
    %337 = vector.broadcast %335 : vector<4x1x1xf32> to vector<4x8x8xf32>
    %338 = vector.broadcast %336 : vector<1x8x8xf32> to vector<4x8x8xf32>
    %339 = arith.mulf %337, %338 : vector<4x8x8xf32>
    %340 = arith.addf %331, %339 : vector<4x8x8xf32>
    %c2_132 = arith.constant 2 : index
    %c0_133 = arith.constant 0 : index
    %c1_134 = arith.constant 1 : index
    %341 = vector.load %arg11[%c2_132, %c0_133, %c1_134] : memref<4x10x10xf32, #tpu.memory_space<vmem>>, vector<1x8x8xf32>
    %342 = vector.shape_cast %341 : vector<1x8x8xf32> to vector<8x8xf32>
    %343 = vector.extract_strided_slice %1 {offsets = [0, 2, 0, 1], sizes = [4, 1, 1, 1], strides = [1, 1, 1, 1]} : vector<4x4x3x3xf32> to vector<4x1x1x1xf32>
    %344 = vector.shape_cast %343 : vector<4x1x1x1xf32> to vector<4x1x1xf32>
    %345 = vector.shape_cast %342 : vector<8x8xf32> to vector<1x8x8xf32>
    %346 = vector.broadcast %344 : vector<4x1x1xf32> to vector<4x8x8xf32>
    %347 = vector.broadcast %345 : vector<1x8x8xf32> to vector<4x8x8xf32>
    %348 = arith.mulf %346, %347 : vector<4x8x8xf32>
    %349 = arith.addf %340, %348 : vector<4x8x8xf32>
    %c2_135 = arith.constant 2 : index
    %c0_136 = arith.constant 0 : index
    %c2_137 = arith.constant 2 : index
    %350 = vector.load %arg11[%c2_135, %c0_136, %c2_137] : memref<4x10x10xf32, #tpu.memory_space<vmem>>, vector<1x8x8xf32>
    %351 = vector.shape_cast %350 : vector<1x8x8xf32> to vector<8x8xf32>
    %352 = vector.extract_strided_slice %1 {offsets = [0, 2, 0, 2], sizes = [4, 1, 1, 1], strides = [1, 1, 1, 1]} : vector<4x4x3x3xf32> to vector<4x1x1x1xf32>
    %353 = vector.shape_cast %352 : vector<4x1x1x1xf32> to vector<4x1x1xf32>
    %354 = vector.shape_cast %351 : vector<8x8xf32> to vector<1x8x8xf32>
    %355 = vector.broadcast %353 : vector<4x1x1xf32> to vector<4x8x8xf32>
    %356 = vector.broadcast %354 : vector<1x8x8xf32> to vector<4x8x8xf32>
    %357 = arith.mulf %355, %356 : vector<4x8x8xf32>
    %358 = arith.addf %349, %357 : vector<4x8x8xf32>
    %c2_138 = arith.constant 2 : index
    %c1_139 = arith.constant 1 : index
    %c0_140 = arith.constant 0 : index
    %359 = vector.load %arg11[%c2_138, %c1_139, %c0_140] : memref<4x10x10xf32, #tpu.memory_space<vmem>>, vector<1x8x8xf32>
    %360 = vector.shape_cast %359 : vector<1x8x8xf32> to vector<8x8xf32>
    %361 = vector.extract_strided_slice %1 {offsets = [0, 2, 1, 0], sizes = [4, 1, 1, 1], strides = [1, 1, 1, 1]} : vector<4x4x3x3xf32> to vector<4x1x1x1xf32>
    %362 = vector.shape_cast %361 : vector<4x1x1x1xf32> to vector<4x1x1xf32>
    %363 = vector.shape_cast %360 : vector<8x8xf32> to vector<1x8x8xf32>
    %364 = vector.broadcast %362 : vector<4x1x1xf32> to vector<4x8x8xf32>
    %365 = vector.broadcast %363 : vector<1x8x8xf32> to vector<4x8x8xf32>
    %366 = arith.mulf %364, %365 : vector<4x8x8xf32>
    %367 = arith.addf %358, %366 : vector<4x8x8xf32>
    %c2_141 = arith.constant 2 : index
    %c1_142 = arith.constant 1 : index
    %c1_143 = arith.constant 1 : index
    %368 = vector.load %arg11[%c2_141, %c1_142, %c1_143] : memref<4x10x10xf32, #tpu.memory_space<vmem>>, vector<1x8x8xf32>
    %369 = vector.shape_cast %368 : vector<1x8x8xf32> to vector<8x8xf32>
    %370 = vector.extract_strided_slice %1 {offsets = [0, 2, 1, 1], sizes = [4, 1, 1, 1], strides = [1, 1, 1, 1]} : vector<4x4x3x3xf32> to vector<4x1x1x1xf32>
    %371 = vector.shape_cast %370 : vector<4x1x1x1xf32> to vector<4x1x1xf32>
    %372 = vector.shape_cast %369 : vector<8x8xf32> to vector<1x8x8xf32>
    %373 = vector.broadcast %371 : vector<4x1x1xf32> to vector<4x8x8xf32>
    %374 = vector.broadcast %372 : vector<1x8x8xf32> to vector<4x8x8xf32>
    %375 = arith.mulf %373, %374 : vector<4x8x8xf32>
    %376 = arith.addf %367, %375 : vector<4x8x8xf32>
    %c2_144 = arith.constant 2 : index
    %c1_145 = arith.constant 1 : index
    %c2_146 = arith.constant 2 : index
    %377 = vector.load %arg11[%c2_144, %c1_145, %c2_146] : memref<4x10x10xf32, #tpu.memory_space<vmem>>, vector<1x8x8xf32>
    %378 = vector.shape_cast %377 : vector<1x8x8xf32> to vector<8x8xf32>
    %379 = vector.extract_strided_slice %1 {offsets = [0, 2, 1, 2], sizes = [4, 1, 1, 1], strides = [1, 1, 1, 1]} : vector<4x4x3x3xf32> to vector<4x1x1x1xf32>
    %380 = vector.shape_cast %379 : vector<4x1x1x1xf32> to vector<4x1x1xf32>
    %381 = vector.shape_cast %378 : vector<8x8xf32> to vector<1x8x8xf32>
    %382 = vector.broadcast %380 : vector<4x1x1xf32> to vector<4x8x8xf32>
    %383 = vector.broadcast %381 : vector<1x8x8xf32> to vector<4x8x8xf32>
    %384 = arith.mulf %382, %383 : vector<4x8x8xf32>
    %385 = arith.addf %376, %384 : vector<4x8x8xf32>
    %c2_147 = arith.constant 2 : index
    %c2_148 = arith.constant 2 : index
    %c0_149 = arith.constant 0 : index
    %386 = vector.load %arg11[%c2_147, %c2_148, %c0_149] : memref<4x10x10xf32, #tpu.memory_space<vmem>>, vector<1x8x8xf32>
    %387 = vector.shape_cast %386 : vector<1x8x8xf32> to vector<8x8xf32>
    %388 = vector.extract_strided_slice %1 {offsets = [0, 2, 2, 0], sizes = [4, 1, 1, 1], strides = [1, 1, 1, 1]} : vector<4x4x3x3xf32> to vector<4x1x1x1xf32>
    %389 = vector.shape_cast %388 : vector<4x1x1x1xf32> to vector<4x1x1xf32>
    %390 = vector.shape_cast %387 : vector<8x8xf32> to vector<1x8x8xf32>
    %391 = vector.broadcast %389 : vector<4x1x1xf32> to vector<4x8x8xf32>
    %392 = vector.broadcast %390 : vector<1x8x8xf32> to vector<4x8x8xf32>
    %393 = arith.mulf %391, %392 : vector<4x8x8xf32>
    %394 = arith.addf %385, %393 : vector<4x8x8xf32>
    %c2_150 = arith.constant 2 : index
    %c2_151 = arith.constant 2 : index
    %c1_152 = arith.constant 1 : index
    %395 = vector.load %arg11[%c2_150, %c2_151, %c1_152] : memref<4x10x10xf32, #tpu.memory_space<vmem>>, vector<1x8x8xf32>
    %396 = vector.shape_cast %395 : vector<1x8x8xf32> to vector<8x8xf32>
    %397 = vector.extract_strided_slice %1 {offsets = [0, 2, 2, 1], sizes = [4, 1, 1, 1], strides = [1, 1, 1, 1]} : vector<4x4x3x3xf32> to vector<4x1x1x1xf32>
    %398 = vector.shape_cast %397 : vector<4x1x1x1xf32> to vector<4x1x1xf32>
    %399 = vector.shape_cast %396 : vector<8x8xf32> to vector<1x8x8xf32>
    %400 = vector.broadcast %398 : vector<4x1x1xf32> to vector<4x8x8xf32>
    %401 = vector.broadcast %399 : vector<1x8x8xf32> to vector<4x8x8xf32>
    %402 = arith.mulf %400, %401 : vector<4x8x8xf32>
    %403 = arith.addf %394, %402 : vector<4x8x8xf32>
    %c2_153 = arith.constant 2 : index
    %c2_154 = arith.constant 2 : index
    %c2_155 = arith.constant 2 : index
    %404 = vector.load %arg11[%c2_153, %c2_154, %c2_155] : memref<4x10x10xf32, #tpu.memory_space<vmem>>, vector<1x8x8xf32>
    %405 = vector.shape_cast %404 : vector<1x8x8xf32> to vector<8x8xf32>
    %406 = vector.extract_strided_slice %1 {offsets = [0, 2, 2, 2], sizes = [4, 1, 1, 1], strides = [1, 1, 1, 1]} : vector<4x4x3x3xf32> to vector<4x1x1x1xf32>
    %407 = vector.shape_cast %406 : vector<4x1x1x1xf32> to vector<4x1x1xf32>
    %408 = vector.shape_cast %405 : vector<8x8xf32> to vector<1x8x8xf32>
    %409 = vector.broadcast %407 : vector<4x1x1xf32> to vector<4x8x8xf32>
    %410 = vector.broadcast %408 : vector<1x8x8xf32> to vector<4x8x8xf32>
    %411 = arith.mulf %409, %410 : vector<4x8x8xf32>
    %412 = arith.addf %403, %411 : vector<4x8x8xf32>
    %c3 = arith.constant 3 : index
    %c0_156 = arith.constant 0 : index
    %c0_157 = arith.constant 0 : index
    %413 = vector.load %arg11[%c3, %c0_156, %c0_157] : memref<4x10x10xf32, #tpu.memory_space<vmem>>, vector<1x8x8xf32>
    %414 = vector.shape_cast %413 : vector<1x8x8xf32> to vector<8x8xf32>
    %415 = vector.extract_strided_slice %1 {offsets = [0, 3, 0, 0], sizes = [4, 1, 1, 1], strides = [1, 1, 1, 1]} : vector<4x4x3x3xf32> to vector<4x1x1x1xf32>
    %416 = vector.shape_cast %415 : vector<4x1x1x1xf32> to vector<4x1x1xf32>
    %417 = vector.shape_cast %414 : vector<8x8xf32> to vector<1x8x8xf32>
    %418 = vector.broadcast %416 : vector<4x1x1xf32> to vector<4x8x8xf32>
    %419 = vector.broadcast %417 : vector<1x8x8xf32> to vector<4x8x8xf32>
    %420 = arith.mulf %418, %419 : vector<4x8x8xf32>
    %421 = arith.addf %412, %420 : vector<4x8x8xf32>
    %c3_158 = arith.constant 3 : index
    %c0_159 = arith.constant 0 : index
    %c1_160 = arith.constant 1 : index
    %422 = vector.load %arg11[%c3_158, %c0_159, %c1_160] : memref<4x10x10xf32, #tpu.memory_space<vmem>>, vector<1x8x8xf32>
    %423 = vector.shape_cast %422 : vector<1x8x8xf32> to vector<8x8xf32>
    %424 = vector.extract_strided_slice %1 {offsets = [0, 3, 0, 1], sizes = [4, 1, 1, 1], strides = [1, 1, 1, 1]} : vector<4x4x3x3xf32> to vector<4x1x1x1xf32>
    %425 = vector.shape_cast %424 : vector<4x1x1x1xf32> to vector<4x1x1xf32>
    %426 = vector.shape_cast %423 : vector<8x8xf32> to vector<1x8x8xf32>
    %427 = vector.broadcast %425 : vector<4x1x1xf32> to vector<4x8x8xf32>
    %428 = vector.broadcast %426 : vector<1x8x8xf32> to vector<4x8x8xf32>
    %429 = arith.mulf %427, %428 : vector<4x8x8xf32>
    %430 = arith.addf %421, %429 : vector<4x8x8xf32>
    %c3_161 = arith.constant 3 : index
    %c0_162 = arith.constant 0 : index
    %c2_163 = arith.constant 2 : index
    %431 = vector.load %arg11[%c3_161, %c0_162, %c2_163] : memref<4x10x10xf32, #tpu.memory_space<vmem>>, vector<1x8x8xf32>
    %432 = vector.shape_cast %431 : vector<1x8x8xf32> to vector<8x8xf32>
    %433 = vector.extract_strided_slice %1 {offsets = [0, 3, 0, 2], sizes = [4, 1, 1, 1], strides = [1, 1, 1, 1]} : vector<4x4x3x3xf32> to vector<4x1x1x1xf32>
    %434 = vector.shape_cast %433 : vector<4x1x1x1xf32> to vector<4x1x1xf32>
    %435 = vector.shape_cast %432 : vector<8x8xf32> to vector<1x8x8xf32>
    %436 = vector.broadcast %434 : vector<4x1x1xf32> to vector<4x8x8xf32>
    %437 = vector.broadcast %435 : vector<1x8x8xf32> to vector<4x8x8xf32>
    %438 = arith.mulf %436, %437 : vector<4x8x8xf32>
    %439 = arith.addf %430, %438 : vector<4x8x8xf32>
    %c3_164 = arith.constant 3 : index
    %c1_165 = arith.constant 1 : index
    %c0_166 = arith.constant 0 : index
    %440 = vector.load %arg11[%c3_164, %c1_165, %c0_166] : memref<4x10x10xf32, #tpu.memory_space<vmem>>, vector<1x8x8xf32>
    %441 = vector.shape_cast %440 : vector<1x8x8xf32> to vector<8x8xf32>
    %442 = vector.extract_strided_slice %1 {offsets = [0, 3, 1, 0], sizes = [4, 1, 1, 1], strides = [1, 1, 1, 1]} : vector<4x4x3x3xf32> to vector<4x1x1x1xf32>
    %443 = vector.shape_cast %442 : vector<4x1x1x1xf32> to vector<4x1x1xf32>
    %444 = vector.shape_cast %441 : vector<8x8xf32> to vector<1x8x8xf32>
    %445 = vector.broadcast %443 : vector<4x1x1xf32> to vector<4x8x8xf32>
    %446 = vector.broadcast %444 : vector<1x8x8xf32> to vector<4x8x8xf32>
    %447 = arith.mulf %445, %446 : vector<4x8x8xf32>
    %448 = arith.addf %439, %447 : vector<4x8x8xf32>
    %c3_167 = arith.constant 3 : index
    %c1_168 = arith.constant 1 : index
    %c1_169 = arith.constant 1 : index
    %449 = vector.load %arg11[%c3_167, %c1_168, %c1_169] : memref<4x10x10xf32, #tpu.memory_space<vmem>>, vector<1x8x8xf32>
    %450 = vector.shape_cast %449 : vector<1x8x8xf32> to vector<8x8xf32>
    %451 = vector.extract_strided_slice %1 {offsets = [0, 3, 1, 1], sizes = [4, 1, 1, 1], strides = [1, 1, 1, 1]} : vector<4x4x3x3xf32> to vector<4x1x1x1xf32>
    %452 = vector.shape_cast %451 : vector<4x1x1x1xf32> to vector<4x1x1xf32>
    %453 = vector.shape_cast %450 : vector<8x8xf32> to vector<1x8x8xf32>
    %454 = vector.broadcast %452 : vector<4x1x1xf32> to vector<4x8x8xf32>
    %455 = vector.broadcast %453 : vector<1x8x8xf32> to vector<4x8x8xf32>
    %456 = arith.mulf %454, %455 : vector<4x8x8xf32>
    %457 = arith.addf %448, %456 : vector<4x8x8xf32>
    %c3_170 = arith.constant 3 : index
    %c1_171 = arith.constant 1 : index
    %c2_172 = arith.constant 2 : index
    %458 = vector.load %arg11[%c3_170, %c1_171, %c2_172] : memref<4x10x10xf32, #tpu.memory_space<vmem>>, vector<1x8x8xf32>
    %459 = vector.shape_cast %458 : vector<1x8x8xf32> to vector<8x8xf32>
    %460 = vector.extract_strided_slice %1 {offsets = [0, 3, 1, 2], sizes = [4, 1, 1, 1], strides = [1, 1, 1, 1]} : vector<4x4x3x3xf32> to vector<4x1x1x1xf32>
    %461 = vector.shape_cast %460 : vector<4x1x1x1xf32> to vector<4x1x1xf32>
    %462 = vector.shape_cast %459 : vector<8x8xf32> to vector<1x8x8xf32>
    %463 = vector.broadcast %461 : vector<4x1x1xf32> to vector<4x8x8xf32>
    %464 = vector.broadcast %462 : vector<1x8x8xf32> to vector<4x8x8xf32>
    %465 = arith.mulf %463, %464 : vector<4x8x8xf32>
    %466 = arith.addf %457, %465 : vector<4x8x8xf32>
    %c3_173 = arith.constant 3 : index
    %c2_174 = arith.constant 2 : index
    %c0_175 = arith.constant 0 : index
    %467 = vector.load %arg11[%c3_173, %c2_174, %c0_175] : memref<4x10x10xf32, #tpu.memory_space<vmem>>, vector<1x8x8xf32>
    %468 = vector.shape_cast %467 : vector<1x8x8xf32> to vector<8x8xf32>
    %469 = vector.extract_strided_slice %1 {offsets = [0, 3, 2, 0], sizes = [4, 1, 1, 1], strides = [1, 1, 1, 1]} : vector<4x4x3x3xf32> to vector<4x1x1x1xf32>
    %470 = vector.shape_cast %469 : vector<4x1x1x1xf32> to vector<4x1x1xf32>
    %471 = vector.shape_cast %468 : vector<8x8xf32> to vector<1x8x8xf32>
    %472 = vector.broadcast %470 : vector<4x1x1xf32> to vector<4x8x8xf32>
    %473 = vector.broadcast %471 : vector<1x8x8xf32> to vector<4x8x8xf32>
    %474 = arith.mulf %472, %473 : vector<4x8x8xf32>
    %475 = arith.addf %466, %474 : vector<4x8x8xf32>
    %c3_176 = arith.constant 3 : index
    %c2_177 = arith.constant 2 : index
    %c1_178 = arith.constant 1 : index
    %476 = vector.load %arg11[%c3_176, %c2_177, %c1_178] : memref<4x10x10xf32, #tpu.memory_space<vmem>>, vector<1x8x8xf32>
    %477 = vector.shape_cast %476 : vector<1x8x8xf32> to vector<8x8xf32>
    %478 = vector.extract_strided_slice %1 {offsets = [0, 3, 2, 1], sizes = [4, 1, 1, 1], strides = [1, 1, 1, 1]} : vector<4x4x3x3xf32> to vector<4x1x1x1xf32>
    %479 = vector.shape_cast %478 : vector<4x1x1x1xf32> to vector<4x1x1xf32>
    %480 = vector.shape_cast %477 : vector<8x8xf32> to vector<1x8x8xf32>
    %481 = vector.broadcast %479 : vector<4x1x1xf32> to vector<4x8x8xf32>
    %482 = vector.broadcast %480 : vector<1x8x8xf32> to vector<4x8x8xf32>
    %483 = arith.mulf %481, %482 : vector<4x8x8xf32>
    %484 = arith.addf %475, %483 : vector<4x8x8xf32>
    %c3_179 = arith.constant 3 : index
    %c2_180 = arith.constant 2 : index
    %c2_181 = arith.constant 2 : index
    %485 = vector.load %arg11[%c3_179, %c2_180, %c2_181] : memref<4x10x10xf32, #tpu.memory_space<vmem>>, vector<1x8x8xf32>
    %486 = vector.shape_cast %485 : vector<1x8x8xf32> to vector<8x8xf32>
    %487 = vector.extract_strided_slice %1 {offsets = [0, 3, 2, 2], sizes = [4, 1, 1, 1], strides = [1, 1, 1, 1]} : vector<4x4x3x3xf32> to vector<4x1x1x1xf32>
    %488 = vector.shape_cast %487 : vector<4x1x1x1xf32> to vector<4x1x1xf32>
    %489 = vector.shape_cast %486 : vector<8x8xf32> to vector<1x8x8xf32>
    %490 = vector.broadcast %488 : vector<4x1x1xf32> to vector<4x8x8xf32>
    %491 = vector.broadcast %489 : vector<1x8x8xf32> to vector<4x8x8xf32>
    %492 = arith.mulf %490, %491 : vector<4x8x8xf32>
    %493 = arith.addf %484, %492 : vector<4x8x8xf32>
    %494 = vector.broadcast %5 : vector<4x1x1xf32> to vector<4x8x8xf32>
    %495 = arith.addf %493, %494 : vector<4x8x8xf32>
    %cst_182 = arith.constant dense<0.000000e+00> : vector<4x8xf32>
    %496 = vector.multi_reduction <add>, %495, %cst_182 [2] : vector<4x8x8xf32> to vector<4x8xf32>
    %497 = vector.shape_cast %496 : vector<4x8xf32> to vector<4x8x1xf32>
    %cst_183 = arith.constant dense<0.000000e+00> : vector<4x1xf32>
    %498 = vector.multi_reduction <add>, %497, %cst_183 [1] : vector<4x8x1xf32> to vector<4x1xf32>
    %499 = vector.shape_cast %498 : vector<4x1xf32> to vector<4x1x1xf32>
    %cst_184 = arith.constant 6.400000e+01 : f32
    %500 = vector.broadcast %cst_184 : f32 to vector<4x1x1xf32>
    %501 = arith.divf %499, %500 : vector<4x1x1xf32>
    %502 = vector.broadcast %501 : vector<4x1x1xf32> to vector<4x8x8xf32>
    %503 = arith.subf %495, %502 : vector<4x8x8xf32>
    %504 = arith.mulf %503, %503 : vector<4x8x8xf32>
    %cst_185 = arith.constant dense<0.000000e+00> : vector<4x8xf32>
    %505 = vector.multi_reduction <add>, %504, %cst_185 [2] : vector<4x8x8xf32> to vector<4x8xf32>
    %506 = vector.shape_cast %505 : vector<4x8xf32> to vector<4x8x1xf32>
    %cst_186 = arith.constant dense<0.000000e+00> : vector<4x1xf32>
    %507 = vector.multi_reduction <add>, %506, %cst_186 [1] : vector<4x8x1xf32> to vector<4x1xf32>
    %508 = vector.shape_cast %507 : vector<4x1xf32> to vector<4x1x1xf32>
    %cst_187 = arith.constant 6.400000e+01 : f32
    %509 = vector.broadcast %cst_187 : f32 to vector<4x1x1xf32>
    %510 = arith.divf %508, %509 : vector<4x1x1xf32>
    %511 = vector.broadcast %6 : vector<4x1x1xf32> to vector<4x8x8xf32>
    %512 = arith.mulf %511, %503 : vector<4x8x8xf32>
    %cst_188 = arith.constant 9.99999974E-6 : f32
    %513 = vector.broadcast %cst_188 : f32 to vector<4x1x1xf32>
    %514 = arith.addf %510, %513 : vector<4x1x1xf32>
    %515 = math.rsqrt %514 : vector<4x1x1xf32>
    %516 = vector.broadcast %515 : vector<4x1x1xf32> to vector<4x8x8xf32>
    %517 = arith.mulf %512, %516 : vector<4x8x8xf32>
    %518 = vector.broadcast %7 : vector<4x1x1xf32> to vector<4x8x8xf32>
    %519 = arith.addf %517, %518 : vector<4x8x8xf32>
    %cst_189 = arith.constant 0.000000e+00 : f32
    %520 = vector.broadcast %cst_189 : f32 to vector<4x8x8xf32>
    %521 = arith.maximumf %519, %520 : vector<4x8x8xf32>
    %522 = vector.extract_strided_slice %521 {offsets = [0, 0, 0], sizes = [4, 1, 8], strides = [1, 1, 1]} : vector<4x8x8xf32> to vector<4x1x8xf32>
    %523 = vector.extract_strided_slice %521 {offsets = [0, 1, 0], sizes = [4, 1, 8], strides = [1, 1, 1]} : vector<4x8x8xf32> to vector<4x1x8xf32>
    %524 = arith.maximumf %522, %523 : vector<4x1x8xf32>
    %525 = vector.extract_strided_slice %521 {offsets = [0, 2, 0], sizes = [4, 1, 8], strides = [1, 1, 1]} : vector<4x8x8xf32> to vector<4x1x8xf32>
    %526 = vector.extract_strided_slice %521 {offsets = [0, 3, 0], sizes = [4, 1, 8], strides = [1, 1, 1]} : vector<4x8x8xf32> to vector<4x1x8xf32>
    %527 = arith.maximumf %525, %526 : vector<4x1x8xf32>
    %528 = vector.extract_strided_slice %521 {offsets = [0, 4, 0], sizes = [4, 1, 8], strides = [1, 1, 1]} : vector<4x8x8xf32> to vector<4x1x8xf32>
    %529 = vector.extract_strided_slice %521 {offsets = [0, 5, 0], sizes = [4, 1, 8], strides = [1, 1, 1]} : vector<4x8x8xf32> to vector<4x1x8xf32>
    %530 = arith.maximumf %528, %529 : vector<4x1x8xf32>
    %531 = vector.extract_strided_slice %521 {offsets = [0, 6, 0], sizes = [4, 1, 8], strides = [1, 1, 1]} : vector<4x8x8xf32> to vector<4x1x8xf32>
    %532 = vector.extract_strided_slice %521 {offsets = [0, 7, 0], sizes = [4, 1, 8], strides = [1, 1, 1]} : vector<4x8x8xf32> to vector<4x1x8xf32>
    %533 = arith.maximumf %531, %532 : vector<4x1x8xf32>
    %534 = tpu.concatenate %524, %527, %530, %533 in 1 : vector<4x1x8xf32>, vector<4x1x8xf32>, vector<4x1x8xf32>, vector<4x1x8xf32> -> vector<4x4x8xf32>
    %535 = vector.extract_strided_slice %534 {offsets = [0, 0, 0], sizes = [4, 4, 1], strides = [1, 1, 1]} : vector<4x4x8xf32> to vector<4x4x1xf32>
    %536 = vector.extract_strided_slice %534 {offsets = [0, 0, 1], sizes = [4, 4, 1], strides = [1, 1, 1]} : vector<4x4x8xf32> to vector<4x4x1xf32>
    %537 = arith.maximumf %535, %536 : vector<4x4x1xf32>
    %538 = vector.extract_strided_slice %534 {offsets = [0, 0, 2], sizes = [4, 4, 1], strides = [1, 1, 1]} : vector<4x4x8xf32> to vector<4x4x1xf32>
    %539 = vector.extract_strided_slice %534 {offsets = [0, 0, 3], sizes = [4, 4, 1], strides = [1, 1, 1]} : vector<4x4x8xf32> to vector<4x4x1xf32>
    %540 = arith.maximumf %538, %539 : vector<4x4x1xf32>
    %541 = vector.extract_strided_slice %534 {offsets = [0, 0, 4], sizes = [4, 4, 1], strides = [1, 1, 1]} : vector<4x4x8xf32> to vector<4x4x1xf32>
    %542 = vector.extract_strided_slice %534 {offsets = [0, 0, 5], sizes = [4, 4, 1], strides = [1, 1, 1]} : vector<4x4x8xf32> to vector<4x4x1xf32>
    %543 = arith.maximumf %541, %542 : vector<4x4x1xf32>
    %544 = vector.extract_strided_slice %534 {offsets = [0, 0, 6], sizes = [4, 4, 1], strides = [1, 1, 1]} : vector<4x4x8xf32> to vector<4x4x1xf32>
    %545 = vector.extract_strided_slice %534 {offsets = [0, 0, 7], sizes = [4, 4, 1], strides = [1, 1, 1]} : vector<4x4x8xf32> to vector<4x4x1xf32>
    %546 = arith.maximumf %544, %545 : vector<4x4x1xf32>
    %547 = tpu.concatenate %537, %540, %543, %546 in 2 : vector<4x4x1xf32>, vector<4x4x1xf32>, vector<4x4x1xf32>, vector<4x4x1xf32> -> vector<4x4x4xf32>
    %c0_190 = arith.constant 0 : index
    %c0_191 = arith.constant 0 : index
    %c0_192 = arith.constant 0 : index
    %548 = vector.load %arg9[%c0_190, %c0_191, %c0_192] : memref<4x4x4xf32, #tpu.memory_space<vmem>>, vector<4x4x4xf32>
    tpu.vector_store %arg9[%c0_190, %c0_191, %c0_192], %547 {strides = array<i32>} : memref<4x4x4xf32, #tpu.memory_space<vmem>>, vector<4x4x4xf32>,
    return
  }
}

</mosaic_0001>

<bundles_post_ra>
// kernel: tpu_custom_call.1
= control target key start
LH: loop header
LB: loop body
LE: loop exit
PB: predicated region body
PF: predicated region fallthrough
CT: control target
= control target key end

     0   :  { %s5377_s0 = inlined_call_operand.vmem [shape: f32[1,16,16], index: 0, kind: input, shape index: {}]   ;;  %s5378_s1 = inlined_call_operand.vmem [shape: f32[4,3,3], index: 1, kind: input, shape index: {}]   ;;  %s5379_s2 = inlined_call_operand.vmem [shape: f32[4,1,1], index: 2, kind: input, shape index: {}]   ;;  %s5380_s3 = inlined_call_operand.vmem [shape: f32[4,1,1], index: 3, kind: input, shape index: {}]   ;;  %s5381_s4 = inlined_call_operand.vmem [shape: f32[4,1,1], index: 4, kind: input, shape index: {}]   ;;  %s5382_s5 = inlined_call_operand.vmem [shape: f32[4,4,3,3], index: 5, kind: input, shape index: {}]   ;;  %s5383_s6 = inlined_call_operand.vmem [shape: f32[4,1,1], index: 6, kind: input, shape index: {}]   ;;  %s5384_s7 = inlined_call_operand.vmem [shape: f32[4,1,1], index: 7, kind: input, shape index: {}]   ;;  %s5385_s8 = inlined_call_operand.vmem [shape: f32[4,1,1], index: 8, kind: input, shape index: {}]   ;;  %s5386_s9 = inlined_call_operand.hbm [shape: f32[4,4,4], index: 9, kind: output, shape index: {}]  }
   0x1   :  { %5397 = sst [smem:[#allocation94_spill]] %s5384_s7 }
   0x2   :  { %5398 = sst [smem:[#allocation95_spill]] %s5385_s8 }
   0x3   :  { %5399 = sst [smem:[#allocation96_spill]] %s5386_s9 }
   0x4   :  { %v35_v0 = vld [vmem:[%s5378_s1 + $0x8] sm:$0x7]  ;;  %v33_v1 = vld [vmem:[%s5378_s1] sm:$0x7]  ;;  %s5391_s13 = smov 127  }
   0x5   :  { %133 = vrot.lane.b32.xlu1 %v35_v0, %s5391_s13  ;;  %129 = vrot.lane.b32.xlu0 %v33_v1, %s5391_s13  ;;  %v34_v2 = vld [vmem:[%s5378_s1 + $0x4] sm:$0x7]  ;;  %2954 = vpush %v33_v1  ;;  %v36_v3 = vld [vmem:[%s5378_s1 + $0xc] sm:$0x7] }
   0x6   :  { %2956 = vpush %v34_v2 }
   0x7   :  { %2958 = vpush %v35_v0 }
   0x8   :  { %14 = vsyncpa [#allocation5], 0  ;;  %2960 = vpush %v36_v3  ;;  %s5389_s18 = smov 126   ;;  %v268_v4 = vrot.slane %v34_v2, 1  ;;  %v267_v5 = vrot.slane %v33_v1, 1  ;;  %v270_v6 = vrot.slane %v36_v3, 1 }
   0x9   :  { %135 = vrot.lane.b32.xlu1 %v36_v3, %s5391_s13  ;;  %131 = vrot.lane.b32.xlu0 %v34_v2, %s5391_s13  ;;  %v269_v7 = vrot.slane %v35_v0, 1  ;;  %v3369_v8 = vmov 0   ;;  %v3458_v9 = vrot.slane %v34_v2, 2  ;;  %v3460_v10 = vrot.slane %v33_v1, 2  ;;  %v83_v14 = vld [vmem:[%s5377_s0 + $0x8] sm:$0xff]  ;;  %v82_v15 = vld [vmem:[%s5377_s0] sm:$0xff] }
   0xa   :  { %3327 = vset.pattern.permute.xlu0 %v3369_v8  ;;  %3328 = vset.pattern.permute.xlu1 %v3369_v8  ;;  %vm77_vm0 = vcmask 146432   ;;  %v3370_v11 = vmov 0.0   ;;  %vm80_vm1 = vcmask 140288   ;;  %v440_v12 = vrot.slane %v36_v3, 2  ;;  %s5387_s22 = smov 1   ;;  %s5401_s8 = smov 127  }
   0xb   :  { %79 = vst.msk [vmem:[#allocation2 + $0x8] sm:$0xff] %vm77_vm0, %v3370_v11  ;;  %78 = vst.msk [vmem:[#allocation2] sm:$0xff] %vm77_vm0, %v3370_v11  ;;  %v439_v13 = vrot.slane %v35_v0, 2  ;;  %v2930_v16 = vld [vmem:[%s5379_s2] ss:$0 sm:$0xff]  ;;  %vm92_vm2 = vcmask 138248  }
   0xc   :  { %81 = vst.msk [vmem:[#allocation2 + $0x10] sm:$0x3] %vm80_vm1, %v3370_v11  ;;  %v2932_v17 = vld [vmem:[%s5379_s2 + $0x2] ss:$0 sm:$0xff]  ;;  %v2931_v18 = vld [vmem:[%s5379_s2 + $0x1] ss:$0 sm:$0xff] }
   0xd   :  { %199 = vrot.lane.b32.xlu1 %v34_v2, %s5389_s18  ;;  %197 = vrot.lane.b32.xlu0 %v33_v1, %s5389_s18  ;;  %v2933_v19 = vld [vmem:[%s5379_s2 + $0x3] ss:$0 sm:$0xff]  ;;  %v3510_v46 = vld [vmem:[%s5382_s5] sm:$0x7]  ;;  %vm649_vm3 = vcmask 130048   ;;  %vm987_vm4 = vcmask 1040384  }
   0xe   :  { %v3515_v47 = vld [vmem:[%s5382_s5 + $0x10] sm:$0x7]  ;;  %v3523_v50 = vld [vmem:[%s5382_s5 + $0x20] sm:$0x7]  ;;  %vm992_vm5 = vcmask 1041408   ;;  %vm997_vm6 = vcmask 1042432  }
   0xf   :  { %v3531_v52 = vld [vmem:[%s5382_s5 + $0x30] sm:$0x7]  ;;  %vm1002_vm7 = vcmask 1043456   ;;  %vm1007_vm8 = vcmask 1044480   ;;  %vm1012_vm9 = vcmask 1045504   ;;  %vm1017_vm10 = vcmask 1046528  }
  0x10   :  { %vm1165_vm11 = vcmask 80896   ;;  %vm1167_vm12 = vcmask 74752   ;;  %vm1130_vm13 = vcmask 7168   ;;  %vm1135_vm14 = vcmask 15360  }
  0x11   :  { %203 = vrot.lane.b32.xlu1 %v36_v3, %s5389_s18  ;;  %201 = vrot.lane.b32.xlu0 %v35_v0, %s5389_s18  ;;  %1166 = vst.msk [vmem:[#allocation3] sm:$0xff] %vm1165_vm11, %v3370_v11  ;;  %1169 = vst.msk [vmem:[#allocation3 + $0x10] sm:$0xff] %vm1165_vm11, %v3370_v11  ;;  %vm1140_vm15 = vcmask 23552   ;;  %vm1145_vm0 = vcmask 31744   ;;  %vm1150_vm1 = vcmask 39936  }
  0x12   :  { %1168 = vst.msk [vmem:[#allocation3 + $0x8] sm:$0x3] %vm1167_vm12, %v3370_v11  ;;  %1170 = vst.msk [vmem:[#allocation3 + $0x18] sm:$0x3] %vm1167_vm12, %v3370_v11 }
  0x13   :  { %1171 = vst.msk [vmem:[#allocation3 + $0x20] sm:$0xff] %vm1165_vm11, %v3370_v11  ;;  %1173 = vst.msk [vmem:[#allocation3 + $0x30] sm:$0xff] %vm1165_vm11, %v3370_v11 }
  0x14   :  { %1172 = vst.msk [vmem:[#allocation3 + $0x28] sm:$0x3] %vm1167_vm12, %v3370_v11  ;;  %1174 = vst.msk [vmem:[#allocation3 + $0x38] sm:$0x3] %vm1167_vm12, %v3370_v11 }
  0x15   :  { %301 = vrot.lane.b32.xlu1 %v268_v4, %s5391_s13  ;;  %299 = vrot.lane.b32.xlu0 %v267_v5, %s5391_s13 }
  0x19   :  { %305 = vrot.lane.b32.xlu1 %v270_v6, %s5391_s13  ;;  %303 = vrot.lane.b32.xlu0 %v269_v7, %s5391_s13 }
  0x1d   :  { %369 = vrot.lane.b32.xlu1 %v268_v4, %s5389_s18  ;;  %367 = vrot.lane.b32.xlu0 %v267_v5, %s5389_s18 }
  0x21   :  { %373 = vrot.lane.b32.xlu1 %v270_v6, %s5389_s18  ;;  %371 = vrot.lane.b32.xlu0 %v269_v7, %s5389_s18 }
  0x25   :  { %471 = vrot.lane.b32.xlu1 %v3458_v9, %s5391_s13  ;;  %469 = vrot.lane.b32.xlu0 %v3460_v10, %s5391_s13 }
  0x29   :  { %475 = vrot.lane.b32.xlu1 %v440_v12, %s5391_s13  ;;  %473 = vrot.lane.b32.xlu0 %v439_v13, %s5391_s13 }
  0x2d   :  { %539 = vrot.lane.b32.xlu1 %v3458_v9, %s5389_s18  ;;  %537 = vrot.lane.b32.xlu0 %v3460_v10, %s5389_s18 }
  0x31   :  { %88 = vrot.lane.b32.xlu1 %v83_v14, %s5387_s22  ;;  %86 = vrot.lane.b32.xlu0 %v82_v15, %s5387_s22 }
  0x35   :  { %543 = vrot.lane.b32.xlu1 %v440_v12, %s5389_s18  ;;  %541 = vrot.lane.b32.xlu0 %v439_v13, %s5389_s18 }
  0x36   :  { %s3499_s2 = spop %2954 }
  0x37   :  { %s3501_s30 = spop %2956 }
  0x38   :  { %s3503_s10 = spop %2958 }
  0x39   :  { %626 = vperm.xlu0 %3327, %v2930_v16   ;;  %634 = vperm.xlu1 %3328, %v2932_v17   ;;  %s3505_s11 = spop %2960 }
  0x3d   :  { %630 = vperm.xlu0 %3327, %v2931_v18  }
  0x41   :  { %638 = vperm.xlu0 %3327, %v2933_v19  }
  0x77   :  { %v134_v20 = vpop.permute.xlu1 %133  ;;  %v130_v21 = vpop.permute.xlu0 %129 }
  0x78   :  { %2962 = vpush %v130_v21 }
  0x7b   :  { %v136_v22 = vpop.permute.xlu1 %135  ;;  %v132_v23 = vpop.permute.xlu0 %131 }
  0x7c   :  { %2964 = vpush %v132_v23 }
  0x7d   :  { %2966 = vpush %v134_v20 }
  0x7e   :  { %2968 = vpush %v136_v22 }
  0x7f   :  { %v200_v24 = vpop.permute.xlu1 %199  ;;  %v198_v25 = vpop.permute.xlu0 %197 }
  0x80   :  { %2970 = vpush %v198_v25 }
  0x81   :  { %2972 = vpush %v200_v24 }
  0x83   :  { %v204_v26 = vpop.permute.xlu1 %203  ;;  %v202_v27 = vpop.permute.xlu0 %201 }
  0x84   :  { %2974 = vpush %v202_v27 }
  0x85   :  { %2976 = vpush %v204_v26 }
  0x86   :  { %2978 = vpush %v267_v5 }
  0x87   :  { %2980 = vpush %v268_v4  ;;  %v302_v28 = vpop.permute.xlu1 %301  ;;  %v300_v29 = vpop.permute.xlu0 %299 }
  0x88   :  { %2982 = vpush %v269_v7 }
  0x89   :  { %2984 = vpush %v270_v6 }
  0x8a   :  { %2986 = vpush %v300_v29 }
  0x8b   :  { %2988 = vpush %v302_v28  ;;  %v306_v30 = vpop.permute.xlu1 %305  ;;  %v304_v31 = vpop.permute.xlu0 %303 }
  0x8c   :  { %2990 = vpush %v304_v31 }
  0x8d   :  { %2992 = vpush %v306_v30 }
  0x8f   :  { %v370_v32 = vpop.permute.xlu1 %369  ;;  %v368_v33 = vpop.permute.xlu0 %367 }
  0x90   :  { %2994 = vpush %v368_v33 }
  0x91   :  { %2996 = vpush %v370_v32 }
  0x93   :  { %v374_v34 = vpop.permute.xlu1 %373  ;;  %v372_v35 = vpop.permute.xlu0 %371 }
  0x94   :  { %2998 = vpush %v372_v35 }
  0x95   :  { %3000 = vpush %v374_v34 }
  0x96   :  { %3002 = vpush %v3460_v10 }
  0x97   :  { %3004 = vpush %v3458_v9  ;;  %v472_v36 = vpop.permute.xlu1 %471  ;;  %v470_v37 = vpop.permute.xlu0 %469 }
  0x98   :  { %3006 = vpush %v439_v13 }
  0x99   :  { %3008 = vpush %v440_v12 }
  0x9a   :  { %3010 = vpush %v470_v37 }
  0x9b   :  { %3012 = vpush %v472_v36  ;;  %v476_v38 = vpop.permute.xlu1 %475  ;;  %v474_v39 = vpop.permute.xlu0 %473 }
  0x9c   :  { %3014 = vpush %v474_v39 }
  0x9d   :  { %3016 = vpush %v476_v38 }
  0x9f   :  { %v540_v40 = vpop.permute.xlu1 %539  ;;  %v538_v41 = vpop.permute.xlu0 %537 }
  0xa0   :  { %3018 = vpush %v538_v41 }
  0xa1   :  { %3020 = vpush %v540_v40 }
  0xa3   :  { %v89_v42 = vpop.permute.xlu1 %88  ;;  %v87_v43 = vpop.permute.xlu0 %86 }
  0xa4   :  { %94 = vst.msk [vmem:[#allocation2 + $0x9] sm:$0xff] %vm92_vm2, %v89_v42  ;;  %93 = vst.msk [vmem:[#allocation2 + $0x1] sm:$0xff] %vm92_vm2, %v87_v43  ;;  %vm1155_vm2 = vcmask 48128  }
  0xa7   :  { %v544_v44 = vpop.permute.xlu1 %543  ;;  %v542_v45 = vpop.permute.xlu0 %541 }
  0xa8   :  { %3022 = vpush %v542_v45 }
  0xa9   :  { %3024 = vpush %v544_v44  ;;  %s2963_s12 = spop %2962 }
  0xaa   :  { %3026 = vpush %v3510_v46  ;;  %v138_v49 = vstv %s2963_s12 }
  0xab   :  { %v3518_v48 = vld [vmem:[#allocation2] sm:$0xff]  ;;  %3028 = vpush %v3515_v47  ;;  %v3526_v51 = vld [vmem:[#allocation2 + $0x8] sm:$0xff] }
  0xac   :  { %3030 = vpush %v3523_v50  ;;  %v149_v53 = vmul.f32 %v138_v49, %v3518_v48  ;;  %v150_v54 = vmul.f32 %v138_v49, %v3526_v51  ;;  %v3611_v14 = vld [vmem:[#allocation2 + $0x9] sm:$0xff]  ;;  %v3613_v15 = vld [vmem:[#allocation2 + $0x1] sm:$0xff] }
  0xad   :  { %s2965_s23 = spop %2964  ;;  %3032 = vpush %v3531_v52  ;;  %v3628_v23 = vld [vmem:[#allocation2 + $0x2] sm:$0xff]  ;;  %v3635_v27 = vld [vmem:[#allocation2 + $0xa] sm:$0xff] }
  0xae   :  { %s3537_s24 = spop %2966  ;;  %167 = vrot.lane.b32.xlu1 %v150_v54, %s5391_s13  ;;  %165 = vrot.lane.b32.xlu0 %v149_v53, %s5391_s13  ;;  %v141_v58 = vstv %s2965_s23 }
  0xaf   :  { %s3539_s25 = spop %2968  ;;  %v151_v59 = vmul.f32 %v141_v58, %v3518_v48  ;;  %v152_v60 = vmul.f32 %v141_v58, %v3526_v51  ;;  %v144_v0 = vstv %s3537_s24 }
  0xb0   :  { %v153_v1 = vmul.f32 %v144_v0, %v3518_v48  ;;  %v154_v2 = vmul.f32 %v144_v0, %v3526_v51  ;;  %v147_v6 = vstv %s3539_s25 }
  0xb1   :  { %s2971_s26 = spop %2970  ;;  %v155_v7 = vmul.f32 %v147_v6, %v3518_v48  ;;  %v156_v8 = vmul.f32 %v147_v6, %v3526_v51 }
  0xb2   :  { %v206_v55 = vstv %s2971_s26  ;;  %s2973_s0 = spop %2972 }
  0xb3   :  { %v217_v56 = vmul.f32 %v206_v55, %v3518_v48  ;;  %v218_v57 = vmul.f32 %v206_v55, %v3526_v51  ;;  %v209_v61 = vstv %s2973_s0 }
  0xb4   :  { %v219_v62 = vmul.f32 %v209_v61, %v3518_v48  ;;  %v220_v63 = vmul.f32 %v209_v61, %v3526_v51 }
  0xb5   :  { %s2975_s27 = spop %2974  ;;  %235 = vrot.lane.b32.xlu1 %v218_v57, %s5389_s18  ;;  %233 = vrot.lane.b32.xlu0 %v217_v56, %s5389_s18 }
  0xb6   :  { %s3547_s28 = spop %2976  ;;  %v212_v3 = vstv %s2975_s27 }
  0xb7   :  { %s3551_s29 = spop %2978  ;;  %v221_v4 = vmul.f32 %v212_v3, %v3518_v48  ;;  %v222_v5 = vmul.f32 %v212_v3, %v3526_v51  ;;  %v215_v9 = vstv %s3547_s28  ;;  %s5400_s28 = smov 126  }
  0xb8   :  { %s3553_s12 = spop %2980  ;;  %v223_v10 = vmul.f32 %v215_v9, %v3518_v48  ;;  %v224_v12 = vmul.f32 %v215_v9, %v3526_v51  ;;  %v3703_v9 = vpop.permute.xlu0 %626 }
  0xb9   :  { %s3555_s14 = spop %2982  ;;  %171 = vrot.lane.b32.xlu1 %v152_v60, %s5391_s13  ;;  %169 = vrot.lane.b32.xlu0 %v151_v59, %s5391_s13 }
  0xba   :  { %s3561_s15 = spop %2984 }
  0xbb   :  { %s3564_s16 = spop %2986 }
  0xbc   :  { %s3568_s17 = spop %2988  ;;  %v308_v13 = vstv %s3564_s16 }
  0xbd   :  { %239 = vrot.lane.b32.xlu1 %v220_v63, %s5389_s18  ;;  %237 = vrot.lane.b32.xlu0 %v219_v62, %s5389_s18  ;;  %s3572_s1 = spop %2990  ;;  %v319_v16 = vmul.f32 %v308_v13, %v3613_v15  ;;  %v320_v17 = vmul.f32 %v308_v13, %v3611_v14  ;;  %v311_v26 = vstv %s3568_s17  ;;  %v2939_v13 = vld [vmem:[%s5381_s4 + $0x1] ss:$0 sm:$0xff]  ;;  %s3375_s17 = smov 123  }
  0xbe   :  { %s3574_s19 = spop %2992  ;;  %v321_v28 = vmul.f32 %v311_v26, %v3613_v15  ;;  %v322_v34 = vmul.f32 %v311_v26, %v3611_v14  ;;  %v314_v39 = vstv %s3572_s1 }
  0xbf   :  { %v324_v40 = vmul.f32 %v314_v39, %v3611_v14  ;;  %v323_v49 = vmul.f32 %v314_v39, %v3613_v15  ;;  %v317_v57 = vstv %s3574_s19  ;;  %v3749_v39 = vrot.slane %v3515_v47, 1 }
  0xc0   :  { %v325_v58 = vmul.f32 %v317_v57, %v3613_v15  ;;  %v326_v0 = vmul.f32 %v317_v57, %v3611_v14 }
  0xc1   :  { %173 = vrot.lane.b32.xlu1 %v153_v1, %s5391_s13  ;;  %175 = vrot.lane.b32.xlu0 %v154_v2, %s5391_s13  ;;  %s3578_s20 = spop %2994 }
  0xc2   :  { %s3583_s21 = spop %2996  ;;  %v376_v18 = vstv %s3578_s20 }
  0xc3   :  { %v387_v19 = vmul.f32 %v376_v18, %v3613_v15  ;;  %v388_v20 = vmul.f32 %v376_v18, %v3611_v14  ;;  %v379_v30 = vstv %s3583_s21  ;;  %v2936_v18 = vld [vmem:[%s5380_s3 + $0x2] ss:$0 sm:$0xff] }
  0xc4   :  { %v389_v31 = vmul.f32 %v379_v30, %v3613_v15  ;;  %v390_v37 = vmul.f32 %v379_v30, %v3611_v14 }
  0xc5   :  { %s3585_s23 = spop %2998  ;;  %241 = vrot.lane.b32.xlu1 %v221_v4, %s5389_s18  ;;  %243 = vrot.lane.b32.xlu0 %v222_v5, %s5389_s18  ;;  %v2934_v5 = vld [vmem:[%s5380_s3] ss:$0 sm:$0xff] }
  0xc6   :  { %s3589_s24 = spop %3000  ;;  %v382_v42 = vstv %s3585_s23 }
  0xc7   :  { %s3593_s26 = spop %3002  ;;  %v392_v43 = vmul.f32 %v382_v42, %v3611_v14  ;;  %v391_v55 = vmul.f32 %v382_v42, %v3613_v15  ;;  %v385_v60 = vstv %s3589_s24 }
  0xc8   :  { %s3596_s0 = spop %3004  ;;  %v393_v61 = vmul.f32 %v385_v60, %v3613_v15  ;;  %v394_v3 = vmul.f32 %v385_v60, %v3611_v14 }
  0xc9   :  { %s3598_s25 = spop %3006  ;;  %179 = vrot.lane.b32.xlu1 %v156_v8, %s5391_s13  ;;  %177 = vrot.lane.b32.xlu0 %v155_v7, %s5391_s13  ;;  %v2935_v7 = vld [vmem:[%s5380_s3 + $0x1] ss:$0 sm:$0xff] }
  0xca   :  { %s3602_s27 = spop %3008 }
  0xcb   :  { %s3011_s22 = spop %3010 }
  0xcc   :  { %s3607_s18 = spop %3012  ;;  %v478_v21 = vstv %s3011_s22 }
  0xcd   :  { %247 = vrot.lane.b32.xlu1 %v224_v12, %s5400_s28  ;;  %245 = vrot.lane.b32.xlu0 %v223_v10, %s5400_s28  ;;  %s3615_s9 = spop %3014  ;;  %v489_v24 = vmul.f32 %v478_v21, %v3628_v23  ;;  %v490_v29 = vmul.f32 %v478_v21, %v3635_v27  ;;  %v481_v33 = vstv %s3607_s18  ;;  %v2938_v10 = vld [vmem:[%s5381_s4] ss:$0 sm:$0xff] }
  0xce   :  { %s3620_s13 = spop %3016  ;;  %v492_v35 = vmul.f32 %v481_v33, %v3635_v27  ;;  %v491_v41 = vmul.f32 %v481_v33, %v3628_v23  ;;  %v484_v45 = vstv %s3615_s9  ;;  %v2940_v12 = vld [vmem:[%s5381_s4 + $0x2] ss:$0 sm:$0xff]  ;;  %v2937_v21 = vld [vmem:[%s5380_s3 + $0x3] ss:$0 sm:$0xff] }
  0xcf   :  { %v493_v53 = vmul.f32 %v484_v45, %v3628_v23  ;;  %v494_v59 = vmul.f32 %v484_v45, %v3635_v27  ;;  %v487_v63 = vstv %s3620_s13  ;;  %s3374_s13 = smov 122  }
  0xd0   :  { %v496_v1 = vmul.f32 %v487_v63, %v3635_v27  ;;  %v495_v6 = vmul.f32 %v487_v63, %v3628_v23  ;;  %v3773_v63 = vrot.slane %v3510_v46, 1 }
  0xd1   :  { %s3019_s16 = spop %3018  ;;  %337 = vrot.lane.b32.xlu1 %v320_v17, %s5401_s8  ;;  %335 = vrot.lane.b32.xlu0 %v319_v16, %s5401_s8  ;;  %v2941_v16 = vld [vmem:[%s5381_s4 + $0x3] ss:$0 sm:$0xff]  ;;  %v3717_v17 = vpop.permute.xlu0 %630 }
  0xd2   :  { %v546_v22 = vstv %s3019_s16  ;;  %s3021_s22 = spop %3020 }
  0xd3   :  { %v557_v25 = vmul.f32 %v546_v22, %v3628_v23  ;;  %v558_v32 = vmul.f32 %v546_v22, %v3635_v27  ;;  %v549_v36 = vstv %s3021_s22  ;;  %v99_v22 = vstv %s3499_s2 }
  0xd4   :  { %v560_v38 = vmul.f32 %v549_v36, %v3635_v27  ;;  %v559_v44 = vmul.f32 %v549_v36, %v3628_v23  ;;  %v113_v26 = vmul.f32 %v99_v22, %v3518_v48 }
  0xd5   :  { %405 = vrot.lane.b32.xlu1 %v388_v20, %s5400_s28  ;;  %403 = vrot.lane.b32.xlu0 %v387_v19, %s5400_s28  ;;  %v3722_v19 = vpop.permute.xlu1 %634  ;;  %v3724_v20 = vpop.permute.xlu0 %638 }
  0xd9   :  { %505 = vrot.lane.b32.xlu1 %v489_v24, %s5401_s8  ;;  %573 = vrot.lane.b32.xlu0 %v557_v25, %s5400_s28  ;;  %s3023_s18 = spop %3022 }
  0xda   :  { %v552_v54 = vstv %s3023_s18  ;;  %s3025_s9 = spop %3024  ;;  %s3372_s18 = smov 124  }
  0xdb   :  { %v561_v56 = vmul.f32 %v552_v54, %v3628_v23  ;;  %v562_v62 = vmul.f32 %v552_v54, %v3635_v27  ;;  %v555_v2 = vstv %s3025_s9  ;;  %s5394_s9 = smov 125  }
  0xdc   :  { %v564_v4 = vmul.f32 %v555_v2, %v3635_v27  ;;  %v563_v8 = vmul.f32 %v555_v2, %v3628_v23 }
  0xdd   :  { %507 = vrot.lane.b32.xlu1 %v490_v29, %s5401_s8  ;;  %339 = vrot.lane.b32.xlu0 %v321_v28, %s5401_s8  ;;  %v114_v28 = vmul.f32 %v99_v22, %v3526_v51  ;;  %v272_v29 = vstv %s3551_s29 }
  0xe1   :  { %575 = vrot.lane.b32.xlu1 %v558_v32, %s5400_s28  ;;  %407 = vrot.lane.b32.xlu0 %v389_v31, %s5400_s28 }
  0xe5   :  { %341 = vrot.lane.b32.xlu1 %v322_v34, %s5401_s8  ;;  %511 = vrot.lane.b32.xlu0 %v492_v35, %s5401_s8  ;;  %v283_v34 = vmul.f32 %v272_v29, %v3613_v15  ;;  %v284_v35 = vmul.f32 %v272_v29, %v3611_v14 }
  0xe9   :  { %409 = vrot.lane.b32.xlu1 %v390_v37, %s5400_s28  ;;  %579 = vrot.lane.b32.xlu0 %v560_v38, %s5400_s28  ;;  %v103_v38 = vstv %s3501_s30 }
  0xea   :  { %v116_v45 = vmul.f32 %v103_v38, %v3526_v51 }
  0xed   :  { %509 = vrot.lane.b32.xlu1 %v491_v41, %s5401_s8  ;;  %345 = vrot.lane.b32.xlu0 %v324_v40, %s5401_s8 }
  0xf1   :  { %577 = vrot.lane.b32.xlu1 %v559_v44, %s5400_s28  ;;  %413 = vrot.lane.b32.xlu0 %v392_v43, %s5400_s28  ;;  %v115_v44 = vmul.f32 %v103_v38, %v3518_v48 }
  0xf5   :  { %343 = vrot.lane.b32.xlu1 %v323_v49, %s5401_s8  ;;  %513 = vrot.lane.b32.xlu0 %v493_v53, %s5401_s8  ;;  %v275_v49 = vstv %s3553_s12  ;;  %v3763_v53 = vrot.slane %v3531_v52, 1 }
  0xf9   :  { %411 = vrot.lane.b32.xlu1 %v391_v55, %s5400_s28  ;;  %581 = vrot.lane.b32.xlu0 %v561_v56, %s5400_s28 }
  0xfd   :  { %515 = vrot.lane.b32.xlu1 %v494_v59, %s5401_s8  ;;  %347 = vrot.lane.b32.xlu0 %v325_v58, %s5401_s8  ;;  %v285_v58 = vmul.f32 %v275_v49, %v3613_v15  ;;  %v286_v59 = vmul.f32 %v275_v49, %v3611_v14 }
 0x101   :  { %583 = vrot.lane.b32.xlu1 %v562_v62, %s5400_s28  ;;  %415 = vrot.lane.b32.xlu0 %v393_v61, %s5400_s28  ;;  %v107_v62 = vstv %s3503_s10 }
 0x105   :  { %349 = vrot.lane.b32.xlu1 %v326_v0, %s5401_s8  ;;  %519 = vrot.lane.b32.xlu0 %v496_v1, %s5401_s8 }
 0x109   :  { %417 = vrot.lane.b32.xlu1 %v394_v3, %s5400_s28  ;;  %587 = vrot.lane.b32.xlu0 %v564_v4, %s5400_s28  ;;  %v117_v4 = vmul.f32 %v107_v62, %v3518_v48 }
 0x10d   :  { %517 = vrot.lane.b32.xlu1 %v495_v6, %s5401_s8  ;;  %800 = vperm.xlu0 %3327, %v2934_v5   ;;  %v118_v5 = vmul.f32 %v107_v62, %v3526_v51  ;;  %v278_v6 = vstv %s3555_s14 }
 0x111   :  { %585 = vrot.lane.b32.xlu1 %v563_v8, %s5400_s28  ;;  %804 = vperm.xlu0 %3327, %v2935_v7   ;;  %v3787_v7 = vrot.slane %v3523_v50, 1 }
 0x115   :  { %860 = vperm.xlu1 %3328, %v2938_v10   ;;  %868 = vperm.xlu0 %3327, %v2940_v12  }
 0x119   :  { %864 = vperm.xlu1 %3328, %v2939_v13   ;;  %872 = vperm.xlu0 %3327, %v2941_v16   ;;  %v287_v16 = vmul.f32 %v278_v6, %v3613_v15 }
 0x11d   :  { %808 = vperm.xlu1 %3328, %v2936_v18   ;;  %1223 = vrot.lane.b32.xlu0 %v3515_v47, %s5401_s8  ;;  %v288_v18 = vmul.f32 %v278_v6, %v3611_v14  ;;  %v3858_v6 = vld [vmem:[%s5382_s5 + $0x14] sm:$0x7] }
 0x120   :  { %v168_v24 = vpop.permute.xlu1 %167  ;;  %v166_v25 = vpop.permute.xlu0 %165 }
 0x121   :  { %812 = vperm.xlu1 %3328, %v2937_v21   ;;  %1227 = vrot.lane.b32.xlu0 %v3531_v52, %s5401_s8  ;;  %v190_v30 = vadd.f32 %v168_v24, %v114_v28  ;;  %v189_v31 = vadd.f32 %v166_v25, %v113_v26  ;;  %v111_v24 = vstv %s3505_s11  ;;  %v3797_v25 = vrot.slane %v3515_v47, 2 }
 0x125   :  { %1221 = vrot.lane.b32.xlu1 %v3510_v46, %s5401_s8  ;;  %1267 = vrot.lane.b32.xlu0 %v3515_v47, %s5400_s28  ;;  %v3811_v47 = vrot.slane %v3531_v52, 2 }
 0x127   :  { %v236_v32 = vpop.permute.xlu1 %235  ;;  %v234_v33 = vpop.permute.xlu0 %233 }
 0x128   :  { %v258_v36 = vadd.f32 %v236_v32, %v190_v30  ;;  %v257_v37 = vadd.f32 %v234_v33, %v189_v31  ;;  %v119_v31 = vmul.f32 %v111_v24, %v3518_v48  ;;  %v120_v32 = vmul.f32 %v111_v24, %v3526_v51 }
 0x129   :  { %1225 = vrot.lane.b32.xlu1 %v3523_v50, %s5401_s8  ;;  %1271 = vrot.lane.b32.xlu0 %v3531_v52, %s5400_s28  ;;  %v281_v33 = vstv %s3561_s15  ;;  %v3820_v52 = vrot.slane %v3510_v46, 2 }
 0x12a   :  { %v3751_v40 = vadd.f32 %v284_v35, %v258_v36  ;;  %v3753_v41 = vadd.f32 %v283_v34, %v257_v37  ;;  %v289_v38 = vmul.f32 %v281_v33, %v3613_v15  ;;  %v290_v48 = vmul.f32 %v281_v33, %v3611_v14 }
 0x12b   :  { %v172_v42 = vpop.permute.xlu1 %171  ;;  %v170_v43 = vpop.permute.xlu0 %169  ;;  %v442_v15 = vstv %s3593_s26  ;;  %v3832_v14 = vrot.slane %v3523_v50, 2 }
 0x12c   :  { %v192_v54 = vadd.f32 %v172_v42, %v116_v45  ;;  %v191_v55 = vadd.f32 %v170_v43, %v115_v44 }
 0x12d   :  { %1265 = vrot.lane.b32.xlu1 %v3510_v46, %s5400_s28  ;;  %1336 = vrot.lane.b32.xlu0 %v3749_v39, %s5401_s8 }
 0x12f   :  { %v240_v56 = vpop.permute.xlu1 %239  ;;  %v238_v57 = vpop.permute.xlu0 %237 }
 0x130   :  { %v260_v60 = vadd.f32 %v240_v56, %v192_v54  ;;  %v259_v61 = vadd.f32 %v238_v57, %v191_v55  ;;  %v453_v57 = vmul.f32 %v442_v15, %v3628_v23 }
 0x131   :  { %1269 = vrot.lane.b32.xlu1 %v3523_v50, %s5400_s28  ;;  %1340 = vrot.lane.b32.xlu0 %v3763_v53, %s5401_s8 }
 0x132   :  { %v3775_v0 = vadd.f32 %v285_v58, %v259_v61  ;;  %v3777_v1 = vadd.f32 %v286_v59, %v260_v60  ;;  %v454_v58 = vmul.f32 %v442_v15, %v3635_v27 }
 0x133   :  { %v174_v2 = vpop.permute.xlu1 %173  ;;  %v176_v3 = vpop.permute.xlu0 %175 }
 0x134   :  { %v193_v8 = vadd.f32 %v174_v2, %v117_v4  ;;  %v194_v10 = vadd.f32 %v176_v3, %v118_v5  ;;  %v445_v4 = vstv %s3596_s0 }
 0x135   :  { %1334 = vrot.lane.b32.xlu1 %v3773_v63, %s5401_s8  ;;  %1380 = vrot.lane.b32.xlu0 %v3749_v39, %s5400_s28 }
 0x137   :  { %v242_v12 = vpop.permute.xlu1 %241  ;;  %v244_v13 = vpop.permute.xlu0 %243 }
 0x138   :  { %v261_v21 = vadd.f32 %v242_v12, %v193_v8  ;;  %v262_v22 = vadd.f32 %v244_v13, %v194_v10  ;;  %v455_v12 = vmul.f32 %v445_v4, %v3628_v23 }
 0x139   :  { %1338 = vrot.lane.b32.xlu1 %v3787_v7, %s5401_s8  ;;  %1384 = vrot.lane.b32.xlu0 %v3763_v53, %s5400_s28 }
 0x13a   :  { %v3799_v26 = vadd.f32 %v288_v18, %v262_v22  ;;  %v3801_v28 = vadd.f32 %v287_v16, %v261_v21 }
 0x13b   :  { %v180_v29 = vpop.permute.xlu1 %179  ;;  %v178_v30 = vpop.permute.xlu0 %177 }
 0x13c   :  { %v196_v34 = vadd.f32 %v180_v29, %v120_v32  ;;  %v195_v35 = vadd.f32 %v178_v30, %v119_v31  ;;  %v456_v29 = vmul.f32 %v445_v4, %v3635_v27 }
 0x13d   :  { %1378 = vrot.lane.b32.xlu1 %v3773_v63, %s5400_s28  ;;  %1449 = vrot.lane.b32.xlu0 %v3797_v25, %s5401_s8 }
 0x13f   :  { %v248_v36 = vpop.permute.xlu1 %247  ;;  %v246_v37 = vpop.permute.xlu0 %245 }
 0x140   :  { %v264_v51 = vadd.f32 %v248_v36, %v196_v34  ;;  %v263_v42 = vadd.f32 %v246_v37, %v195_v35  ;;  %v448_v34 = vstv %s3598_s25 }
 0x141   :  { %1382 = vrot.lane.b32.xlu1 %v3787_v7, %s5400_s28  ;;  %1453 = vrot.lane.b32.xlu0 %v3811_v47, %s5401_s8 }
 0x142   :  { %v3822_v43 = vadd.f32 %v289_v38, %v263_v42  ;;  %v3824_v44 = vadd.f32 %v290_v48, %v264_v51  ;;  %v458_v51 = vmul.f32 %v448_v34, %v3635_v27 }
 0x143   :  { %v338_v45 = vpop.permute.xlu1 %337  ;;  %v336_v49 = vpop.permute.xlu0 %335 }
 0x144   :  { %v360_v54 = vadd.f32 %v338_v45, %v3751_v40  ;;  %v359_v46 = vadd.f32 %v336_v49, %v3753_v41  ;;  %v3845_v40 = vld [vmem:[%s5382_s5 + $0x4] sm:$0x7] }
 0x145   :  { %1447 = vrot.lane.b32.xlu1 %v3820_v52, %s5401_s8  ;;  %1491 = vrot.lane.b32.xlu0 %v3820_v52, %s5400_s28 }
 0x147   :  { %v406_v55 = vpop.permute.xlu1 %405  ;;  %v404_v56 = vpop.permute.xlu0 %403 }
 0x148   :  { %v428_v59 = vadd.f32 %v406_v55, %v360_v54  ;;  %v427_v60 = vadd.f32 %v404_v56, %v359_v46 }
 0x149   :  { %1451 = vrot.lane.b32.xlu1 %v3832_v14, %s5401_s8  ;;  %1495 = vrot.lane.b32.xlu0 %v3832_v14, %s5400_s28 }
 0x14a   :  { %v461_v50 = vadd.f32 %v453_v57, %v427_v60  ;;  %v462_v41 = vadd.f32 %v454_v58, %v428_v59  ;;  %v457_v59 = vmul.f32 %v448_v34, %v3628_v23 }
 0x14b   :  { %v506_v61 = vpop.permute.xlu1 %505  ;;  %v574_v62 = vpop.permute.xlu0 %573 }
 0x14c   :  { %v529_v60 = vadd.f32 %v506_v61, %v461_v50 }
 0x14d   :  { %1493 = vrot.lane.b32.xlu1 %v3797_v25, %s5400_s28  ;;  %1561 = vrot.lane.b32.xlu0 %v3845_v40, %s5401_s8 }
 0x14f   :  { %v508_v2 = vpop.permute.xlu1 %507  ;;  %v340_v3 = vpop.permute.xlu0 %339 }
 0x150   :  { %v361_v5 = vadd.f32 %v340_v3, %v3775_v0  ;;  %v530_v35 = vadd.f32 %v508_v2, %v462_v41 }
 0x151   :  { %1497 = vrot.lane.b32.xlu1 %v3811_v47, %s5400_s28 }
 0x153   :  { %v576_v8 = vpop.permute.xlu1 %575  ;;  %v408_v10 = vpop.permute.xlu0 %407 }
 0x154   :  { %v429_v13 = vadd.f32 %v408_v10, %v361_v5  ;;  %v598_v37 = vadd.f32 %v576_v8, %v530_v35  ;;  %v451_v5 = vstv %s3602_s27  ;;  %v597_v8 = vadd.f32 %v574_v62, %v529_v60 }
 0x155   :  { %1563 = vrot.lane.b32.xlu1 %v3858_v6, %s5401_s8 }
 0x156   :  { %v463_v16 = vadd.f32 %v455_v12, %v429_v13  ;;  %v3869_v46 = vadd.f32 %v3703_v9, %v598_v37 }
 0x157   :  { %v342_v18 = vpop.permute.xlu1 %341  ;;  %v512_v21 = vpop.permute.xlu0 %511 }
 0x158   :  { %v362_v22 = vadd.f32 %v342_v18, %v3777_v1  ;;  %v653_v57 = vsel %vm649_vm3, %v3869_v46, 0.0  ;;  %v459_v18 = vmul.f32 %v451_v5, %v3628_v23 }
 0x15b   :  { %v410_v0 = vpop.permute.xlu1 %409  ;;  %v580_v24 = vpop.permute.xlu0 %579 }
 0x15c   :  { %v430_v30 = vadd.f32 %v410_v0, %v362_v22 }
 0x15e   :  { %v464_v31 = vadd.f32 %v456_v29, %v430_v30  ;;  %v3887_v30 = vadd.f32 %v3703_v9, %v597_v8  ;;  %v460_v9 = vmul.f32 %v451_v5, %v3635_v27 }
 0x15f   :  { %v510_v32 = vpop.permute.xlu1 %509  ;;  %v346_v33 = vpop.permute.xlu0 %345 }
 0x160   :  { %v364_v36 = vadd.f32 %v346_v33, %v3799_v26  ;;  %v531_v45 = vadd.f32 %v510_v32, %v463_v16  ;;  %v532_v10 = vadd.f32 %v512_v21, %v464_v31  ;;  %v650_v23 = vsel %vm649_vm3, %v3887_v30, 0.0 }
 0x162   :  { %v600_v61 = vadd.f32 %v580_v24, %v532_v10  ;;  %v3947_v10 = vrot.slane %v3845_v40, 1 }
 0x163   :  { %v578_v38 = vpop.permute.xlu1 %577  ;;  %v414_v48 = vpop.permute.xlu0 %413 }
 0x164   :  { %v432_v42 = vadd.f32 %v414_v48, %v364_v36  ;;  %v599_v49 = vadd.f32 %v578_v38, %v531_v45  ;;  %v3894_v24 = vadd.f32 %v3717_v17, %v600_v61 }
 0x166   :  { %v466_v1 = vadd.f32 %v458_v51, %v432_v42  ;;  %v3875_v58 = vadd.f32 %v3717_v17, %v599_v49  ;;  %v659_v36 = vsel %vm649_vm3, %v3894_v24, 0.0 }
 0x167   :  { %v344_v15 = vpop.permute.xlu1 %343  ;;  %v514_v54 = vpop.permute.xlu0 %513 }
 0x168   :  { %v363_v55 = vadd.f32 %v344_v15, %v3801_v28  ;;  %v656_v28 = vsel %vm649_vm3, %v3875_v58, 0.0 }
 0x16b   :  { %v412_v56 = vpop.permute.xlu1 %411  ;;  %v582_v26 = vpop.permute.xlu0 %581 }
 0x16c   :  { %v431_v41 = vadd.f32 %v412_v56, %v363_v55  ;;  %654 = vadd.xlane.f32.xlu0 %v653_v57 }
 0x16e   :  { %v465_v2 = vadd.f32 %v457_v59, %v431_v41 }
 0x16f   :  { %v516_v3 = vpop.permute.xlu1 %515  ;;  %v348_v4 = vpop.permute.xlu0 %347 }
 0x170   :  { %v533_v12 = vadd.f32 %v514_v54, %v465_v2  ;;  %657 = vadd.xlane.f32.xlu0 %v656_v28  ;;  %v365_v16 = vadd.f32 %v348_v4, %v3822_v43  ;;  %v534_v32 = vadd.f32 %v516_v3, %v466_v1  ;;  %v3917_v54 = vld [vmem:[%s5382_s5 + $0x34] sm:$0x7]  ;;  %v3938_v2 = vld [vmem:[%s5382_s5 + $0x24] sm:$0x7] }
 0x172   :  { %v601_v13 = vadd.f32 %v582_v26, %v533_v12 }
 0x173   :  { %v584_v22 = vpop.permute.xlu1 %583  ;;  %v416_v50 = vpop.permute.xlu0 %415 }
 0x174   :  { %v433_v0 = vadd.f32 %v416_v50, %v365_v16  ;;  %v3884_v29 = vadd.f32 %v3722_v19, %v601_v13  ;;  %v602_v43 = vadd.f32 %v584_v22, %v534_v32  ;;  %v3952_v16 = vrot.slane %v3938_v2, 1 }
 0x176   :  { %v662_v62 = vsel %vm649_vm3, %v3884_v29, 0.0  ;;  %v467_v21 = vadd.f32 %v459_v18, %v433_v0  ;;  %v3901_v37 = vadd.f32 %v3722_v19, %v602_v43 }
 0x177   :  { %v350_v31 = vpop.permute.xlu1 %349  ;;  %663 = vadd.xlane.f32.xlu0 %v662_v62  ;;  %v520_v38 = vpop.permute.xlu0 %519 }
 0x178   :  { %v366_v33 = vadd.f32 %v350_v31, %v3824_v44  ;;  %v665_v17 = vsel %vm649_vm3, %v3901_v37, 0.0 }
 0x179   :  { %651 = vadd.xlane.f32.xlu1 %v650_v23 }
 0x17b   :  { %v418_v34 = vpop.permute.xlu1 %417  ;;  %v588_v45 = vpop.permute.xlu0 %587 }
 0x17c   :  { %v434_v35 = vadd.f32 %v418_v34, %v366_v33  ;;  %v3981_v33 = vrot.slane %v3858_v6, 2 }
 0x17d   :  { %660 = vadd.xlane.f32.xlu1 %v659_v36 }
 0x17e   :  { %v468_v48 = vadd.f32 %v460_v9, %v434_v35  ;;  %v3989_v35 = vrot.slane %v3917_v54, 2 }
 0x17f   :  { %v518_v51 = vpop.permute.xlu1 %517 }
 0x180   :  { %v535_v42 = vadd.f32 %v518_v51, %v467_v21  ;;  %v536_v50 = vadd.f32 %v520_v38, %v468_v48  ;;  %v4008_v48 = vld [vmem:[%s5382_s5 + $0x38] sm:$0x7] }
 0x181   :  { %666 = vadd.xlane.f32.xlu1 %v665_v17  ;;  %v4017_v17 = vrot.slane %v3917_v54, 1 }
 0x182   :  { %v604_v32 = vadd.f32 %v588_v45, %v536_v50 }
 0x183   :  { %v586_v44 = vpop.permute.xlu1 %585 }
 0x184   :  { %v603_v1 = vadd.f32 %v586_v44, %v535_v42  ;;  %v3963_v31 = vadd.f32 %v3724_v20, %v604_v32  ;;  %v4042_v44 = vld [vmem:[%s5382_s5 + $0x8] sm:$0x7] }
 0x185   :  { %v4049_v45 = vrot.slane %v4042_v44, 1 }
 0x186   :  { %v3906_v27 = vadd.f32 %v3724_v20, %v603_v1  ;;  %v3975_v20 = vrot.slane %v3938_v2, 2  ;;  %v4054_v1 = vld [vmem:[%s5382_s5 + $0x28] sm:$0x7] }
 0x188   :  { %v3908_v49 = vpop.permute.xlu0 %800  ;;  %v668_v19 = vsel %vm649_vm3, %v3906_v27, 0.0 }
 0x189   :  { %669 = vadd.xlane.f32.xlu0 %v668_v19  ;;  %v4061_v19 = vrot.slane %v4054_v1, 1 }
 0x18c   :  { %v3912_v15 = vpop.permute.xlu0 %804 }
 0x190   :  { %v3919_v55 = vpop.permute.xlu1 %860  ;;  %v3921_v56 = vpop.permute.xlu0 %868 }
 0x192   :  { %1567 = vrot.lane.b32.xlu1 %v3917_v54, %s5401_s8 }
 0x194   :  { %v3925_v26 = vpop.permute.xlu1 %864  ;;  %v3927_v57 = vpop.permute.xlu0 %872 }
 0x196   :  { %1607 = vrot.lane.b32.xlu1 %v3858_v6, %s5400_s28 }
 0x198   :  { %v3931_v59 = vpop.permute.xlu1 %808  ;;  %v1224_v60 = vpop.permute.xlu0 %1223 }
 0x19c   :  { %v3933_v41 = vpop.permute.xlu1 %812  ;;  %v1228_v3 = vpop.permute.xlu0 %1227 }
 0x19f   :  { %1565 = vrot.lane.b32.xlu0 %v3938_v2, %s5401_s8 }
 0x1a0   :  { %v1222_v4 = vpop.permute.xlu1 %1221  ;;  %v1268_v28 = vpop.permute.xlu0 %1267 }
 0x1a1   :  { %3034 = vpush %v1222_v4 }
 0x1a2   :  { %3036 = vpush %v1224_v60  ;;  %v4075_v60 = vrot.slane %v4054_v1, 2 }
 0x1a3   :  { %1605 = vrot.lane.b32.xlu0 %v3845_v40, %s5400_s28 }
 0x1a4   :  { %v1226_v5 = vpop.permute.xlu1 %1225  ;;  %v1272_v8 = vpop.permute.xlu0 %1271 }
 0x1a5   :  { %3038 = vpush %v1226_v5 }
 0x1a6   :  { %3040 = vpush %v1228_v3  ;;  %v4101_v3 = vld [vmem:[%s5382_s5 + $0x2c] sm:$0x7] }
 0x1a7   :  { %1609 = vrot.lane.b32.xlu0 %v3938_v2, %s5400_s28 }
 0x1a8   :  { %v1266_v12 = vpop.permute.xlu1 %1265  ;;  %v1337_v13 = vpop.permute.xlu0 %1336 }
 0x1a9   :  { %3042 = vpush %v1266_v12 }
 0x1aa   :  { %3044 = vpush %v1268_v28 }
 0x1ab   :  { %1674 = vrot.lane.b32.xlu0 %v3947_v10, %s5401_s8 }
 0x1ac   :  { %v1270_v18 = vpop.permute.xlu1 %1269  ;;  %v1341_v22 = vpop.permute.xlu0 %1340 }
 0x1ad   :  { %3046 = vpush %v1270_v18 }
 0x1ae   :  { %3048 = vpush %v1272_v8 }
 0x1af   :  { %1678 = vrot.lane.b32.xlu0 %v3952_v16, %s5401_s8  ;;  %3050 = vpush %v3773_v63 }
 0x1b0   :  { %v1335_v61 = vpop.permute.xlu1 %1334  ;;  %3052 = vpush %v3749_v39  ;;  %v1381_v0 = vpop.permute.xlu0 %1380  ;;  %v3968_v39 = vrot.slane %v3845_v40, 2 }
 0x1b1   :  { %3054 = vpush %v3787_v7  ;;  %v671_v7 = vsel %vm649_vm3, %v3963_v31, 0.0 }
 0x1b2   :  { %3056 = vpush %v3763_v53 }
 0x1b3   :  { %3058 = vpush %v1335_v61  ;;  %1718 = vrot.lane.b32.xlu0 %v3947_v10, %s5400_s28 }
 0x1b4   :  { %v1339_v62 = vpop.permute.xlu1 %1338  ;;  %3060 = vpush %v1337_v13  ;;  %v1385_v21 = vpop.permute.xlu0 %1384 }
 0x1b5   :  { %3062 = vpush %v1339_v62 }
 0x1b6   :  { %3064 = vpush %v1341_v22 }
 0x1b7   :  { %1722 = vrot.lane.b32.xlu0 %v3952_v16, %s5400_s28 }
 0x1b8   :  { %v1379_v63 = vpop.permute.xlu1 %1378  ;;  %v1450_v53 = vpop.permute.xlu0 %1449 }
 0x1b9   :  { %3066 = vpush %v1379_v63 }
 0x1ba   :  { %672 = vadd.xlane.f32.xlu1 %v671_v7  ;;  %3068 = vpush %v1381_v0 }
 0x1bb   :  { %1787 = vrot.lane.b32.xlu0 %v3968_v39, %s5401_s8 }
 0x1bc   :  { %v1383_v43 = vpop.permute.xlu1 %1382  ;;  %v1454_v23 = vpop.permute.xlu0 %1453 }
 0x1bd   :  { %3070 = vpush %v1383_v43 }
 0x1be   :  { %3072 = vpush %v1385_v21 }
 0x1bf   :  { %1791 = vrot.lane.b32.xlu0 %v3975_v20, %s5401_s8  ;;  %3074 = vpush %v3820_v52 }
 0x1c0   :  { %v1448_v34 = vpop.permute.xlu1 %1447  ;;  %3076 = vpush %v3797_v25  ;;  %v1492_v9 = vpop.permute.xlu0 %1491 }
 0x1c1   :  { %3078 = vpush %v3832_v14  ;;  %v4003_v14 = vrot.slane %v3858_v6, 1 }
 0x1c2   :  { %3080 = vpush %v3811_v47  ;;  %v3996_v47 = vld [vmem:[%s5382_s5 + $0x18] sm:$0x7] }
 0x1c3   :  { %3082 = vpush %v1448_v34  ;;  %1833 = vrot.lane.b32.xlu0 %v3981_v33, %s5400_s28 }
 0x1c4   :  { %v1452_v36 = vpop.permute.xlu1 %1451  ;;  %3084 = vpush %v1450_v53  ;;  %v1496_v25 = vpop.permute.xlu0 %1495  ;;  %v4116_v53 = vrot.slane %v3996_v47, 2 }
 0x1c5   :  { %3086 = vpush %v1452_v36  ;;  %v4121_v36 = vrot.slane %v4008_v48, 2 }
 0x1c6   :  { %3088 = vpush %v1454_v23 }
 0x1c7   :  { %1837 = vrot.lane.b32.xlu0 %v3989_v35, %s5400_s28  ;;  %3090 = vpush %v1492_v9 }
 0x1c8   :  { %v1494_v52 = vpop.permute.xlu1 %1493  ;;  %v1562_v51 = vpop.permute.xlu0 %1561 }
 0x1c9   :  { %3092 = vpush %v1494_v52 }
 0x1ca   :  { %3094 = vpush %v1496_v25 }
 0x1cb   :  { %1903 = vrot.lane.b32.xlu0 %v3996_v47, %s5401_s8  ;;  %1611 = vrot.lane.b32.xlu1 %v3917_v54, %s5400_s28 }
 0x1cc   :  { %v1498_v38 = vpop.permute.xlu1 %1497 }
 0x1cd   :  { %3096 = vpush %v1498_v38 }
 0x1ce   :  { %3098 = vpush %v3845_v40  ;;  %v4030_v40 = vrot.slane %v3996_v47, 1 }
 0x1cf   :  { %1907 = vrot.lane.b32.xlu0 %v4008_v48, %s5401_s8  ;;  %1676 = vrot.lane.b32.xlu1 %v4003_v14, %s5401_s8  ;;  %3100 = vpush %v3858_v6  ;;  %v4037_v6 = vrot.slane %v4008_v48, 1 }
 0x1d0   :  { %v1564_v42 = vpop.permute.xlu1 %1563  ;;  %3102 = vpush %v3938_v2  ;;  %v4092_v2 = vld [vmem:[%s5382_s5 + $0xc] sm:$0x7] }
 0x1d1   :  { %3104 = vpush %v3917_v54  ;;  %v4068_v54 = vrot.slane %v4042_v44, 2 }
 0x1d2   :  { %3106 = vpush %v1562_v51 }
 0x1d3   :  { %3108 = vpush %v1564_v42  ;;  %1947 = vrot.lane.b32.xlu0 %v3996_v47, %s5400_s28  ;;  %1680 = vrot.lane.b32.xlu1 %v4017_v17, %s5401_s8 }
 0x1d7   :  { %1951 = vrot.lane.b32.xlu0 %v4008_v48, %s5400_s28  ;;  %1720 = vrot.lane.b32.xlu1 %v4003_v14, %s5400_s28 }
 0x1db   :  { %2016 = vrot.lane.b32.xlu0 %v4030_v40, %s5401_s8  ;;  %1724 = vrot.lane.b32.xlu1 %v4017_v17, %s5400_s28 }
 0x1df   :  { %2020 = vrot.lane.b32.xlu0 %v4037_v6, %s5401_s8  ;;  %1789 = vrot.lane.b32.xlu1 %v3981_v33, %s5401_s8 }
 0x1e3   :  { %2058 = vrot.lane.b32.xlu0 %v4049_v45, %s5400_s28  ;;  %1793 = vrot.lane.b32.xlu1 %v3989_v35, %s5401_s8 }
 0x1e7   :  { %2062 = vrot.lane.b32.xlu0 %v4061_v19, %s5400_s28  ;;  %1831 = vrot.lane.b32.xlu1 %v3968_v39, %s5400_s28 }
 0x1eb   :  { %2127 = vrot.lane.b32.xlu0 %v4068_v54, %s5401_s8  ;;  %1835 = vrot.lane.b32.xlu1 %v3975_v20, %s5400_s28 }
 0x1ef   :  { %2131 = vrot.lane.b32.xlu0 %v4075_v60, %s5401_s8  ;;  %1901 = vrot.lane.b32.xlu1 %v4042_v44, %s5401_s8 }
 0x1f3   :  { %2171 = vrot.lane.b32.xlu0 %v4068_v54, %s5400_s28  ;;  %1905 = vrot.lane.b32.xlu1 %v4054_v1, %s5401_s8 }
 0x1f5   :  { %v655_v4 = vpop.xlane.xlu0 %654 }
 0x1f7   :  { %2175 = vrot.lane.b32.xlu0 %v4075_v60, %s5400_s28  ;;  %1945 = vrot.lane.b32.xlu1 %v4042_v44, %s5400_s28 }
 0x1f9   :  { %v658_v12 = vpop.xlane.xlu0 %657 }
 0x1fb   :  { %2241 = vrot.lane.b32.xlu0 %v4092_v2, %s5401_s8  ;;  %1949 = vrot.lane.b32.xlu1 %v4054_v1, %s5400_s28 }
 0x1ff   :  { %2245 = vrot.lane.b32.xlu0 %v4101_v3, %s5401_s8  ;;  %2014 = vrot.lane.b32.xlu1 %v4049_v45, %s5401_s8 }
 0x200   :  { %v664_v0 = vpop.xlane.xlu0 %663 }
 0x202   :  { %v652_v28 = vpop.xlane.xlu1 %651 }
 0x203   :  { %v674_v5 = vadd.f32 %v655_v4, %v652_v28  ;;  %2285 = vrot.lane.b32.xlu0 %v4092_v2, %s5400_s28  ;;  %2018 = vrot.lane.b32.xlu1 %v4061_v19, %s5401_s8 }
 0x205   :  { %v675_v8 = vrot.slane %v674_v5, 4 }
 0x206   :  { %v661_v13 = vpop.xlane.xlu1 %660 }
 0x207   :  { %v676_v18 = vadd.f32 %v675_v8, %v674_v5  ;;  %v681_v22 = vadd.f32 %v661_v13, %v658_v12  ;;  %2060 = vrot.lane.b32.xlu1 %v4030_v40, %s5400_s28 }
 0x209   :  { %v677_v50 = vrot.slane %v676_v18, 2  ;;  %v682_v61 = vrot.slane %v681_v22, 4 }
 0x20a   :  { %v667_v32 = vpop.xlane.xlu1 %666 }
 0x20b   :  { %v678_v62 = vadd.f32 %v677_v50, %v676_v18  ;;  %v683_v21 = vadd.f32 %v682_v61, %v681_v22  ;;  %v688_v63 = vadd.f32 %v667_v32, %v664_v0  ;;  %2064 = vrot.lane.b32.xlu1 %v4037_v6, %s5400_s28  ;;  %v4135_v0 = vld [vmem:[%s5382_s5 + $0x1c] sm:$0x7] }
 0x20d   :  { %v679_v7 = vrot.slane %v678_v62, 1  ;;  %v684_v43 = vrot.slane %v683_v21, 2  ;;  %v689_v23 = vrot.slane %v688_v63, 4 }
 0x20e   :  { %v1568_v5 = vpop.permute.xlu1 %1567 }
 0x20f   :  { %v685_v34 = vadd.f32 %v684_v43, %v683_v21  ;;  %v690_v9 = vadd.f32 %v689_v23, %v688_v63  ;;  %2129 = vrot.lane.b32.xlu1 %v4116_v53, %s5401_s8  ;;  %v680_v25 = vadd.f32 %v679_v7, %v678_v62  ;;  %v4147_v63 = vld [vmem:[%s5382_s5 + $0x3c] sm:$0x7]  ;;  %s3376_s5 = smov 121  }
 0x211   :  { %v686_v52 = vrot.slane %v685_v34, 1  ;;  %v691_v38 = vrot.slane %v690_v9, 2  ;;  %v703_v8 = vmul.f32 0.00390625, %v680_v25 }
 0x212   :  { %v670_v51 = vpop.xlane.xlu0 %669  ;;  %v1608_v61 = vpop.permute.xlu1 %1607 }
 0x213   :  { %v692_v42 = vadd.f32 %v691_v38, %v690_v9  ;;  %2133 = vrot.lane.b32.xlu1 %v4121_v36, %s5401_s8  ;;  %v687_v4 = vadd.f32 %v686_v52, %v685_v34  ;;  %v4128_v18 = vsub.f32 %v3887_v30, %v703_v8 }
 0x215   :  { %v693_v28 = vrot.slane %v692_v42, 1  ;;  %v704_v22 = vmul.f32 0.00390625, %v687_v4  ;;  %v715_v32 = vmul.f32 %v4128_v18, %v4128_v18 }
 0x216   :  { %v1566_v12 = vpop.permute.xlu0 %1565 }
 0x217   :  { %3110 = vpush %v1566_v12  ;;  %2173 = vrot.lane.b32.xlu1 %v4116_v53, %s5400_s28  ;;  %v694_v13 = vadd.f32 %v693_v28, %v692_v42  ;;  %v4140_v62 = vsub.f32 %v3875_v58, %v704_v22  ;;  %v723_v7 = vsel %vm649_vm3, %v715_v32, 0.0 }
 0x218   :  { %3112 = vpush %v1568_v5  ;;  %v4168_v5 = vsub.f32 %v3869_v46, %v703_v8 }
 0x219   :  { %v705_v30 = vmul.f32 0.00390625, %v694_v13  ;;  %v717_v43 = vmul.f32 %v4140_v62, %v4140_v62 }
 0x21a   :  { %v1606_v50 = vpop.permute.xlu0 %1605  ;;  %v716_v32 = vmul.f32 %v4168_v5, %v4168_v5 }
 0x21b   :  { %2177 = vrot.lane.b32.xlu1 %v4121_v36, %s5400_s28  ;;  %3114 = vpush %v1606_v50  ;;  %v4153_v23 = vsub.f32 %v3884_v29, %v705_v30  ;;  %v729_v34 = vsel %vm649_vm3, %v717_v43, 0.0  ;;  %v4181_v8 = vsub.f32 %v3901_v37, %v705_v30 }
 0x21c   :  { %3116 = vpush %v1608_v61  ;;  %v726_v46 = vsel %vm649_vm3, %v716_v32, 0.0 }
 0x21d   :  { %v719_v9 = vmul.f32 %v4153_v23, %v4153_v23 }
 0x21e   :  { %v1610_v21 = vpop.permute.xlu0 %1609 }
 0x21f   :  { %2243 = vrot.lane.b32.xlu1 %v4135_v0, %s5401_s8  ;;  %3118 = vpush %v1610_v21  ;;  %v735_v52 = vsel %vm649_vm3, %v719_v9, 0.0  ;;  %v4173_v21 = vsub.f32 %v3894_v24, %v704_v22 }
 0x222   :  { %724 = vadd.xlane.f32.xlu0 %v723_v7  ;;  %v1675_v58 = vpop.permute.xlu0 %1674 }
 0x223   :  { %2247 = vrot.lane.b32.xlu1 %v4147_v63, %s5401_s8 }
 0x226   :  { %730 = vadd.xlane.f32.xlu0 %v729_v34  ;;  %v1679_v25 = vpop.permute.xlu0 %1678 }
 0x227   :  { %2287 = vrot.lane.b32.xlu1 %v4135_v0, %s5400_s28 }
 0x22a   :  { %736 = vadd.xlane.f32.xlu0 %v735_v52  ;;  %v1719_v29 = vpop.permute.xlu0 %1718  ;;  %v720_v52 = vmul.f32 %v4181_v8, %v4181_v8 }
 0x22e   :  { %v1723_v38 = vpop.permute.xlu0 %1722 }
 0x232   :  { %v1788_v42 = vpop.permute.xlu0 %1787 }
 0x236   :  { %v1792_v4 = vpop.permute.xlu0 %1791 }
 0x23a   :  { %v4163_v28 = vpop.permute.xlu0 %1833 }
 0x23e   :  { %v1838_v50 = vpop.permute.xlu0 %1837 }
 0x240   :  { %2289 = vrot.lane.b32.xlu0 %v4101_v3, %s5400_s28 }
 0x242   :  { %v1904_v9 = vpop.permute.xlu0 %1903 }
 0x243   :  { %v673_v12 = vpop.xlane.xlu1 %672 }
 0x244   :  { %v695_v13 = vadd.f32 %v673_v12, %v670_v51  ;;  %v718_v51 = vmul.f32 %v4173_v21, %v4173_v21 }
 0x246   :  { %v696_v61 = vrot.slane %v695_v13, 4  ;;  %v1908_v12 = vpop.permute.xlu0 %1907 }
 0x247   :  { %v1612_v7 = vpop.permute.xlu1 %1611 }
 0x248   :  { %v697_v43 = vadd.f32 %v696_v61, %v695_v13  ;;  %3120 = vpush %v1612_v7 }
 0x249   :  { %3122 = vpush %v3947_v10 }
 0x24a   :  { %v698_v34 = vrot.slane %v697_v43, 2  ;;  %3124 = vpush %v4003_v14  ;;  %v732_v14 = vsel %vm649_vm3, %v718_v51, 0.0  ;;  %v1948_v61 = vpop.permute.xlu0 %1947  ;;  %v4229_v51 = vrot.slane %v4147_v63, 1 }
 0x24b   :  { %3126 = vpush %v3952_v16  ;;  %727 = vadd.xlane.f32.xlu1 %v726_v46  ;;  %v1677_v24 = vpop.permute.xlu1 %1676  ;;  %v738_v16 = vsel %vm649_vm3, %v720_v52, 0.0 }
 0x24c   :  { %v699_v22 = vadd.f32 %v698_v34, %v697_v43  ;;  %3128 = vpush %v4017_v17 }
 0x24d   :  { %3130 = vpush %v1675_v58 }
 0x24e   :  { %v700_v10 = vrot.slane %v699_v22, 1  ;;  %3132 = vpush %v1677_v24 }
 0x24f   :  { %3134 = vpush %v1679_v25  ;;  %733 = vadd.xlane.f32.xlu1 %v732_v14  ;;  %v1681_v37 = vpop.permute.xlu1 %1680 }
 0x250   :  { %v701_v30 = vadd.f32 %v700_v10, %v699_v22  ;;  %3136 = vpush %v1681_v37 }
 0x251   :  { %3138 = vpush %v1719_v29 }
 0x252   :  { %v4189_v13 = vmul.f32 0.00390625, %v701_v30 }
 0x253   :  { %739 = vadd.xlane.f32.xlu1 %v738_v16  ;;  %v1721_v17 = vpop.permute.xlu1 %1720 }
 0x254   :  { %3140 = vpush %v1721_v17  ;;  %v4193_v58 = vsub.f32 %v3963_v31, %v4189_v13 }
 0x255   :  { %3142 = vpush %v1723_v38  ;;  %v1952_v38 = vpop.permute.xlu0 %1951 }
 0x256   :  { %v722_v29 = vmul.f32 %v4193_v58, %v4193_v58 }
 0x257   :  { %v1725_v25 = vpop.permute.xlu1 %1724 }
 0x258   :  { %3144 = vpush %v1725_v25  ;;  %v744_v31 = vsel %vm649_vm3, %v722_v29, 0.0 }
 0x259   :  { %3146 = vpush %v3968_v39  ;;  %v2017_v39 = vpop.permute.xlu0 %2016 }
 0x25a   :  { %3148 = vpush %v3981_v33 }
 0x25b   :  { %3150 = vpush %v3975_v20  ;;  %v1790_v32 = vpop.permute.xlu1 %1789 }
 0x25c   :  { %3152 = vpush %v3989_v35 }
 0x25d   :  { %3154 = vpush %v1788_v42  ;;  %v2021_v33 = vpop.permute.xlu0 %2020 }
 0x25e   :  { %3156 = vpush %v1790_v32 }
 0x25f   :  { %3158 = vpush %v1792_v4  ;;  %745 = vadd.xlane.f32.xlu0 %v744_v31  ;;  %v1794_v7 = vpop.permute.xlu1 %1793 }
 0x260   :  { %3160 = vpush %v1794_v7 }
 0x261   :  { %v2059_v42 = vpop.permute.xlu0 %2058 }
 0x263   :  { %v1832_v43 = vpop.permute.xlu1 %1831 }
 0x264   :  { %2291 = vrot.lane.b32.xlu1 %v4147_v63, %s5400_s28  ;;  %3162 = vpush %v1832_v43 }
 0x265   :  { %3164 = vpush %v4163_v28  ;;  %v4210_v28 = vrot.slane %v4092_v2, 1 }
 0x267   :  { %v1836_v20 = vpop.permute.xlu1 %1835 }
 0x268   :  { %3166 = vpush %v1836_v20 }
 0x269   :  { %3168 = vpush %v1838_v50  ;;  %v2063_v50 = vpop.permute.xlu0 %2062 }
 0x26a   :  { %3170 = vpush %v4042_v44  ;;  %v4220_v44 = vrot.slane %v4135_v0, 1 }
 0x26b   :  { %v1902_v35 = vpop.permute.xlu1 %1901  ;;  %3172 = vpush %v3996_v47  ;;  %v4215_v47 = vrot.slane %v4101_v3, 1 }
 0x26c   :  { %3174 = vpush %v4054_v1 }
 0x26d   :  { %3176 = vpush %v4008_v48  ;;  %v2128_v1 = vpop.permute.xlu0 %2127 }
 0x26e   :  { %3178 = vpush %v1902_v35 }
 0x26f   :  { %3180 = vpush %v1904_v9  ;;  %v1906_v4 = vpop.permute.xlu1 %1905 }
 0x270   :  { %3182 = vpush %v1906_v4 }
 0x271   :  { %3184 = vpush %v1908_v12  ;;  %v2132_v24 = vpop.permute.xlu0 %2131 }
 0x273   :  { %v1946_v34 = vpop.permute.xlu1 %1945 }
 0x274   :  { %3186 = vpush %v1946_v34 }
 0x275   :  { %3188 = vpush %v1948_v61  ;;  %2354 = vrot.lane.b32.xlu0 %v4210_v28, %s5401_s8  ;;  %v2172_v22 = vpop.permute.xlu0 %2171 }
 0x277   :  { %v1950_v48 = vpop.permute.xlu1 %1949 }
 0x278   :  { %3190 = vpush %v1950_v48 }
 0x279   :  { %3192 = vpush %v1952_v38  ;;  %2358 = vrot.lane.b32.xlu0 %v4215_v47, %s5401_s8  ;;  %v2176_v37 = vpop.permute.xlu0 %2175 }
 0x27a   :  { %3194 = vpush %v4049_v45  ;;  %v4233_v45 = vsub.f32 %v3906_v27, %v4189_v13  ;;  %v4245_v27 = vrot.slane %v4147_v63, 2 }
 0x27b   :  { %v2015_v46 = vpop.permute.xlu1 %2014  ;;  %3196 = vpush %v4030_v40  ;;  %v4238_v40 = vrot.slane %v4135_v0, 2 }
 0x27c   :  { %3198 = vpush %v4061_v19  ;;  %v721_v19 = vmul.f32 %v4233_v45, %v4233_v45 }
 0x27d   :  { %3200 = vpush %v4037_v6  ;;  %2400 = vrot.lane.b32.xlu0 %v4220_v44, %s5400_s28 }
 0x27e   :  { %3202 = vpush %v2015_v46  ;;  %v741_v14 = vsel %vm649_vm3, %v721_v19, 0.0  ;;  %vm1160_vm3 = vcmask 56320  }
 0x27f   :  { %3204 = vpush %v2017_v39  ;;  %v2019_v9 = vpop.permute.xlu1 %2018 }
 0x280   :  { %3206 = vpush %v2019_v9 }
 0x281   :  { %3208 = vpush %v2021_v33  ;;  %2404 = vrot.lane.b32.xlu0 %v4229_v51, %s5400_s28 }
 0x282   :  { %3210 = vpush %v2059_v42 }
 0x283   :  { %v2061_v6 = vpop.permute.xlu1 %2060 }
 0x284   :  { %3212 = vpush %v2061_v6 }
 0x285   :  { %3214 = vpush %v2063_v50  ;;  %2469 = vrot.lane.b32.xlu0 %v4238_v40, %s5401_s8 }
 0x287   :  { %v2065_v10 = vpop.permute.xlu1 %2064 }
 0x288   :  { %742 = vadd.xlane.f32.xlu1 %v741_v14  ;;  %3216 = vpush %v2065_v10 }
 0x289   :  { %3218 = vpush %v4068_v54  ;;  %2473 = vrot.lane.b32.xlu0 %v4245_v27, %s5401_s8  ;;  %v2943_v54 = vld [vmem:[%s5383_s6 + $0x1] ss:$0 sm:$0xff] }
 0x28a   :  { %3220 = vpush %v4116_v53 }
 0x28b   :  { %3222 = vpush %v4075_v60  ;;  %v2130_v52 = vpop.permute.xlu1 %2129  ;;  %v2242_v60 = vpop.permute.xlu0 %2241 }
 0x28c   :  { %3224 = vpush %v4121_v36  ;;  %v2945_v36 = vld [vmem:[%s5383_s6 + $0x3] ss:$0 sm:$0xff] }
 0x28d   :  { %3226 = vpush %v2128_v1  ;;  %2513 = vrot.lane.b32.xlu0 %v4238_v40, %s5400_s28 }
 0x28e   :  { %3228 = vpush %v2130_v52 }
 0x28f   :  { %3230 = vpush %v2132_v24  ;;  %v2134_v30 = vpop.permute.xlu1 %2133  ;;  %v2246_v16 = vpop.permute.xlu0 %2245 }
 0x290   :  { %3232 = vpush %v2134_v30 }
 0x291   :  { %3234 = vpush %v2172_v22  ;;  %2517 = vrot.lane.b32.xlu0 %v4245_v27, %s5400_s28 }
 0x293   :  { %v2174_v53 = vpop.permute.xlu1 %2173  ;;  %v2286_v17 = vpop.permute.xlu0 %2285 }
 0x294   :  { %3236 = vpush %v2174_v53 }
 0x295   :  { %3238 = vpush %v2176_v37  ;;  %2580 = vperm.xlu0 %3327, %v2943_v54  }
 0x297   :  { %v2178_v12 = vpop.permute.xlu1 %2177 }
 0x298   :  { %3240 = vpush %v2178_v12 }
 0x299   :  { %3242 = vpush %v4092_v2  ;;  %2588 = vperm.xlu0 %3327, %v2945_v36   ;;  %2356 = vrot.lane.b32.xlu1 %v4220_v44, %s5401_s8 }
 0x29a   :  { %3244 = vpush %v4135_v0  ;;  %v4277_v0 = vrot.slane %v4092_v2, 2  ;;  %v2942_v2 = vld [vmem:[%s5383_s6] ss:$0 sm:$0xff] }
 0x29b   :  { %3246 = vpush %v4101_v3  ;;  %v2244_v13 = vpop.permute.xlu1 %2243 }
 0x29c   :  { %3248 = vpush %v4147_v63  ;;  %v4282_v63 = vrot.slane %v4101_v3, 2 }
 0x29d   :  { %3250 = vpush %v2242_v60  ;;  %2360 = vrot.lane.b32.xlu1 %v4229_v51, %s5401_s8 }
 0x29e   :  { %3252 = vpush %v2244_v13 }
 0x29f   :  { %3254 = vpush %v2246_v16  ;;  %v2248_v61 = vpop.permute.xlu1 %2247 }
 0x2a0   :  { %3256 = vpush %v2248_v61 }
 0x2a1   :  { %3258 = vpush %v2286_v17  ;;  %2398 = vrot.lane.b32.xlu1 %v4210_v28, %s5400_s28 }
 0x2a3   :  { %v2288_v25 = vpop.permute.xlu1 %2287 }
 0x2a4   :  { %3260 = vpush %v2288_v25 }
 0x2a5   :  { %2402 = vrot.lane.b32.xlu1 %v4215_v47, %s5400_s28 }
 0x2a9   :  { %2467 = vrot.lane.b32.xlu1 %v4277_v0, %s5401_s8 }
 0x2ab   :  { %v725_v29 = vpop.xlane.xlu0 %724 }
 0x2ad   :  { %2471 = vrot.lane.b32.xlu1 %v4282_v63, %s5401_s8 }
 0x2af   :  { %v731_v32 = vpop.xlane.xlu0 %730 }
 0x2b1   :  { %2511 = vrot.lane.b32.xlu1 %v4277_v0, %s5400_s28 }
 0x2b3   :  { %v737_v38 = vpop.xlane.xlu0 %736 }
 0x2b5   :  { %2515 = vrot.lane.b32.xlu1 %v4282_v63, %s5400_s28 }
 0x2b7   :  { %v2290_v31 = vpop.permute.xlu0 %2289 }
 0x2b8   :  { %3262 = vpush %v2290_v31 }
 0x2b9   :  { %2576 = vperm.xlu1 %3328, %v2942_v2  }
 0x2d4   :  { %v728_v3 = vpop.xlane.xlu1 %727 }
 0x2d5   :  { %v747_v7 = vadd.f32 %v728_v3, %v725_v29  ;;  %v817_v29 = vmul.f32 %v3912_v15, %v4140_v62 }
 0x2d7   :  { %v748_v39 = vrot.slane %v747_v7, 4 }
 0x2d8   :  { %v734_v43 = vpop.xlane.xlu1 %733 }
 0x2d9   :  { %v749_v20 = vadd.f32 %v748_v39, %v747_v7  ;;  %v754_v33 = vadd.f32 %v734_v43, %v731_v32  ;;  %v818_v32 = vmul.f32 %v3912_v15, %v4173_v21  ;;  %v820_v15 = vmul.f32 %v3931_v59, %v4181_v8 }
 0x2db   :  { %v750_v35 = vrot.slane %v749_v20, 2  ;;  %v755_v42 = vrot.slane %v754_v33, 4 }
 0x2dc   :  { %v740_v4 = vpop.xlane.xlu1 %739 }
 0x2dd   :  { %v751_v34 = vadd.f32 %v750_v35, %v749_v20  ;;  %v756_v50 = vadd.f32 %v755_v42, %v754_v33  ;;  %v761_v48 = vadd.f32 %v740_v4, %v737_v38 }
 0x2df   :  { %v752_v1 = vrot.slane %v751_v34, 1  ;;  %v757_v46 = vrot.slane %v756_v50, 2  ;;  %v762_v9 = vrot.slane %v761_v48, 4 }
 0x2e0   :  { %v2292_v24 = vpop.permute.xlu1 %2291 }
 0x2e1   :  { %v753_v6 = vadd.f32 %v752_v1, %v751_v34  ;;  %v758_v19 = vadd.f32 %v757_v46, %v756_v50  ;;  %v763_v22 = vadd.f32 %v762_v9, %v761_v48  ;;  %3264 = vpush %v2292_v24 }
 0x2e2   :  { %3266 = vpush %v4210_v28 }
 0x2e3   :  { %v775_v10 = vmul.f32 0.00390625, %v753_v6  ;;  %v759_v14 = vrot.slane %v758_v19, 1  ;;  %v764_v52 = vrot.slane %v763_v22, 2  ;;  %3268 = vpush %v4220_v44  ;;  %v816_v44 = vmul.f32 %v3908_v49, %v4168_v5 }
 0x2e4   :  { %3270 = vpush %v4215_v47  ;;  %v815_v47 = vmul.f32 %v3908_v49, %v4128_v18  ;;  %v819_v49 = vmul.f32 %v3931_v59, %v4153_v23 }
 0x2e5   :  { %v823_v37 = vadd.f32 1e-05, %v775_v10  ;;  %v760_v30 = vadd.f32 %v759_v14, %v758_v19  ;;  %v765_v54 = vadd.f32 %v764_v52, %v763_v22  ;;  %3272 = vpush %v4229_v51 }
 0x2e7   :  { %3329 = vrsqrt.f32 %v823_v37  ;;  %v776_v60 = vmul.f32 0.00390625, %v760_v30  ;;  %v766_v53 = vrot.slane %v765_v54, 1 }
 0x2e8   :  { %v4297_v36 = vpop.xlane.xlu0 %745 }
 0x2e9   :  { %v824_v12 = vadd.f32 1e-05, %v776_v60  ;;  %v767_v16 = vadd.f32 %v766_v53, %v765_v54 }
 0x2eb   :  { %3331 = vrsqrt.f32 %v824_v12  ;;  %v777_v28 = vmul.f32 0.00390625, %v767_v16 }
 0x2ec   :  { %v2355_v13 = vpop.permute.xlu0 %2354 }
 0x2ed   :  { %v825_v17 = vadd.f32 1e-05, %v777_v28  ;;  %3274 = vpush %v2355_v13 }
 0x2ef   :  { %3333 = vrsqrt.f32 %v825_v17 }
 0x2f4   :  { %v3330_v51 = vpop.eup %3329 }
 0x2f5   :  { %v831_v61 = vmul.f32 %v3330_v51, %v815_v47  ;;  %v832_v25 = vmul.f32 %v3330_v51, %v816_v44 }
 0x2f7   :  { %v875_v38 = vadd.f32 %v3919_v55, %v831_v61  ;;  %v876_v2 = vadd.f32 %v3919_v55, %v832_v25  ;;  %v2944_v25 = vld [vmem:[%s5383_s6 + $0x2] ss:$0 sm:$0xff]  ;;  %s4354_s6 = spop %3026 }
 0x2f8   :  { %v3332_v31 = vpop.eup %3331  ;;  %5402 = sst [smem:[#allocation7_spill]] %s4354_s6  ;;  %s4356_s11 = spop %3028 }
 0x2f9   :  { %v883_v3 = vmax.f32 %v875_v38, 0.0  ;;  %v833_v7 = vmul.f32 %v3332_v31, %v817_v29  ;;  %v884_v18 = vmax.f32 %v876_v2, 0.0  ;;  %v834_v39 = vmul.f32 %v3332_v31, %v818_v32  ;;  %5403 = sst [smem:[#allocation8_spill]] %s4356_s11  ;;  %s4358_s29 = spop %3030 }
 0x2fa   :  { %5404 = sst [smem:[#allocation9_spill]] %s4358_s29  ;;  %s4360_s12 = spop %3032 }
 0x2fb   :  { %v877_v5 = vadd.f32 %v3925_v26, %v833_v7  ;;  %v895_v43 = vrot.slane %v883_v3, 1  ;;  %v911_v20 = vrot.slane %v884_v18, 1  ;;  %v878_v62 = vadd.f32 %v3925_v26, %v834_v39  ;;  %5405 = sst [smem:[#allocation10_spill]] %s4360_s12  ;;  %s4362_s14 = spop %3034 }
 0x2fc   :  { %v3334_v33 = vpop.eup %3333  ;;  %s4364_s15 = spop %3036 }
 0x2fd   :  { %v885_v21 = vmax.f32 %v877_v5, 0.0  ;;  %v835_v55 = vmul.f32 %v3334_v33, %v819_v49  ;;  %v903_v35 = vmax.f32 %v883_v3, %v895_v43  ;;  %v919_v42 = vmax.f32 %v884_v18, %v911_v20  ;;  %s4366_s26 = spop %3038 }
 0x2fe   :  { %v886_v4 = vmax.f32 %v878_v62, 0.0  ;;  %v836_v34 = vmul.f32 %v3334_v33, %v820_v15  ;;  %v2359_v15 = vpop.permute.xlu0 %2358  ;;  %s4369_s0 = spop %3040 }
 0x2ff   :  { %v879_v23 = vadd.f32 %v3921_v56, %v835_v55  ;;  %v927_v50 = vrot.slane %v903_v35, 1  ;;  %v935_v48 = vrot.slane %v903_v35, 2  ;;  %v943_v1 = vrot.slane %v903_v35, 3  ;;  %s4373_s25 = spop %3042 }
 0x300   :  { %v896_v8 = vrot.slane %v885_v21, 1  ;;  %v912_v46 = vrot.slane %v886_v4, 1  ;;  %v955_v9 = vrot.slane %v919_v42, 4  ;;  %v880_v6 = vadd.f32 %v3921_v56, %v836_v34  ;;  %s4376_s27 = spop %3044 }
 0x301   :  { %v887_v26 = vmax.f32 %v879_v23, 0.0  ;;  %v988_v59 = vsel %vm987_vm4, %v903_v35, %v927_v50  ;;  %v963_v19 = vrot.slane %v919_v42, 5  ;;  %v971_v52 = vrot.slane %v919_v42, 6  ;;  %s4378_s20 = spop %3046 }
 0x302   :  { %v993_v24 = vsel %vm992_vm5, %v988_v59, %v935_v48  ;;  %v904_v10 = vmax.f32 %v885_v21, %v896_v8  ;;  %v920_v30 = vmax.f32 %v886_v4, %v912_v46  ;;  %v888_v54 = vmax.f32 %v880_v6, 0.0  ;;  %s4380_s21 = spop %3048 }
 0x303   :  { %v998_v22 = vsel %vm997_vm6, %v993_v24, %v943_v1  ;;  %v897_v14 = vrot.slane %v887_v26, 1  ;;  %v979_v60 = vrot.slane %v919_v42, 7  ;;  %s4382_s23 = spop %3050 }
 0x304   :  { %v1003_v37 = vsel %vm1002_vm7, %v998_v22, %v955_v9  ;;  %v928_v12 = vrot.slane %v904_v10, 1  ;;  %v936_v16 = vrot.slane %v904_v10, 2  ;;  %v944_v56 = vrot.slane %v904_v10, 3  ;;  %5406 = sst [smem:[#allocation11_spill]] %s4382_s23  ;;  %s4384_s24 = spop %3052 }
 0x305   :  { %v1008_v53 = vsel %vm1007_vm8, %v1003_v37, %v963_v19  ;;  %v905_v47 = vmax.f32 %v887_v26, %v897_v14  ;;  %v956_v44 = vrot.slane %v920_v30, 4  ;;  %v913_v61 = vrot.slane %v888_v54, 1  ;;  %v2401_v26 = vpop.permute.xlu0 %2400  ;;  %5407 = sst [smem:[#allocation12_spill]] %s4384_s24  ;;  %s4390_s16 = spop %3054 }
 0x306   :  { %v1013_v28 = vsel %vm1012_vm9, %v1008_v53, %v971_v52  ;;  %v989_v17 = vsel %vm987_vm4, %v904_v10, %v928_v12  ;;  %v964_v29 = vrot.slane %v920_v30, 5  ;;  %v972_v31 = vrot.slane %v920_v30, 6  ;;  %5408 = sst [smem:[#allocation13_spill]] %s4390_s16  ;;  %s4392_s22 = spop %3056 }
 0x307   :  { %v4324_v13 = vsel %vm1017_vm10, %v1013_v28, %v979_v60  ;;  %v994_v51 = vsel %vm992_vm5, %v989_v17, %v936_v16  ;;  %v929_v38 = vrot.slane %v905_v47, 1  ;;  %v937_v2 = vrot.slane %v905_v47, 2  ;;  %5409 = sst [smem:[#allocation14_spill]] %s4392_s22  ;;  %s4480_s1 = spop %3058 }
 0x308   :  { %1026 = vrot.lane.b32.xlu1 %v4324_v13, %s5401_s8  ;;  %v999_v32 = vsel %vm997_vm6, %v994_v51, %v944_v56  ;;  %v921_v7 = vmax.f32 %v888_v54, %v913_v61  ;;  %v980_v18 = vrot.slane %v920_v30, 7  ;;  %v945_v43 = vrot.slane %v905_v47, 3  ;;  %s4483_s19 = spop %3060 }
 0x309   :  { %v1004_v3 = vsel %vm1002_vm7, %v999_v32, %v956_v44  ;;  %v990_v49 = vsel %vm987_vm4, %v905_v47, %v929_v38  ;;  %v2405_v6 = vpop.permute.xlu0 %2404  ;;  %s4485_s3 = spop %3062 }
 0x30a   :  { %v1009_v39 = vsel %vm1007_vm8, %v1004_v3, %v964_v29  ;;  %v957_v62 = vrot.slane %v921_v7, 4  ;;  %v995_v33 = vsel %vm992_vm5, %v990_v49, %v937_v2  ;;  %v965_v21 = vrot.slane %v921_v7, 5  ;;  %s4488_s4 = spop %3064 }
 0x30b   :  { %v1014_v5 = vsel %vm1012_vm9, %v1009_v39, %v972_v31  ;;  %v1000_v55 = vsel %vm997_vm6, %v995_v33, %v945_v43  ;;  %v973_v35 = vrot.slane %v921_v7, 6  ;;  %v981_v4 = vrot.slane %v921_v7, 7  ;;  %s4491_s2 = spop %3066 }
 0x30c   :  { %2584 = vperm.xlu1 %3328, %v2944_v25   ;;  %v4339_v20 = vsel %vm1017_vm10, %v1014_v5, %v980_v18  ;;  %v1005_v42 = vsel %vm1002_vm7, %v1000_v55, %v957_v62  ;;  %5414 = sst [smem:[#allocation19_spill]] %s4491_s2  ;;  %s4493_s30 = spop %3068 }
 0x30d   :  { %1028 = vrot.lane.b32.xlu0 %v4339_v20, %s5401_s8  ;;  %v1010_v34 = vsel %vm1007_vm8, %v1005_v42, %v965_v21  ;;  %v2470_v14 = vpop.permute.xlu0 %2469  ;;  %5415 = sst [smem:[#allocation20_spill]] %s4493_s30  ;;  %s4497_s10 = spop %3070 }
 0x30e   :  { %v1015_v23 = vsel %vm1012_vm9, %v1010_v34, %v973_v35  ;;  %5416 = sst [smem:[#allocation21_spill]] %s4497_s10 }
 0x30f   :  { %v4349_v48 = vsel %vm1017_vm10, %v1015_v23, %v981_v4 }
 0x310   :  { %1030 = vrot.lane.b32.xlu1 %v4349_v48, %s5401_s8 }
 0x311   :  { %v743_v50 = vpop.xlane.xlu1 %742  ;;  %v2474_v60 = vpop.permute.xlu0 %2473 }
 0x312   :  { %v768_v1 = vadd.f32 %v4297_v36, %v743_v50 }
 0x314   :  { %v769_v59 = vrot.slane %v768_v1, 4 }
 0x315   :  { %v2357_v8 = vpop.permute.xlu1 %2356 }
 0x316   :  { %v770_v46 = vadd.f32 %v769_v59, %v768_v1  ;;  %3276 = vpush %v2357_v8 }
 0x317   :  { %3278 = vpush %v2359_v15 }
 0x318   :  { %v771_v9 = vrot.slane %v770_v46, 2 }
 0x319   :  { %v2361_v24 = vpop.permute.xlu1 %2360 }
 0x31a   :  { %v772_v19 = vadd.f32 %v771_v9, %v770_v46  ;;  %3280 = vpush %v2361_v24 }
 0x31c   :  { %v773_v22 = vrot.slane %v772_v19, 1 }
 0x31d   :  { %v2399_v36 = vpop.permute.xlu1 %2398 }
 0x31e   :  { %v774_v10 = vadd.f32 %v773_v22, %v772_v19  ;;  %3282 = vpush %v2399_v36 }
 0x31f   :  { %3284 = vpush %v2401_v26 }
 0x320   :  { %v778_v52 = vmul.f32 0.00390625, %v774_v10 }
 0x321   :  { %v2403_v37 = vpop.permute.xlu1 %2402 }
 0x322   :  { %v826_v30 = vadd.f32 1e-05, %v778_v52  ;;  %3286 = vpush %v2403_v37 }
 0x323   :  { %3288 = vpush %v2405_v6 }
 0x324   :  { %3335 = vrsqrt.f32 %v826_v30  ;;  %3290 = vpush %v4277_v0  ;;  %v2514_v0 = vpop.permute.xlu0 %2513 }
 0x325   :  { %v2468_v54 = vpop.permute.xlu1 %2467  ;;  %3292 = vpush %v4238_v40 }
 0x326   :  { %3294 = vpush %v4282_v63  ;;  %v821_v63 = vmul.f32 %v3933_v41, %v4233_v45 }
 0x327   :  { %3296 = vpush %v4245_v27  ;;  %v822_v27 = vmul.f32 %v3933_v41, %v4193_v58 }
 0x328   :  { %3298 = vpush %v2468_v54  ;;  %v2518_v28 = vpop.permute.xlu0 %2517 }
 0x329   :  { %v2472_v53 = vpop.permute.xlu1 %2471  ;;  %3300 = vpush %v2470_v14 }
 0x32a   :  { %3302 = vpush %v2472_v53 }
 0x32b   :  { %3304 = vpush %v2474_v60 }
 0x32c   :  { %v4406_v15 = vpop.permute.xlu0 %2580 }
 0x32d   :  { %v2512_v40 = vpop.permute.xlu1 %2511  ;;  %5411 = vst [vmem:[#allocation16_spill] sm:$0xff] %v4406_v15 }
 0x32e   :  { %3306 = vpush %v2512_v40 }
 0x32f   :  { %3308 = vpush %v2514_v0 }
 0x330   :  { %v4411_v35 = vpop.permute.xlu0 %2588 }
 0x331   :  { %v3336_v12 = vpop.eup %3335  ;;  %v2516_v16 = vpop.permute.xlu1 %2515  ;;  %5412 = vst [vmem:[#allocation17_spill] sm:$0xff] %v4411_v35 }
 0x332   :  { %v837_v56 = vmul.f32 %v3336_v12, %v821_v63  ;;  %v838_v17 = vmul.f32 %v3336_v12, %v822_v27  ;;  %3310 = vpush %v2516_v16 }
 0x333   :  { %3312 = vpush %v2518_v28 }
 0x334   :  { %v881_v47 = vadd.f32 %v3927_v57, %v837_v56  ;;  %v882_v44 = vadd.f32 %v3927_v57, %v838_v17 }
 0x335   :  { %v4404_v33 = vpop.permute.xlu1 %2576 }
 0x336   :  { %v889_v51 = vmax.f32 %v881_v47, 0.0  ;;  %v890_v58 = vmax.f32 %v882_v44, 0.0  ;;  %5410 = vst [vmem:[#allocation15_spill] sm:$0xff] %v4404_v33 }
 0x338   :  { %v898_v61 = vrot.slane %v889_v51, 1  ;;  %v914_v25 = vrot.slane %v890_v58, 1 }
 0x33a   :  { %v906_v41 = vmax.f32 %v889_v51, %v898_v61  ;;  %v922_v45 = vmax.f32 %v890_v58, %v914_v25 }
 0x33c   :  { %v930_v29 = vrot.slane %v906_v41, 1  ;;  %v938_v32 = vrot.slane %v906_v41, 2  ;;  %v946_v38 = vrot.slane %v906_v41, 3  ;;  %v958_v31 = vrot.slane %v922_v45, 4 }
 0x33d   :  { %v966_v7 = vrot.slane %v922_v45, 5  ;;  %v974_v39 = vrot.slane %v922_v45, 6  ;;  %v982_v49 = vrot.slane %v922_v45, 7 }
 0x33e   :  { %v991_v2 = vsel %vm987_vm4, %v906_v41, %v930_v29 }
 0x33f   :  { %v996_v3 = vsel %vm992_vm5, %v991_v2, %v938_v32 }
 0x340   :  { %v1001_v18 = vsel %vm997_vm6, %v996_v3, %v946_v38 }
 0x341   :  { %v1006_v57 = vsel %vm1002_vm7, %v1001_v18, %v958_v31  ;;  %vm1191_vm7 = vcmask 72712  }
 0x342   :  { %v1011_v5 = vsel %vm1007_vm8, %v1006_v57, %v966_v7  ;;  %vm2595_vm8 = vcmask 64512  }
 0x343   :  { %v1016_v43 = vsel %vm1012_vm9, %v1011_v5, %v974_v39 }
 0x344   :  { %v1021_v62 = vsel %vm1017_vm10, %v1016_v43, %v982_v49 }
 0x345   :  { %1032 = vrot.lane.b32.xlu0 %v1021_v62, %s5401_s8 }
 0x37a   :  { %v1027_v21 = vpop.permute.xlu1 %1026 }
 0x37b   :  { %v1038_v55 = vmax.f32 %v4324_v13, %v1027_v21 }
 0x37d   :  { %1058 = vrot.lane.b32.xlu0 %v1038_v55, %s5400_s28  ;;  %1046 = vrot.lane.b32.xlu1 %v1038_v55, %s5401_s8 }
 0x37f   :  { %v1029_v42 = vpop.permute.xlu0 %1028 }
 0x380   :  { %v4418_v13 = vmax.f32 %v4339_v20, %v1029_v42 }
 0x381   :  { %1082 = vrot.lane.b32.xlu0 %v1038_v55, %s3372_s18  ;;  %1070 = vrot.lane.b32.xlu1 %v1038_v55, %s5394_s9 }
 0x385   :  { %1106 = vrot.lane.b32.xlu0 %v1038_v55, %s3374_s13  ;;  %1094 = vrot.lane.b32.xlu1 %v1038_v55, %s3375_s17 }
 0x387   :  { %v4427_v4 = vpop.permute.xlu1 %2584 }
 0x388   :  { %5413 = vst [vmem:[#allocation18_spill] sm:$0xff] %v4427_v4 }
 0x389   :  { %1048 = vrot.lane.b32.xlu0 %v4418_v13, %s5401_s8  ;;  %1118 = vrot.lane.b32.xlu1 %v1038_v55, %s3376_s5 }
 0x38b   :  { %v1031_v20 = vpop.permute.xlu1 %1030 }
 0x38c   :  { %v4438_v34 = vmax.f32 %v4349_v48, %v1031_v20 }
 0x38d   :  { %1072 = vrot.lane.b32.xlu0 %v4418_v13, %s5394_s9  ;;  %1060 = vrot.lane.b32.xlu1 %v4418_v13, %s5400_s28 }
 0x391   :  { %1096 = vrot.lane.b32.xlu0 %v4418_v13, %s3375_s17  ;;  %1084 = vrot.lane.b32.xlu1 %v4418_v13, %s3372_s18 }
 0x395   :  { %1120 = vrot.lane.b32.xlu0 %v4418_v13, %s3376_s5  ;;  %1108 = vrot.lane.b32.xlu1 %v4418_v13, %s3374_s13 }
 0x399   :  { %1062 = vrot.lane.b32.xlu0 %v4438_v34, %s5400_s28  ;;  %1050 = vrot.lane.b32.xlu1 %v4438_v34, %s5401_s8 }
 0x39d   :  { %1086 = vrot.lane.b32.xlu0 %v4438_v34, %s3372_s18  ;;  %1074 = vrot.lane.b32.xlu1 %v4438_v34, %s5394_s9 }
 0x3a1   :  { %1110 = vrot.lane.b32.xlu0 %v4438_v34, %s3374_s13  ;;  %1098 = vrot.lane.b32.xlu1 %v4438_v34, %s3375_s17 }
 0x3a5   :  { %1122 = vrot.lane.b32.xlu1 %v4438_v34, %s3376_s5 }
 0x3b7   :  { %v1033_v23 = vpop.permute.xlu0 %1032 }
 0x3b8   :  { %v4454_v50 = vmax.f32 %v1021_v62, %v1033_v23  ;;  %v1233_v23 = vstv %s4364_s15 }
 0x3ba   :  { %1052 = vrot.lane.b32.xlu0 %v4454_v50, %s5401_s8  ;;  %1064 = vrot.lane.b32.xlu1 %v4454_v50, %s5400_s28 }
 0x3be   :  { %1076 = vrot.lane.b32.xlu0 %v4454_v50, %s5394_s9  ;;  %1088 = vrot.lane.b32.xlu1 %v4454_v50, %s3372_s18  ;;  %s5417_s18 = smov 1  }
 0x3c2   :  { %1100 = vrot.lane.b32.xlu0 %v4454_v50, %s3375_s17  ;;  %1112 = vrot.lane.b32.xlu1 %v4454_v50, %s3374_s13  ;;  %s4500_s13 = spop %3072 }
 0x3c3   :  { %5418 = sst [smem:[#allocation22_spill]] %s4500_s13  ;;  %s4504_s17 = spop %3074 }
 0x3c6   :  { %1124 = vrot.lane.b32.xlu0 %v4454_v50, %s3376_s5  ;;  %s4507_s5 = spop %3076 }
 0x3c7   :  { %s4510_s9 = spop %3078 }
 0x3c8   :  { %s4513_s7 = spop %3080 }
 0x3c9   :  { %s4516_s22 = spop %3082 }
 0x3ca   :  { %5419 = sst [smem:[#allocation23_spill]] %s4516_s22  ;;  %s4519_s16 = spop %3084 }
 0x3cb   :  { %5420 = sst [smem:[#allocation24_spill]] %s4519_s16  ;;  %s4523_s24 = spop %3086 }
 0x3cc   :  { %5421 = sst [smem:[#allocation25_spill]] %s4523_s24  ;;  %s4525_s23 = spop %3088 }
 0x3cd   :  { %5422 = sst [smem:[#allocation26_spill]] %s4525_s23  ;;  %s4529_s12 = spop %3090 }
 0x3ce   :  { %5423 = sst [smem:[#allocation27_spill]] %s4529_s12  ;;  %s4532_s29 = spop %3092 }
 0x3cf   :  { %5424 = sst [smem:[#allocation28_spill]] %s4532_s29  ;;  %s4535_s11 = spop %3094 }
 0x3d0   :  { %5425 = sst [smem:[#allocation29_spill]] %s4535_s11  ;;  %s4537_s6 = spop %3096 }
 0x3d1   :  { %5426 = sst [smem:[#allocation30_spill]] %s4537_s6  ;;  %s4540_s23 = spop %3098 }
 0x3d2   :  { %s4543_s12 = spop %3100 }
 0x3d3   :  { %5427 = sst [smem:[#allocation31_spill]] %s4543_s12  ;;  %s4546_s29 = spop %3102 }
 0x3d4   :  { %5428 = sst [smem:[#allocation32_spill]] %s4546_s29  ;;  %s4550_s6 = spop %3104 }
 0x3d5   :  { %5429 = sst [smem:[#allocation33_spill]] %s4550_s6  ;;  %s4552_s11 = spop %3106 }
 0x3d6   :  { %5430 = sst [smem:[#allocation34_spill]] %s4552_s11  ;;  %s4554_s24 = spop %3108 }
 0x3d7   :  { %5431 = sst [smem:[#allocation35_spill]] %s4554_s24  ;;  %s4556_s16 = spop %3110 }
 0x3d8   :  { %5432 = sst [smem:[#allocation36_spill]] %s4556_s16  ;;  %s4558_s22 = spop %3112 }
 0x3d9   :  { %5433 = sst [smem:[#allocation37_spill]] %s4558_s22  ;;  %s4560_s13 = spop %3114 }
 0x3da   :  { %5434 = sst [smem:[#allocation38_spill]] %s4560_s13  ;;  %s4562_s10 = spop %3116 }
 0x3db   :  { %5435 = sst [smem:[#allocation39_spill]] %s4562_s10  ;;  %s4564_s30 = spop %3118 }
 0x3dc   :  { %5436 = sst [smem:[#allocation40_spill]] %s4564_s30  ;;  %s4566_s2 = spop %3120 }
 0x3dd   :  { %5437 = sst [smem:[#allocation41_spill]] %s4566_s2  ;;  %s4568_s29 = spop %3122 }
 0x3de   :  { %s4570_s12 = spop %3124 }
 0x3df   :  { %5438 = sst [smem:[#allocation42_spill]] %s4570_s12  ;;  %s4572_s6 = spop %3126 }
 0x3e0   :  { %5439 = sst [smem:[#allocation43_spill]] %s4572_s6  ;;  %s4576_s22 = spop %3128 }
 0x3e1   :  { %5440 = sst [smem:[#allocation44_spill]] %s4576_s22  ;;  %s4578_s13 = spop %3130 }
 0x3e2   :  { %5441 = sst [smem:[#allocation45_spill]] %s4578_s13  ;;  %s4581_s2 = spop %3132 }
 0x3e3   :  { %5442 = sst [smem:[#allocation46_spill]] %s4581_s2  ;;  %s4584_s30 = spop %3134 }
 0x3e4   :  { %5443 = sst [smem:[#allocation47_spill]] %s4584_s30  ;;  %s4586_s10 = spop %3136 }
 0x3e5   :  { %5444 = sst [smem:[#allocation48_spill]] %s4586_s10  ;;  %s4590_s16 = spop %3138 }
 0x3e6   :  { %5445 = sst [smem:[#allocation49_spill]] %s4590_s16  ;;  %s4592_s13 = spop %3140 }
 0x3e7   :  { %5446 = sst [smem:[#allocation50_spill]] %s4592_s13  ;;  %s4595_s2 = spop %3142 }
 0x3e8   :  { %5447 = sst [smem:[#allocation51_spill]] %s4595_s2  ;;  %s4598_s30 = spop %3144 }
 0x3e9   :  { %5448 = sst [smem:[#allocation52_spill]] %s4598_s30  ;;  %s4601_s10 = spop %3146 }
 0x3ea   :  { %5449 = sst [smem:[#allocation53_spill]] %s4601_s10  ;;  %s4603_s24 = spop %3148 }
 0x3eb   :  { %5450 = sst [smem:[#allocation54_spill]] %s4603_s24  ;;  %s4605_s11 = spop %3150 }
 0x3ec   :  { %5451 = sst [smem:[#allocation55_spill]] %s4605_s11  ;;  %s4607_s16 = spop %3152 }
 0x3ed   :  { %5452 = sst [smem:[#allocation56_spill]] %s4607_s16  ;;  %s4609_s13 = spop %3154 }
 0x3ee   :  { %5453 = sst [smem:[#allocation57_spill]] %s4609_s13  ;;  %s4611_s22 = spop %3156 }
 0x3ef   :  { %v1059_v48 = vpop.permute.xlu0 %1058  ;;  %v1047_v1 = vpop.permute.xlu1 %1046  ;;  %5454 = sst [smem:[#allocation58_spill]] %s4611_s22  ;;  %s4613_s6 = spop %3158 }
 0x3f0   :  { %v1131_v11 = vsel %vm1130_vm13, %v1038_v55, %v1047_v1  ;;  %5455 = sst [smem:[#allocation59_spill]] %s4613_s6  ;;  %s4615_s2 = spop %3160 }
 0x3f1   :  { %v1136_v59 = vsel %vm1135_vm14, %v1131_v11, %v1059_v48  ;;  %5456 = sst [smem:[#allocation60_spill]] %s4615_s2  ;;  %s4617_s12 = spop %3162  ;;  %v1236_v11 = vstv %s4366_s26 }
 0x3f2   :  { %5457 = sst [smem:[#allocation61_spill]] %s4617_s12  ;;  %s4619_s30 = spop %3164 }
 0x3f3   :  { %v1083_v26 = vpop.permute.xlu0 %1082  ;;  %v1071_v8 = vpop.permute.xlu1 %1070  ;;  %5458 = sst [smem:[#allocation62_spill]] %s4619_s30 }
 0x3f4   :  { %v1141_v46 = vsel %vm1140_vm15, %v1136_v59, %v1071_v8 }
 0x3f5   :  { %v1146_v24 = vsel %vm1145_vm0, %v1141_v46, %v1083_v26  ;;  %v1239_v26 = vstv %s4369_s0  ;;  %s5479_s0 = sld [smem:[#allocation31_spill]] }
 0x3f7   :  { %v1107_v9 = vpop.permute.xlu0 %1106  ;;  %v1095_v6 = vpop.permute.xlu1 %1094 }
 0x3f8   :  { %v1151_v19 = vsel %vm1150_vm1, %v1146_v24, %v1095_v6  ;;  %v1431_v24 = vstv %s4507_s5  ;;  %s5484_s5 = sld [smem:[#allocation42_spill]] }
 0x3f9   :  { %v1156_v36 = vsel %vm1155_vm2, %v1151_v19, %v1107_v9  ;;  %v1428_v9 = vstv %s4504_s17  ;;  %v1434_v19 = vstv %s4510_s9 }
 0x3fb   :  { %v1049_v22 = vpop.permute.xlu0 %1048  ;;  %v1119_v10 = vpop.permute.xlu1 %1118 }
 0x3fc   :  { %v1161_v14 = vsel %vm1160_vm3, %v1156_v36, %v1119_v10  ;;  %v1132_v52 = vsel %vm1130_vm13, %v4418_v13, %v1049_v22  ;;  %v1437_v22 = vstv %s4513_s7  ;;  %v1274_v36 = vstv %s4373_s25  ;;  %s5480_s25 = sld [smem:[#allocation32_spill]] }
 0x3fd   :  { %1179 = vrot.lane.b32.xlu1 %v1161_v14, %s5417_s18  ;;  %v1277_v10 = vstv %s4376_s27  ;;  %s5481_s27 = sld [smem:[#allocation33_spill]] }
 0x3ff   :  { %v1073_v37 = vpop.permute.xlu0 %1072  ;;  %v1061_v30 = vpop.permute.xlu1 %1060 }
 0x400   :  { %v1137_v54 = vsel %vm1135_vm14, %v1132_v52, %v1061_v30 }
 0x401   :  { %v1142_v53 = vsel %vm1140_vm15, %v1137_v54, %v1073_v37 }
 0x403   :  { %v1097_v60 = vpop.permute.xlu0 %1096  ;;  %v1085_v0 = vpop.permute.xlu1 %1084 }
 0x404   :  { %v1147_v40 = vsel %vm1145_vm0, %v1142_v53, %v1085_v0  ;;  %v1280_v53 = vstv %s4378_s20  ;;  %v1283_v0 = vstv %s4380_s21  ;;  %s5486_s20 = sld [smem:[#allocation44_spill]] }
 0x405   :  { %v1152_v63 = vsel %vm1150_vm1, %v1147_v40, %v1097_v60  ;;  %s5487_s21 = sld [smem:[#allocation53_spill]] }
 0x407   :  { %v1121_v27 = vpop.permute.xlu0 %1120  ;;  %v1109_v12 = vpop.permute.xlu1 %1108 }
 0x408   :  { %v1157_v16 = vsel %vm1155_vm2, %v1152_v63, %v1109_v12  ;;  %v1343_v63 = vstv %s4480_s1  ;;  %v1346_v12 = vstv %s4483_s19 }
 0x409   :  { %v1162_v28 = vsel %vm1160_vm3, %v1157_v16, %v1121_v27 }
 0x40a   :  { %1181 = vrot.lane.b32.xlu0 %v1162_v28, %s5417_s18  ;;  %v1349_v28 = vstv %s4485_s3  ;;  %s5496_s3 = sld [smem:[#allocation20_spill]] }
 0x40b   :  { %v1063_v56 = vpop.permute.xlu0 %1062  ;;  %v1051_v17 = vpop.permute.xlu1 %1050 }
 0x40c   :  { %v1133_v47 = vsel %vm1130_vm13, %v4438_v34, %v1051_v17  ;;  %v1230_v34 = vstv %s4362_s14  ;;  %v1539_v17 = vstv %s4540_s23 }
 0x40d   :  { %v1138_v51 = vsel %vm1135_vm14, %v1133_v47, %v1063_v56  ;;  %v1352_v56 = vstv %s4488_s4  ;;  %v1543_v47 = vstv %s5479_s0  ;;  %s5497_s4 = sld [smem:[#allocation21_spill]] }
 0x40f   :  { %v1087_v44 = vpop.permute.xlu0 %1086  ;;  %v1075_v58 = vpop.permute.xlu1 %1074 }
 0x410   :  { %v1143_v61 = vsel %vm1140_vm15, %v1138_v51, %v1075_v58  ;;  %v1551_v51 = vstv %s5481_s27  ;;  %v1655_v58 = vstv %s4568_s29  ;;  %s5500_s27 = sld [smem:[#allocation24_spill]] }
 0x411   :  { %v1148_v25 = vsel %vm1145_vm0, %v1143_v61, %v1087_v44  ;;  %v1547_v44 = vstv %s5480_s25  ;;  %v1658_v61 = vstv %s5484_s5  ;;  %s5499_s25 = sld [smem:[#allocation23_spill]] }
 0x413   :  { %v1099_v41 = vpop.permute.xlu1 %1098  ;;  %v1111_v45 = vpop.permute.xlu0 %1110 }
 0x414   :  { %v1153_v29 = vsel %vm1150_vm1, %v1148_v25, %v1099_v41 }
 0x415   :  { %v1158_v32 = vsel %vm1155_vm2, %v1153_v29, %v1111_v45 }
 0x417   :  { %v1123_v38 = vpop.permute.xlu1 %1122 }
 0x418   :  { %v1163_v2 = vsel %vm1160_vm3, %v1158_v32, %v1123_v38  ;;  %v1664_v32 = vstv %s5486_s20  ;;  %v1768_v38 = vstv %s5487_s21 }
 0x419   :  { %1183 = vrot.lane.b32.xlu1 %v1163_v2, %s5417_s18 }
 0x42c   :  { %v1053_v31 = vpop.permute.xlu0 %1052  ;;  %v1065_v3 = vpop.permute.xlu1 %1064 }
 0x42d   :  { %v1134_v7 = vsel %vm1130_vm13, %v4454_v50, %v1053_v31 }
 0x42e   :  { %v1139_v18 = vsel %vm1135_vm14, %v1134_v7, %v1065_v3 }
 0x430   :  { %v1077_v39 = vpop.permute.xlu0 %1076  ;;  %v1089_v57 = vpop.permute.xlu1 %1088 }
 0x431   :  { %v1144_v49 = vsel %vm1140_vm15, %v1139_v18, %v1077_v39 }
 0x432   :  { %v1149_v5 = vsel %vm1145_vm0, %v1144_v49, %v1089_v57 }
 0x434   :  { %v1101_v43 = vpop.permute.xlu0 %1100  ;;  %v1113_v21 = vpop.permute.xlu1 %1112 }
 0x435   :  { %v1154_v62 = vsel %vm1150_vm1, %v1149_v5, %v1101_v43 }
 0x436   :  { %v1159_v55 = vsel %vm1155_vm2, %v1154_v62, %v1113_v21 }
 0x438   :  { %v1125_v42 = vpop.permute.xlu0 %1124 }
 0x439   :  { %v1164_v13 = vsel %vm1160_vm3, %v1159_v55, %v1125_v42 }
 0x43a   :  { %1185 = vrot.lane.b32.xlu0 %v1164_v13, %s5417_s18  ;;  %s4621_s18 = spop %3166 }
 0x43b   :  { %5459 = sst [smem:[#allocation63_spill]] %s4621_s18  ;;  %s4623_s10 = spop %3168 }
 0x43c   :  { %5460 = sst [smem:[#allocation64_spill]] %s4623_s10  ;;  %s4625_s24 = spop %3170 }
 0x43d   :  { %5461 = sst [smem:[#allocation65_spill]] %s4625_s24  ;;  %s4627_s11 = spop %3172 }
 0x43e   :  { %s4629_s16 = spop %3174  ;;  %s5503_s20 = sld [smem:[#allocation65_spill]] }
 0x43f   :  { %5462 = sst [smem:[#allocation66_spill]] %s4629_s16  ;;  %s4631_s13 = spop %3176 }
 0x440   :  { %5463 = sst [smem:[#allocation67_spill]] %s4631_s13  ;;  %s4633_s22 = spop %3178 }
 0x441   :  { %5464 = sst [smem:[#allocation68_spill]] %s4633_s22  ;;  %s4635_s6 = spop %3180 }
 0x442   :  { %5465 = sst [smem:[#allocation69_spill]] %s4635_s6  ;;  %s4637_s2 = spop %3182 }
 0x443   :  { %5466 = sst [smem:[#allocation70_spill]] %s4637_s2  ;;  %s4639_s12 = spop %3184 }
 0x444   :  { %5467 = sst [smem:[#allocation71_spill]] %s4639_s12  ;;  %s4641_s30 = spop %3186 }
 0x445   :  { %5468 = sst [smem:[#allocation72_spill]] %s4641_s30  ;;  %s4643_s18 = spop %3188 }
 0x446   :  { %5469 = sst [smem:[#allocation73_spill]] %s4643_s18  ;;  %s4645_s10 = spop %3190 }
 0x447   :  { %5470 = sst [smem:[#allocation74_spill]] %s4645_s10  ;;  %s4647_s24 = spop %3192 }
 0x448   :  { %5471 = sst [smem:[#allocation75_spill]] %s4647_s24  ;;  %s4649_s16 = spop %3194 }
 0x449   :  { %s4651_s13 = spop %3196 }
 0x44a   :  { %s4653_s22 = spop %3198 }
 0x44b   :  { %5472 = sst [smem:[#allocation76_spill]] %s4653_s22  ;;  %s4655_s6 = spop %3200 }
 0x44c   :  { %5473 = sst [smem:[#allocation77_spill]] %s4655_s6  ;;  %s4657_s2 = spop %3202 }
 0x44d   :  { %s4659_s12 = spop %3204 }
 0x44e   :  { %s4661_s18 = spop %3206 }
 0x44f   :  { %5474 = sst [smem:[#allocation78_spill]] %s4661_s18  ;;  %s4663_s24 = spop %3208 }
 0x450   :  { %s4666_s10 = spop %3210 }
 0x451   :  { %5475 = sst [smem:[#allocation79_spill]] %s4666_s10  ;;  %s4668_s30 = spop %3212 }
 0x452   :  { %s4670_s22 = spop %3214 }
 0x453   :  { %s4672_s6 = spop %3216 }
 0x454   :  { %5476 = sst [smem:[#allocation80_spill]] %s4672_s6  ;;  %s4678_s18 = spop %3218 }
 0x455   :  { %s4682_s10 = spop %3220  ;;  %s5491_s6 = sld [smem:[#allocation56_spill]] }
 0x456   :  { %s4688_s14 = spop %3222 }
 0x457   :  { %s4699_s15 = spop %3224 }
 0x458   :  { %s4705_s26 = spop %3226 }
 0x459   :  { %5477 = sst [smem:[#allocation81_spill]] %s4705_s26  ;;  %s4715_s7 = spop %3228 }
 0x45a   :  { %5478 = sst [smem:[#allocation82_spill]] %s4715_s7  ;;  %s4727_s9 = spop %3230 }
 0x45b   :  { %5482 = sst [smem:[#allocation31_spill]] %s4727_s9  ;;  %s4729_s17 = spop %3232  ;;  %v1777_v7 = vstv %s5491_s6 }
 0x45c   :  { %5483 = sst [smem:[#allocation32_spill]] %s4729_s17  ;;  %s4739_s26 = spop %3234 }
 0x45d   :  { %s5485_s7 = sld [smem:[#allocation43_spill]]  ;;  %s4747_s1 = spop %3236 }
 0x45e   :  { %5488 = sst [smem:[#allocation33_spill]] %s4739_s26  ;;  %s4759_s23 = spop %3238 }
 0x45f   :  { %s5489_s9 = sld [smem:[#allocation54_spill]]  ;;  %s4765_s19 = spop %3240 }
 0x460   :  { %s5490_s17 = sld [smem:[#allocation55_spill]]  ;;  %s4779_s29 = spop %3242 }
 0x461   :  { %5492 = sst [smem:[#allocation42_spill]] %s4747_s1  ;;  %s4806_s0 = spop %3244 }
 0x462   :  { %5493 = sst [smem:[#allocation43_spill]] %s4759_s23  ;;  %s4818_s5 = spop %3246 }
 0x463   :  { %v1661_v29 = vstv %s5485_s7  ;;  %5494 = sst [smem:[#allocation44_spill]] %s4765_s19  ;;  %s4822_s21 = spop %3248 }
 0x464   :  { %s5495_s6 = sld [smem:[#allocation19_spill]] }
 0x465   :  { %v1771_v2 = vstv %s5489_s9  ;;  %s5498_s7 = sld [smem:[#allocation22_spill]] }
 0x466   :  { %v1774_v3 = vstv %s5490_s17  ;;  %s5501_s9 = sld [smem:[#allocation25_spill]] }
 0x467   :  { %s5502_s17 = sld [smem:[#allocation26_spill]] }
 0x468   :  { %s5504_s19 = sld [smem:[#allocation66_spill]] }
 0x469   :  { %s5505_s23 = sld [smem:[#allocation67_spill]] }
 0x46a   :  { %s5507_s1 = sld [smem:[#allocation77_spill]] }
 0x46f   :  { %v1180_v20 = vpop.permute.xlu1 %1179 }
 0x470   :  { %1192 = vst.msk [vmem:[#allocation3 + $0x1] sm:$0xff] %vm1191_vm7, %v1180_v20 }
 0x477   :  { %v4676_v50 = vld [vmem:[#allocation3] sm:$0xff] }
 0x478   :  { %v1242_v48 = vmul.f32 %v1233_v23, %v4676_v50  ;;  %v1241_v1 = vmul.f32 %v1230_v34, %v4676_v50  ;;  %v1244_v8 = vmul.f32 %v1239_v26, %v4676_v50  ;;  %v1243_v46 = vmul.f32 %v1236_v11, %v4676_v50  ;;  %v4694_v6 = vld [vmem:[#allocation3 + $0x2] sm:$0xff] }
 0x479   :  { %v1286_v14 = vmul.f32 %v1277_v10, %v4676_v50  ;;  %v1285_v52 = vmul.f32 %v1274_v36, %v4676_v50  ;;  %v4710_v37 = vmul.f32 %v1431_v24, %v4694_v6  ;;  %v4713_v30 = vmul.f32 %v1428_v9, %v4694_v6  ;;  %v4735_v16 = vld [vmem:[#allocation3 + $0x1] sm:$0xff] }
 0x47a   :  { %1251 = vrot.lane.b32.xlu0 %v1242_v48, %s5401_s8  ;;  %1249 = vrot.lane.b32.xlu1 %v1241_v1, %s5401_s8  ;;  %v4718_v54 = vmul.f32 %v1437_v22, %v4694_v6  ;;  %v4721_v60 = vmul.f32 %v1434_v19, %v4694_v6  ;;  %v1288_v40 = vmul.f32 %v1283_v0, %v4676_v50  ;;  %v1387_v11 = vstv %s5495_s6  ;;  %s4828_s6 = spop %3250 }
 0x47b   :  { %v1287_v27 = vmul.f32 %v1280_v53, %v4676_v50  ;;  %v1355_v41 = vmul.f32 %v1346_v12, %v4735_v16  ;;  %v1354_v45 = vmul.f32 %v1343_v63, %v4735_v16  ;;  %v1357_v57 = vmul.f32 %v1352_v56, %v4735_v16  ;;  %s4836_s26 = spop %3252 }
 0x47c   :  { %v1182_v59 = vpop.permute.xlu0 %1181  ;;  %v1356_v49 = vmul.f32 %v1349_v28, %v4735_v16  ;;  %v1390_v26 = vstv %s5496_s3  ;;  %v1396_v9 = vstv %s5498_s7  ;;  %s5506_s3 = sld [smem:[#allocation76_spill]]  ;;  %v1456_v22 = vstv %s5499_s25 }
 0x47d   :  { %1193 = vst.msk [vmem:[#allocation3 + $0x11] sm:$0xff] %vm1191_vm7, %v1182_v59  ;;  %v1399_v59 = vmul.f32 %v1390_v26, %v4735_v16  ;;  %v1401_v24 = vmul.f32 %v1396_v9, %v4735_v16  ;;  %v1459_v36 = vstv %s5500_s27  ;;  %v1462_v10 = vstv %s5501_s9  ;;  %s5517_s9 = sld [smem:[#allocation36_spill]] }
 0x47e   :  { %1255 = vrot.lane.b32.xlu0 %v1244_v8, %s5401_s8  ;;  %1253 = vrot.lane.b32.xlu1 %v1243_v46, %s5401_s8  ;;  %v1398_v8 = vmul.f32 %v1387_v11, %v4735_v16  ;;  %v1393_v46 = vstv %s5497_s4  ;;  %v1883_v53 = vstv %s4627_s11  ;;  %s4846_s4 = spop %3254 }
 0x47f   :  { %v1400_v19 = vmul.f32 %v1393_v46, %v4735_v16  ;;  %v1887_v0 = vstv %s5504_s19  ;;  %v1998_v63 = vstv %s4651_s13  ;;  %v2004_v56 = vstv %s5507_s1  ;;  %s4852_s7 = spop %3256  ;;  %s5510_s13 = sld [smem:[#allocation28_spill]] }
 0x480   :  { %s4865_s11 = spop %3258  ;;  %s5516_s19 = sld [smem:[#allocation35_spill]] }
 0x482   :  { %1295 = vrot.lane.b32.xlu0 %v1286_v14, %s5400_s28  ;;  %1293 = vrot.lane.b32.xlu1 %v1285_v52, %s5400_s28  ;;  %v1465_v14 = vstv %s5502_s17  ;;  %v1879_v52 = vstv %s5503_s20  ;;  %s5518_s20 = sld [smem:[#allocation37_spill]] }
 0x483   :  { %v2001_v28 = vstv %s5506_s3 }
 0x484   :  { %v4751_v25 = vld [vmem:[#allocation3 + $0x10] sm:$0xff] }
 0x485   :  { %v4761_v31 = vld [vmem:[#allocation3 + $0x11] sm:$0xff]  ;;  %v4774_v5 = vmul.f32 %v1543_v47, %v4751_v25  ;;  %v4777_v43 = vmul.f32 %v1539_v17, %v4751_v25  ;;  %v4783_v62 = vmul.f32 %v1551_v51, %v4751_v25  ;;  %v4786_v21 = vmul.f32 %v1547_v44, %v4751_v25 }
 0x486   :  { %1299 = vrot.lane.b32.xlu0 %v1288_v40, %s5400_s28  ;;  %1297 = vrot.lane.b32.xlu1 %v1287_v27, %s5400_s28  ;;  %v4767_v18 = vld [vmem:[#allocation3 + $0x12] sm:$0xff]  ;;  %v4789_v55 = vmul.f32 %v1658_v61, %v4761_v31  ;;  %v4792_v42 = vmul.f32 %v1655_v58, %v4761_v31  ;;  %v4795_v13 = vmul.f32 %v1664_v32, %v4761_v31  ;;  %v1891_v40 = vstv %s5505_s23  ;;  %s5515_s23 = sld [smem:[#allocation34_spill]] }
 0x487   :  { %v4798_v20 = vmul.f32 %v1661_v29, %v4761_v31  ;;  %v4801_v34 = vmul.f32 %v1771_v2, %v4767_v18  ;;  %v4804_v23 = vmul.f32 %v1768_v38, %v4767_v18  ;;  %v4811_v48 = vmul.f32 %v1777_v7, %v4767_v18 }
 0x488   :  { %v4814_v1 = vmul.f32 %v1774_v3, %v4767_v18  ;;  %v1995_v27 = vstv %s4649_s16  ;;  %v1468_v47 = vmul.f32 %v1459_v36, %v4694_v6  ;;  %v1467_v44 = vmul.f32 %v1456_v22, %v4694_v6  ;;  %s5508_s16 = sld [smem:[#allocation27_spill]] }
 0x489   :  { %v2108_v51 = vstv %s4678_s18  ;;  %v2111_v58 = vstv %s4682_s10  ;;  %v2114_v61 = vstv %s4688_s14  ;;  %v2117_v29 = vstv %s4699_s15  ;;  %s4876_s10 = spop %3260  ;;  %s5512_s14 = sld [smem:[#allocation29_spill]] }
 0x48a   :  { %1364 = vrot.lane.b32.xlu0 %v1355_v41, %s5401_s8  ;;  %1362 = vrot.lane.b32.xlu1 %v1354_v45, %s5401_s8  ;;  %v1470_v45 = vmul.f32 %v1465_v14, %v4694_v6  ;;  %v1469_v32 = vmul.f32 %v1462_v10, %v4694_v6  ;;  %5509 = sst [smem:[#allocation53_spill]] %s4876_s10  ;;  %s4890_s18 = spop %3262 }
 0x48b   :  { %v1184_v39 = vpop.permute.xlu1 %1183  ;;  %5511 = sst [smem:[#allocation54_spill]] %s4890_s18  ;;  %s4910_s1 = spop %3264 }
 0x48c   :  { %1194 = vst.msk [vmem:[#allocation3 + $0x21] sm:$0xff] %vm1191_vm7, %v1184_v39  ;;  %s5513_s15 = sld [smem:[#allocation30_spill]]  ;;  %s4916_s25 = spop %3266 }
 0x48d   :  { %5514 = sst [smem:[#allocation55_spill]] %s4910_s1  ;;  %s4920_s27 = spop %3268 }
 0x48e   :  { %1368 = vrot.lane.b32.xlu0 %v1357_v57, %s5401_s8  ;;  %1366 = vrot.lane.b32.xlu1 %v1356_v49, %s5401_s8  ;;  %v1500_v9 = vstv %s5508_s16  ;;  %s4926_s17 = spop %3270 }
 0x48f   :  { %v1511_v22 = vmul.f32 %v1500_v9, %v4694_v6  ;;  %v1506_v36 = vstv %s5512_s14  ;;  %s4930_s3 = spop %3272 }
 0x490   :  { %s4936_s16 = spop %3274 }
 0x491   :  { %5519 = sst [smem:[#allocation56_spill]] %s4936_s16  ;;  %s4940_s14 = spop %3276 }
 0x492   :  { %1408 = vrot.lane.b32.xlu0 %v1399_v59, %s5400_s28  ;;  %1406 = vrot.lane.b32.xlu1 %v1398_v8, %s5400_s28  ;;  %v1509_v10 = vstv %s5513_s15  ;;  %5521 = sst [smem:[#allocation19_spill]] %s4940_s14  ;;  %s4942_s1 = spop %3278 }
 0x493   :  { %v4848_v12 = vld [vmem:[#allocation3 + $0x20] sm:$0xff]  ;;  %v1514_v14 = vmul.f32 %v1509_v10, %v4694_v6  ;;  %s5522_s15 = sld [smem:[#allocation39_spill]]  ;;  %v2219_v10 = vstv %s4779_s29 }
 0x494   :  { %v4854_v17 = vld [vmem:[#allocation3 + $0x21] sm:$0xff]  ;;  %v4871_v38 = vmul.f32 %v1883_v53, %v4848_v12  ;;  %v4874_v2 = vmul.f32 %v1879_v52, %v4848_v12  ;;  %v4879_v3 = vmul.f32 %v1891_v40, %v4848_v12  ;;  %v4882_v7 = vmul.f32 %v1887_v0, %v4848_v12  ;;  %5523 = sst [smem:[#allocation20_spill]] %s4942_s1 }
 0x495   :  { %v4861_v41 = vld [vmem:[#allocation3 + $0x22] sm:$0xff]  ;;  %v4885_v39 = vmul.f32 %v1998_v63, %v4854_v17  ;;  %v4888_v57 = vmul.f32 %v1995_v27, %v4854_v17  ;;  %v4893_v49 = vmul.f32 %v2004_v56, %v4854_v17  ;;  %v4896_v11 = vmul.f32 %v2001_v28, %v4854_v17  ;;  %s5526_s16 = sld [smem:[#allocation41_spill]] }
 0x496   :  { %1412 = vrot.lane.b32.xlu0 %v1401_v24, %s5400_s28  ;;  %1410 = vrot.lane.b32.xlu1 %v1400_v19, %s5400_s28  ;;  %v4899_v26 = vmul.f32 %v2111_v58, %v4861_v41  ;;  %v4902_v59 = vmul.f32 %v2108_v51, %v4861_v41  ;;  %v4905_v8 = vmul.f32 %v2117_v29, %v4861_v41  ;;  %v1503_v24 = vstv %s5510_s13  ;;  %s5520_s13 = sld [smem:[#allocation38_spill]] }
 0x497   :  { %v4908_v46 = vmul.f32 %v2114_v61, %v4861_v41  ;;  %v1512_v19 = vmul.f32 %v1503_v24, %v4694_v6  ;;  %v1513_v52 = vmul.f32 %v1506_v36, %v4694_v6  ;;  %v1570_v53 = vstv %s5515_s23  ;;  %s4948_s23 = spop %3280  ;;  %s5528_s14 = sld [smem:[#allocation45_spill]] }
 0x498   :  { %v1573_v0 = vstv %s5516_s19  ;;  %v1581_v27 = vmul.f32 %v1570_v53, %v4751_v25  ;;  %v1576_v6 = vstv %s5517_s9  ;;  %v1579_v63 = vstv %s5518_s20  ;;  %5524 = sst [smem:[#allocation21_spill]] %s4948_s23  ;;  %s4952_s18 = spop %3282 }
 0x499   :  { %v1582_v40 = vmul.f32 %v1573_v0, %v4751_v25  ;;  %s5525_s19 = sld [smem:[#allocation40_spill]]  ;;  %v1584_v56 = vmul.f32 %v1579_v63, %v4751_v25  ;;  %s4955_s1 = spop %3284  ;;  %v1617_v51 = vstv %s5522_s15  ;;  %v2231_v53 = vstv %s4822_s21 }
 0x49a   :  { %1477 = vrot.lane.b32.xlu0 %v1468_v47, %s5401_s8  ;;  %1475 = vrot.lane.b32.xlu1 %v1467_v44, %s5401_s8  ;;  %v1583_v47 = vmul.f32 %v1576_v6, %v4751_v25  ;;  %5527 = sst [smem:[#allocation22_spill]] %s4952_s18  ;;  %s4961_s10 = spop %3286  ;;  %v1626_v58 = vmul.f32 %v1617_v51, %v4751_v25  ;;  %v2338_v0 = vstv %s4920_s27  ;;  %v2341_v63 = vstv %s4926_s17 }
 0x49b   :  { %s5529_s9 = sld [smem:[#allocation46_spill]]  ;;  %s4965_s18 = spop %3288  ;;  %v1623_v29 = vstv %s5526_s16 }
 0x49c   :  { %v1614_v44 = vstv %s5520_s13  ;;  %s5530_s20 = sld [smem:[#allocation47_spill]]  ;;  %s4971_s13 = spop %3290 }
 0x49d   :  { %s5531_s23 = sld [smem:[#allocation48_spill]]  ;;  %v1625_v61 = vmul.f32 %v1614_v44, %v4751_v25  ;;  %v1683_v24 = vstv %s5528_s14  ;;  %s4977_s15 = spop %3292 }
 0x49e   :  { %1481 = vrot.lane.b32.xlu0 %v1470_v45, %s5401_s8  ;;  %1479 = vrot.lane.b32.xlu1 %v1469_v32, %s5401_s8  ;;  %v1628_v32 = vmul.f32 %v1623_v29, %v4751_v25  ;;  %s4987_s16 = spop %3294  ;;  %v1694_v6 = vmul.f32 %v1683_v24, %v4761_v31  ;;  %s5532_s29 = sld [smem:[#allocation49_spill]] }
 0x49f   :  { %v1620_v45 = vstv %s5525_s19  ;;  %s3297_s14 = spop %3296  ;;  %v2454_v51 = vstv %s4987_s16  ;;  %s5540_s21 = sld [smem:[#allocation52_spill]] }
 0x4a0   :  { %v1627_v9 = vmul.f32 %v1620_v45, %v4751_v25  ;;  %v2335_v25 = vstv %s4916_s25  ;;  %s5545_s25 = sld [smem:[#allocation57_spill]] }
 0x4a1   :  { %s5546_s27 = sld [smem:[#allocation58_spill]] }
 0x4a2   :  { %1521 = vrot.lane.b32.xlu0 %v1512_v19, %s5400_s28  ;;  %1519 = vrot.lane.b32.xlu1 %v1511_v22, %s5400_s28  ;;  %v1686_v19 = vstv %s5529_s9  ;;  %v1689_v22 = vstv %s5530_s20  ;;  %s5549_s17 = sld [smem:[#allocation59_spill]] }
 0x4a3   :  { %v1692_v36 = vstv %s5531_s23  ;;  %v1696_v29 = vmul.f32 %v1689_v22, %v4761_v31  ;;  %s5551_s23 = sld [smem:[#allocation61_spill]] }
 0x4a4   :  { %v1697_v45 = vmul.f32 %v1692_v36, %v4761_v31  ;;  %s5552_s19 = sld [smem:[#allocation62_spill]] }
 0x4a5   :  { %s5553_s9 = sld [smem:[#allocation63_spill]] }
 0x4a6   :  { %1525 = vrot.lane.b32.xlu0 %v1514_v14, %s5400_s28  ;;  %1523 = vrot.lane.b32.xlu1 %v1513_v52, %s5400_s28  ;;  %v2223_v14 = vstv %s4806_s0  ;;  %v2227_v52 = vstv %s4818_s5  ;;  %s5533_s0 = sld [smem:[#allocation50_spill]] }
 0x4a7   :  { %s5538_s5 = sld [smem:[#allocation51_spill]] }
 0x4a8   :  { %s5554_s20 = sld [smem:[#allocation64_spill]] }
 0x4a9   :  { %s5557_s16 = sld [smem:[#allocation70_spill]] }
 0x4aa   :  { %1591 = vrot.lane.b32.xlu0 %v1582_v40, %s5401_s8  ;;  %1589 = vrot.lane.b32.xlu1 %v1581_v27, %s5401_s8  ;;  %v1695_v27 = vmul.f32 %v1686_v19, %v4761_v31 }
 0x4ac   :  { %v1186_v28 = vpop.permute.xlu0 %1185 }
 0x4ad   :  { %1195 = vst.msk [vmem:[#allocation3 + $0x31] sm:$0xff] %vm1191_vm7, %v1186_v28  ;;  %v2344_v28 = vstv %s4930_s3  ;;  %s5550_s3 = sld [smem:[#allocation60_spill]] }
 0x4ae   :  { %1595 = vrot.lane.b32.xlu0 %v1584_v56, %s5401_s8  ;;  %1593 = vrot.lane.b32.xlu1 %v1583_v47, %s5401_s8  ;;  %v2448_v56 = vstv %s4971_s13  ;;  %v2451_v47 = vstv %s4977_s15  ;;  %s5555_s13 = sld [smem:[#allocation68_spill]] }
 0x4af   :  { %s5556_s15 = sld [smem:[#allocation69_spill]] }
 0x4b2   :  { %1635 = vrot.lane.b32.xlu0 %v1626_v58, %s5400_s28  ;;  %1633 = vrot.lane.b32.xlu1 %v1625_v61, %s5400_s28  ;;  %v2457_v58 = vstv %s3297_s14  ;;  %s5558_s14 = sld [smem:[#allocation71_spill]] }
 0x4b4   :  { %v4991_v40 = vld [vmem:[#allocation3 + $0x30] sm:$0xff] }
 0x4b5   :  { %v4999_v44 = vld [vmem:[#allocation3 + $0x31] sm:$0xff]  ;;  %v5015_v24 = vmul.f32 %v2231_v53, %v4991_v40  ;;  %v5018_v19 = vmul.f32 %v2227_v52, %v4991_v40 }
 0x4b6   :  { %1639 = vrot.lane.b32.xlu0 %v1628_v32, %s5400_s28  ;;  %1637 = vrot.lane.b32.xlu1 %v1627_v9, %s5400_s28  ;;  %v5002_v61 = vld [vmem:[#allocation3 + $0x32] sm:$0xff]  ;;  %v5009_v32 = vmul.f32 %v2223_v14, %v4991_v40  ;;  %v5012_v9 = vmul.f32 %v2219_v10, %v4991_v40  ;;  %v5024_v36 = vmul.f32 %v2335_v25, %v4999_v44 }
 0x4b7   :  { %5535 = vst [vmem:[#allocation84_spill] sm:$0xff] %v5015_v24  ;;  %5536 = vst [vmem:[#allocation85_spill] sm:$0xff] %v5018_v19  ;;  %v5027_v22 = vmul.f32 %v2344_v28, %v4999_v44  ;;  %v5030_v10 = vmul.f32 %v2341_v63, %v4999_v44  ;;  %v5033_v14 = vmul.f32 %v2451_v47, %v5002_v61  ;;  %v1736_v47 = vstv %s5540_s21  ;;  %s5562_s21 = sld [smem:[#allocation75_spill]] }
 0x4b8   :  { %5534 = vst [vmem:[#allocation83_spill] sm:$0xff] %v5012_v9  ;;  %5539 = vst [vmem:[#allocation87_spill] sm:$0xff] %v5024_v36  ;;  %v5036_v52 = vmul.f32 %v2448_v56, %v5002_v61  ;;  %v5041_v53 = vmul.f32 %v2457_v58, %v5002_v61  ;;  %v5044_v25 = vmul.f32 %v2454_v51, %v5002_v61  ;;  %v1733_v56 = vstv %s5538_s5  ;;  %s5561_s5 = sld [smem:[#allocation74_spill]] }
 0x4b9   :  { %5541 = vst [vmem:[#allocation88_spill] sm:$0xff] %v5027_v22  ;;  %5542 = vst [vmem:[#allocation89_spill] sm:$0xff] %v5030_v10  ;;  %v1741_v58 = vmul.f32 %v1736_v47, %v4761_v31  ;;  %v1740_v51 = vmul.f32 %v1733_v56, %v4761_v31  ;;  %v1840_v47 = vstv %s5551_s23  ;;  %s5567_s23 = sld [smem:[#allocation9_spill]] }
 0x4ba   :  { %1704 = vrot.lane.b32.xlu0 %v1695_v27, %s5401_s8  ;;  %1702 = vrot.lane.b32.xlu1 %v1694_v6, %s5401_s8  ;;  %v5021_v27 = vmul.f32 %v2338_v0, %v4999_v44  ;;  %5543 = vst [vmem:[#allocation90_spill] sm:$0xff] %v5033_v14  ;;  %5544 = vst [vmem:[#allocation91_spill] sm:$0xff] %v5036_v52  ;;  %v1727_v0 = vstv %s5532_s29  ;;  %v1730_v6 = vstv %s5533_s0  ;;  %s5559_s29 = sld [smem:[#allocation72_spill]] }
 0x4bb   :  { %5547 = vst [vmem:[#allocation92_spill] sm:$0xff] %v5041_v53  ;;  %5548 = vst [vmem:[#allocation93_spill] sm:$0xff] %v5044_v25  ;;  %v1739_v63 = vmul.f32 %v1730_v6, %v4761_v31  ;;  %v1738_v28 = vmul.f32 %v1727_v0, %v4761_v31  ;;  %s5560_s0 = sld [smem:[#allocation73_spill]]  ;;  %v2073_v53 = vstv %s4670_s22 }
 0x4bc   :  { %5537 = vst [vmem:[#allocation86_spill] sm:$0xff] %v5021_v27  ;;  %v2080_v36 = vmul.f32 %v2073_v53, %v4854_v17  ;;  %s5576_s22 = sld [smem:[#allocation31_spill]] }
 0x4be   :  { %1708 = vrot.lane.b32.xlu0 %v1697_v45, %s5401_s8  ;;  %1706 = vrot.lane.b32.xlu1 %v1696_v29, %s5401_s8  ;;  %v1796_v45 = vstv %s5545_s25  ;;  %v1799_v29 = vstv %s5546_s27  ;;  %s5563_s25 = sld [smem:[#allocation78_spill]] }
 0x4bf   :  { %v1808_v0 = vmul.f32 %v1799_v29, %v4767_v18  ;;  %v1807_v6 = vmul.f32 %v1796_v45, %v4767_v18  ;;  %v1851_v45 = vmul.f32 %v1840_v47, %v4767_v18  ;;  %v1846_v29 = vstv %s5553_s9  ;;  %s5564_s27 = sld [smem:[#allocation7_spill]] }
 0x4c0   :  { %s5569_s9 = sld [smem:[#allocation11_spill]] }
 0x4c2   :  { %1748 = vrot.lane.b32.xlu0 %v1739_v63, %s5400_s28  ;;  %1746 = vrot.lane.b32.xlu1 %v1738_v28, %s5400_s28  ;;  %v1802_v63 = vstv %s5549_s17  ;;  %v1805_v28 = vstv %s5550_s3  ;;  %s5565_s17 = sld [smem:[#allocation8_spill]] }
 0x4c3   :  { %v1810_v31 = vmul.f32 %v1805_v28, %v4767_v18  ;;  %v1809_v56 = vmul.f32 %v1802_v63, %v4767_v18  ;;  %v1853_v63 = vmul.f32 %v1846_v29, %v4767_v18  ;;  %v1910_v28 = vstv %s5555_s13  ;;  %s5566_s3 = sld [smem:[#allocation79_spill]] }
 0x4c4   :  { %v1921_v47 = vmul.f32 %v1910_v28, %v4848_v12  ;;  %v1954_v29 = vstv %s5559_s29  ;;  %v1960_v28 = vstv %s5561_s5  ;;  %s5575_s13 = sld [smem:[#allocation82_spill]] }
 0x4c5   :  { %s5580_s29 = sld [smem:[#allocation43_spill]] }
 0x4c6   :  { %1752 = vrot.lane.b32.xlu0 %v1741_v58, %s5400_s28  ;;  %1750 = vrot.lane.b32.xlu1 %v1740_v51, %s5400_s28  ;;  %v1843_v58 = vstv %s5552_s19  ;;  %s5568_s19 = sld [smem:[#allocation10_spill]]  ;;  %v1315_v35 = vstv %s5569_s9 }
 0x4c7   :  { %v1852_v51 = vmul.f32 %v1843_v58, %v4767_v18  ;;  %v1916_v58 = vstv %s5557_s16  ;;  %s5578_s16 = sld [smem:[#allocation33_spill]] }
 0x4c8   :  { %s5584_s5 = sld [smem:[#allocation55_spill]] }
 0x4ca   :  { %1817 = vrot.lane.b32.xlu0 %v1808_v0, %s5401_s8  ;;  %1815 = vrot.lane.b32.xlu1 %v1807_v6, %s5401_s8  ;;  %v1849_v0 = vstv %s5554_s20  ;;  %s5572_s20 = sld [smem:[#allocation14_spill]]  ;;  %v2139_v9 = vstv %s5575_s13 }
 0x4cb   :  { %v1854_v6 = vmul.f32 %v1849_v0, %v4767_v18  ;;  %v1957_v0 = vstv %s5560_s0  ;;  %s5581_s0 = sld [smem:[#allocation44_spill]] }
 0x4ce   :  { %1821 = vrot.lane.b32.xlu0 %v1810_v31, %s5401_s8  ;;  %1819 = vrot.lane.b32.xlu1 %v1809_v56, %s5401_s8  ;;  %v1913_v31 = vstv %s5556_s15  ;;  %s5577_s15 = sld [smem:[#allocation32_spill]] }
 0x4cf   :  { %v1922_v56 = vmul.f32 %v1913_v31, %v4848_v12  ;;  %v1963_v31 = vstv %s5562_s21  ;;  %s5588_s21 = sld [smem:[#allocation21_spill]] }
 0x4d2   :  { %1861 = vrot.lane.b32.xlu0 %v1852_v51, %s5400_s28  ;;  %1859 = vrot.lane.b32.xlu1 %v1851_v45, %s5400_s28  ;;  %v1919_v51 = vstv %s5558_s14  ;;  %v1923_v45 = vmul.f32 %v1916_v58, %v4848_v12  ;;  %v2023_v58 = vstv %s4657_s2  ;;  %s5570_s2 = sld [smem:[#allocation12_spill]] }
 0x4d3   :  { %v1924_v18 = vmul.f32 %v1919_v51, %v4848_v12  ;;  %v2026_v51 = vstv %s4659_s12  ;;  %s5571_s12 = sld [smem:[#allocation13_spill]] }
 0x4d4   :  { %s5579_s14 = sld [smem:[#allocation42_spill]] }
 0x4d6   :  { %1865 = vrot.lane.b32.xlu0 %v1854_v6, %s5400_s28  ;;  %1863 = vrot.lane.b32.xlu1 %v1853_v63, %s5400_s28  ;;  %v1966_v6 = vmul.f32 %v1957_v0, %v4848_v12  ;;  %v1965_v63 = vmul.f32 %v1954_v29, %v4848_v12  ;;  %v2032_v29 = vstv %s4663_s24  ;;  %s5573_s24 = sld [smem:[#allocation80_spill]] }
 0x4d8   :  { %v1318_v33 = vstv %s5570_s2 }
 0x4d9   :  { %v1321_v25 = vstv %s5571_s12  ;;  %v1327_v19 = vmul.f32 %v1318_v33, %v4735_v16  ;;  %s5605_s12 = sld [smem:[#allocation94_spill]] }
 0x4da   :  { %1931 = vrot.lane.b32.xlu0 %v1922_v56, %s5401_s8  ;;  %1929 = vrot.lane.b32.xlu1 %v1921_v47, %s5401_s8  ;;  %v1968_v56 = vmul.f32 %v1963_v31, %v4848_v12  ;;  %v1967_v47 = vmul.f32 %v1960_v28, %v4848_v12  ;;  %v2029_v12 = vstv %s5563_s25  ;;  %v1199_v31 = vstv %s5564_s27  ;;  %s5589_s25 = sld [smem:[#allocation22_spill]]  ;;  %s3299_s27 = spop %3298 }
 0x4db   :  { %v2036_v28 = vmul.f32 %v2029_v12, %v4854_v17 }
 0x4dc   :  { %v2076_v52 = vstv %s5573_s24 }
 0x4de   :  { %1935 = vrot.lane.b32.xlu0 %v1924_v18, %s5401_s8  ;;  %1933 = vrot.lane.b32.xlu1 %v1923_v45, %s5401_s8  ;;  %v2035_v18 = vmul.f32 %v2026_v51, %v4854_v17  ;;  %v2034_v45 = vmul.f32 %v2023_v58, %v4854_v17  ;;  %v2070_v58 = vstv %s4668_s30  ;;  %v1207_v51 = vstv %s5567_s23  ;;  %s5574_s30 = sld [smem:[#allocation81_spill]] }
 0x4df   :  { %v1215_v10 = vmul.f32 %v1207_v51, %v4676_v50  ;;  %v1328_v51 = vmul.f32 %v1321_v25, %v4735_v16  ;;  %v2183_v25 = vstv %s5579_s14 }
 0x4e2   :  { %1975 = vrot.lane.b32.xlu0 %v1966_v6, %s5400_s28  ;;  %1973 = vrot.lane.b32.xlu1 %v1965_v63, %s5400_s28  ;;  %v2037_v63 = vmul.f32 %v2032_v29, %v4854_v17  ;;  %v2079_v29 = vmul.f32 %v2070_v58, %v4854_v17 }
 0x4e4   :  { %v2136_v24 = vstv %s5574_s30 }
 0x4e5   :  { %v2147_v33 = vmul.f32 %v2136_v24, %v4861_v41 }
 0x4e6   :  { %1979 = vrot.lane.b32.xlu0 %v1968_v56, %s5400_s28  ;;  %1977 = vrot.lane.b32.xlu1 %v1967_v47, %s5400_s28  ;;  %v1203_v56 = vstv %s5565_s17  ;;  %v2067_v47 = vstv %s5566_s3 }
 0x4e7   :  { %v2078_v12 = vmul.f32 %v2067_v47, %v4854_v17  ;;  %v1214_v15 = vmul.f32 %v1203_v56, %v4676_v50 }
 0x4ea   :  { %2044 = vrot.lane.b32.xlu0 %v2035_v18, %s5401_s8  ;;  %2042 = vrot.lane.b32.xlu1 %v2034_v45, %s5401_s8  ;;  %v1211_v18 = vstv %s5568_s19 }
 0x4eb   :  { %v1216_v47 = vmul.f32 %v1211_v18, %v4676_v50 }
 0x4ec   :  { %v1252_v0 = vpop.permute.xlu0 %1251  ;;  %v1250_v6 = vpop.permute.xlu1 %1249 }
 0x4ed   :  { %v1262_v14 = vadd.f32 %v1252_v0, %v1214_v15 }
 0x4ee   :  { %2048 = vrot.lane.b32.xlu0 %v2037_v63, %s5401_s8  ;;  %2046 = vrot.lane.b32.xlu1 %v2036_v28, %s5401_s8  ;;  %v1213_v63 = vmul.f32 %v1199_v31, %v4676_v50  ;;  %v1324_v28 = vstv %s5572_s20  ;;  %v2081_v31 = vmul.f32 %v2076_v52, %v4854_v17 }
 0x4ef   :  { %v1329_v53 = vmul.f32 %v1324_v28, %v4735_v16  ;;  %v2192_v28 = vmul.f32 %v2183_v25, %v4861_v41 }
 0x4f0   :  { %v1256_v45 = vpop.permute.xlu0 %1255  ;;  %v1254_v4 = vpop.permute.xlu1 %1253  ;;  %v1261_v58 = vadd.f32 %v1250_v6, %v1213_v63 }
 0x4f1   :  { %v1264_v15 = vadd.f32 %v1256_v45, %v1216_v47  ;;  %v1263_v50 = vadd.f32 %v1254_v4, %v1215_v10  ;;  %v2142_v4 = vstv %s5576_s22  ;;  %v2186_v47 = vstv %s5580_s29 }
 0x4f2   :  { %2088 = vrot.lane.b32.xlu0 %v2079_v29, %s5400_s28  ;;  %2086 = vrot.lane.b32.xlu1 %v2078_v12, %s5400_s28  ;;  %v1326_v12 = vmul.f32 %v1315_v35, %v4735_v16  ;;  %v2149_v18 = vmul.f32 %v2142_v4, %v4861_v41  ;;  %v2180_v16 = vstv %s5578_s16  ;;  %s5606_s16 = sld [smem:[#allocation95_spill]] }
 0x4f4   :  { %v1296_v22 = vpop.permute.xlu0 %1295  ;;  %v1294_v56 = vpop.permute.xlu1 %1293 }
 0x4f5   :  { %v1306_v27 = vadd.f32 %v1296_v22, %v1262_v14  ;;  %v1305_v29 = vadd.f32 %v1294_v56, %v1261_v58  ;;  %v2148_v22 = vmul.f32 %v2139_v9, %v4861_v41  ;;  %v2191_v58 = vmul.f32 %v2180_v16, %v4861_v41 }
 0x4f6   :  { %2092 = vrot.lane.b32.xlu0 %v2081_v31, %s5400_s28  ;;  %2090 = vrot.lane.b32.xlu1 %v2080_v36, %s5400_s28  ;;  %v2189_v56 = vstv %s5581_s0 }
 0x4f7   :  { %v1331_v0 = vadd.f32 %v1327_v19, %v1306_v27  ;;  %v1330_v52 = vadd.f32 %v1326_v12, %v1305_v29  ;;  %v2145_v19 = vstv %s5577_s15 }
 0x4f8   :  { %v1300_v6 = vpop.permute.xlu0 %1299  ;;  %v1298_v17 = vpop.permute.xlu1 %1297  ;;  %v2150_v10 = vmul.f32 %v2145_v19, %v4861_v41 }
 0x4f9   :  { %v1308_v14 = vadd.f32 %v1300_v6, %v1264_v15  ;;  %v1307_v35 = vadd.f32 %v1298_v17, %v1263_v50  ;;  %v2194_v50 = vmul.f32 %v2189_v56, %v4861_v41  ;;  %v2193_v6 = vmul.f32 %v2186_v47, %v4861_v41 }
 0x4fa   :  { %2157 = vrot.lane.b32.xlu0 %v2148_v22, %s5401_s8  ;;  %2155 = vrot.lane.b32.xlu1 %v2147_v33, %s5401_s8  ;;  %v2250_v33 = vstv %s4828_s6  ;;  %s5582_s6 = sld [smem:[#allocation53_spill]]  ;;  %v2303_v56 = vstv %s5584_s5 }
 0x4fb   :  { %v1333_v27 = vadd.f32 %v1329_v53, %v1308_v14  ;;  %v1332_v36 = vadd.f32 %v1328_v51, %v1307_v35  ;;  %v2253_v14 = vstv %s4836_s26  ;;  %v2261_v19 = vmul.f32 %v2250_v33, %v4991_v40  ;;  %s5583_s26 = sld [smem:[#allocation54_spill]] }
 0x4fc   :  { %v1365_v9 = vpop.permute.xlu0 %1364  ;;  %v1363_v24 = vpop.permute.xlu1 %1362  ;;  %v2262_v41 = vmul.f32 %v2253_v14, %v4991_v40 }
 0x4fd   :  { %v1375_v31 = vadd.f32 %v1365_v9, %v1331_v0  ;;  %v1374_v29 = vadd.f32 %v1363_v24, %v1330_v52 }
 0x4fe   :  { %2161 = vrot.lane.b32.xlu0 %v2150_v10, %s5401_s8  ;;  %2159 = vrot.lane.b32.xlu1 %v2149_v18, %s5401_s8 }
 0x500   :  { %v1369_v45 = vpop.permute.xlu0 %1368  ;;  %v1367_v63 = vpop.permute.xlu1 %1366 }
 0x501   :  { %v1377_v35 = vadd.f32 %v1369_v45, %v1333_v27  ;;  %v1376_v53 = vadd.f32 %v1367_v63, %v1332_v36  ;;  %v2256_v27 = vstv %s4846_s4  ;;  %v2259_v36 = vstv %s4852_s7  ;;  %s5585_s4 = sld [smem:[#allocation56_spill]] }
 0x502   :  { %2201 = vrot.lane.b32.xlu0 %v2192_v28, %s5400_s28  ;;  %2199 = vrot.lane.b32.xlu1 %v2191_v58, %s5400_s28  ;;  %v2264_v16 = vmul.f32 %v2259_v36, %v4991_v40  ;;  %v2263_v25 = vmul.f32 %v2256_v27, %v4991_v40  ;;  %v2294_v45 = vstv %s4865_s11  ;;  %v2297_v63 = vstv %s5582_s6  ;;  %s5586_s7 = sld [smem:[#allocation19_spill]] }
 0x503   :  { %v2300_v47 = vstv %s5583_s26  ;;  %s5587_s11 = sld [smem:[#allocation20_spill]]  ;;  %v2372_v27 = vstv %s5588_s21 }
 0x504   :  { %v1409_v12 = vpop.permute.xlu0 %1408  ;;  %v1407_v15 = vpop.permute.xlu1 %1406 }
 0x505   :  { %v1419_v17 = vadd.f32 %v1409_v12, %v1375_v31  ;;  %v1418_v22 = vadd.f32 %v1407_v15, %v1374_v29 }
 0x506   :  { %2205 = vrot.lane.b32.xlu0 %v2194_v50, %s5400_s28  ;;  %2203 = vrot.lane.b32.xlu1 %v2193_v6, %s5400_s28  ;;  %v2308_v50 = vmul.f32 %v2303_v56, %v4991_v40  ;;  %v2307_v6 = vmul.f32 %v2300_v47, %v4991_v40 }
 0x507   :  { %v1444_v0 = vadd.f32 %v4710_v37, %v1419_v17  ;;  %v1443_v52 = vadd.f32 %v4713_v30, %v1418_v22  ;;  %v2363_v33 = vstv %s5585_s4 }
 0x508   :  { %v1413_v51 = vpop.permute.xlu0 %1412  ;;  %v1411_v4 = vpop.permute.xlu1 %1410  ;;  %v2366_v14 = vstv %s5586_s7 }
 0x509   :  { %v1421_v9 = vadd.f32 %v1413_v51, %v1377_v35  ;;  %v1420_v24 = vadd.f32 %v1411_v4, %v1376_v53 }
 0x50a   :  { %2271 = vrot.lane.b32.xlu0 %v2262_v41, %s5401_s8  ;;  %2269 = vrot.lane.b32.xlu1 %v2261_v19, %s5401_s8  ;;  %v2374_v41 = vmul.f32 %v2363_v33, %v4999_v44 }
 0x50b   :  { %v1446_v37 = vadd.f32 %v4718_v54, %v1421_v9  ;;  %v1445_v30 = vadd.f32 %v4721_v60, %v1420_v24  ;;  %v2306_v54 = vmul.f32 %v2297_v63, %v4991_v40  ;;  %v2305_v60 = vmul.f32 %v2294_v45, %v4991_v40 }
 0x50c   :  { %v1478_v10 = vpop.permute.xlu0 %1477  ;;  %v1476_v18 = vpop.permute.xlu1 %1475  ;;  %v2375_v40 = vmul.f32 %v2366_v14, %v4999_v44  ;;  %v2369_v24 = vstv %s5587_s11  ;;  %s5607_s11 = smov 125  }
 0x50d   :  { %v1488_v31 = vadd.f32 %v1478_v10, %v1444_v0  ;;  %v1487_v29 = vadd.f32 %v1476_v18, %v1443_v52  ;;  %v2376_v10 = vmul.f32 %v2369_v24, %v4999_v44  ;;  %v2407_v18 = vstv %s5589_s25 }
 0x50e   :  { %2275 = vrot.lane.b32.xlu0 %v2264_v16, %s5401_s8  ;;  %2273 = vrot.lane.b32.xlu1 %v2263_v25, %s5401_s8  ;;  %v2410_v16 = vstv %s4955_s1  ;;  %v2418_v63 = vmul.f32 %v2407_v18, %v4999_v44  ;;  %s3301_s1 = spop %3300 }
 0x510   :  { %v1482_v28 = vpop.permute.xlu0 %1481  ;;  %v1480_v58 = vpop.permute.xlu1 %1479 }
 0x511   :  { %v1490_v35 = vadd.f32 %v1482_v28, %v1446_v37  ;;  %v1489_v53 = vadd.f32 %v1480_v58, %v1445_v30  ;;  %v2377_v30 = vmul.f32 %v2372_v27, %v4999_v44  ;;  %v2416_v28 = vstv %s4965_s18 }
 0x512   :  { %2315 = vrot.lane.b32.xlu0 %v2306_v54, %s5400_s28  ;;  %2313 = vrot.lane.b32.xlu1 %v2305_v60, %s5400_s28  ;;  %v2421_v56 = vmul.f32 %v2416_v28, %v4999_v44 }
 0x514   :  { %v1522_v12 = vpop.permute.xlu0 %1521  ;;  %v1520_v15 = vpop.permute.xlu1 %1519 }
 0x515   :  { %v1532_v17 = vadd.f32 %v1522_v12, %v1488_v31  ;;  %v1531_v22 = vadd.f32 %v1520_v15, %v1487_v29  ;;  %v2476_v15 = vstv %s3299_s27 }
 0x516   :  { %2319 = vrot.lane.b32.xlu0 %v2308_v50, %s5400_s28  ;;  %2317 = vrot.lane.b32.xlu1 %v2307_v6, %s5400_s28  ;;  %v2479_v50 = vstv %s3301_s1 }
 0x517   :  { %v1558_v0 = vadd.f32 %v4774_v5, %v1532_v17  ;;  %v1557_v52 = vadd.f32 %v4777_v43, %v1531_v22 }
 0x518   :  { %v1526_v51 = vpop.permute.xlu0 %1525  ;;  %v1524_v4 = vpop.permute.xlu1 %1523 }
 0x519   :  { %v1534_v19 = vadd.f32 %v1526_v51, %v1490_v35  ;;  %v1533_v9 = vadd.f32 %v1524_v4, %v1489_v53  ;;  %v2487_v53 = vmul.f32 %v2476_v15, %v5002_v61 }
 0x51a   :  { %2384 = vrot.lane.b32.xlu0 %v2375_v40, %s5401_s8  ;;  %2382 = vrot.lane.b32.xlu1 %v2374_v41, %s5401_s8 }
 0x51b   :  { %v1560_v5 = vadd.f32 %v4783_v62, %v1534_v19  ;;  %v1559_v43 = vadd.f32 %v4786_v21, %v1533_v9  ;;  %v2419_v62 = vmul.f32 %v2410_v16, %v4999_v44  ;;  %v2413_v21 = vstv %s4961_s10  ;;  %s3303_s10 = spop %3302 }
 0x51c   :  { %v1592_v36 = vpop.permute.xlu0 %1591  ;;  %v1590_v37 = vpop.permute.xlu1 %1589  ;;  %v2420_v31 = vmul.f32 %v2413_v21, %v4999_v44  ;;  %v2488_v44 = vmul.f32 %v2479_v50, %v5002_v61  ;;  %s3305_s18 = spop %3304  ;;  %v2482_v51 = vstv %s3303_s10 }
 0x51d   :  { %v1602_v58 = vadd.f32 %v1592_v36, %v1558_v0  ;;  %v1601_v54 = vadd.f32 %v1590_v37, %v1557_v52  ;;  %v2485_v4 = vstv %s3305_s18  ;;  %s3307_s17 = spop %3306  ;;  %v2489_v9 = vmul.f32 %v2482_v51, %v5002_v61 }
 0x51e   :  { %2388 = vrot.lane.b32.xlu0 %v2377_v30, %s5401_s8  ;;  %2386 = vrot.lane.b32.xlu1 %v2376_v10, %s5401_s8  ;;  %v2490_v19 = vmul.f32 %v2485_v4, %v5002_v61  ;;  %s3309_s3 = spop %3308 }
 0x51f   :  { %s3311_s23 = spop %3310 }
 0x520   :  { %v1596_v25 = vpop.permute.xlu0 %1595  ;;  %v1594_v45 = vpop.permute.xlu1 %1593  ;;  %s3313_s19 = spop %3312  ;;  %v2526_v18 = vstv %s3311_s23 }
 0x521   :  { %v1604_v6 = vadd.f32 %v1596_v25, %v1560_v5  ;;  %v1603_v17 = vadd.f32 %v1594_v45, %v1559_v43  ;;  %v2520_v5 = vstv %s3307_s17  ;;  %v2523_v43 = vstv %s3309_s3 }
 0x522   :  { %2428 = vrot.lane.b32.xlu0 %v2419_v62, %s5400_s28  ;;  %2426 = vrot.lane.b32.xlu1 %v2418_v63, %s5400_s28  ;;  %v2532_v36 = vmul.f32 %v2523_v43, %v5002_v61  ;;  %v2531_v37 = vmul.f32 %v2520_v5, %v5002_v61  ;;  %v2529_v16 = vstv %s3313_s19  ;;  %v2533_v63 = vmul.f32 %v2526_v18, %v5002_v61 }
 0x523   :  { %v2534_v62 = vmul.f32 %v2529_v16, %v5002_v61 }
 0x524   :  { %v1636_v60 = vpop.permute.xlu0 %1635  ;;  %v1634_v47 = vpop.permute.xlu1 %1633 }
 0x525   :  { %v1646_v29 = vadd.f32 %v1636_v60, %v1602_v58  ;;  %v1645_v12 = vadd.f32 %v1634_v47, %v1601_v54 }
 0x526   :  { %2432 = vrot.lane.b32.xlu0 %v2421_v56, %s5400_s28  ;;  %2430 = vrot.lane.b32.xlu1 %v2420_v31, %s5400_s28 }
 0x527   :  { %v1671_v22 = vadd.f32 %v4789_v55, %v1646_v29  ;;  %v1670_v33 = vadd.f32 %v4792_v42, %v1645_v12 }
 0x528   :  { %v1640_v14 = vpop.permute.xlu0 %1639  ;;  %v1638_v35 = vpop.permute.xlu1 %1637 }
 0x529   :  { %v1648_v0 = vadd.f32 %v1640_v14, %v1604_v6  ;;  %v1647_v52 = vadd.f32 %v1638_v35, %v1603_v17 }
 0x52a   :  { %2497 = vrot.lane.b32.xlu0 %v2488_v44, %s5401_s8  ;;  %2495 = vrot.lane.b32.xlu1 %v2487_v53, %s5401_s8 }
 0x52b   :  { %v1673_v55 = vadd.f32 %v4795_v13, %v1648_v0  ;;  %v1672_v42 = vadd.f32 %v4798_v20, %v1647_v52 }
 0x52c   :  { %v1705_v40 = vpop.permute.xlu0 %1704  ;;  %v1703_v41 = vpop.permute.xlu1 %1702 }
 0x52d   :  { %v1715_v24 = vadd.f32 %v1705_v40, %v1671_v22  ;;  %v1714_v27 = vadd.f32 %v1703_v41, %v1670_v33 }
 0x52e   :  { %2501 = vrot.lane.b32.xlu0 %v2490_v19, %s5401_s8  ;;  %2499 = vrot.lane.b32.xlu1 %v2489_v9, %s5401_s8 }
 0x530   :  { %v1709_v13 = vpop.permute.xlu0 %1708  ;;  %v1707_v20 = vpop.permute.xlu1 %1706 }
 0x531   :  { %v1717_v30 = vadd.f32 %v1709_v13, %v1673_v55  ;;  %v1716_v10 = vadd.f32 %v1707_v20, %v1672_v42 }
 0x532   :  { %2541 = vrot.lane.b32.xlu0 %v2532_v36, %s5400_s28  ;;  %2539 = vrot.lane.b32.xlu1 %v2531_v37, %s5400_s28 }
 0x534   :  { %v1749_v25 = vpop.permute.xlu0 %1748  ;;  %v1747_v45 = vpop.permute.xlu1 %1746 }
 0x535   :  { %v1759_v21 = vadd.f32 %v1749_v25, %v1715_v24  ;;  %v1758_v28 = vadd.f32 %v1747_v45, %v1714_v27 }
 0x536   :  { %2545 = vrot.lane.b32.xlu0 %v2534_v62, %s5400_s28  ;;  %2543 = vrot.lane.b32.xlu1 %v2533_v63, %s5400_s28 }
 0x537   :  { %v1784_v58 = vadd.f32 %v4801_v34, %v1759_v21  ;;  %v1783_v54 = vadd.f32 %v4804_v23, %v1758_v28 }
 0x538   :  { %v1753_v60 = vpop.permute.xlu0 %1752  ;;  %v1751_v47 = vpop.permute.xlu1 %1750 }
 0x539   :  { %v1761_v56 = vadd.f32 %v1753_v60, %v1717_v30  ;;  %v1760_v31 = vadd.f32 %v1751_v47, %v1716_v10 }
 0x53b   :  { %v1786_v29 = vadd.f32 %v4811_v48, %v1761_v56  ;;  %v1785_v12 = vadd.f32 %v4814_v1, %v1760_v31 }
 0x53c   :  { %v1818_v15 = vpop.permute.xlu0 %1817  ;;  %v1816_v61 = vpop.permute.xlu1 %1815 }
 0x53d   :  { %v1828_v50 = vadd.f32 %v1818_v15, %v1784_v58  ;;  %v1827_v6 = vadd.f32 %v1816_v61, %v1783_v54 }
 0x540   :  { %v1822_v17 = vpop.permute.xlu0 %1821  ;;  %v1820_v22 = vpop.permute.xlu1 %1819 }
 0x541   :  { %v1830_v33 = vadd.f32 %v1822_v17, %v1786_v29  ;;  %v1829_v14 = vadd.f32 %v1820_v22, %v1785_v12 }
 0x544   :  { %v1862_v35 = vpop.permute.xlu0 %1861  ;;  %v1860_v34 = vpop.permute.xlu1 %1859 }
 0x545   :  { %v1872_v44 = vadd.f32 %v1862_v35, %v1828_v50  ;;  %v1871_v23 = vadd.f32 %v1860_v34, %v1827_v6 }
 0x547   :  { %v1898_v53 = vadd.f32 %v4871_v38, %v1872_v44  ;;  %v1897_v0 = vadd.f32 %v4874_v2, %v1871_v23 }
 0x548   :  { %v1866_v52 = vpop.permute.xlu0 %1865  ;;  %v1864_v48 = vpop.permute.xlu1 %1863 }
 0x549   :  { %v1874_v51 = vadd.f32 %v1866_v52, %v1830_v33  ;;  %v1873_v1 = vadd.f32 %v1864_v48, %v1829_v14 }
 0x54b   :  { %v1900_v4 = vadd.f32 %v4879_v3, %v1874_v51  ;;  %v1899_v55 = vadd.f32 %v4882_v7, %v1873_v1  ;;  %v5591_v51 = vld [vmem:[#allocation84_spill] sm:$0xff] }
 0x54c   :  { %v1932_v42 = vpop.permute.xlu0 %1931  ;;  %v1930_v40 = vpop.permute.xlu1 %1929 }
 0x54d   :  { %v1942_v9 = vadd.f32 %v1932_v42, %v1898_v53  ;;  %v1941_v24 = vadd.f32 %v1930_v40, %v1897_v0  ;;  %v5590_v53 = vld [vmem:[#allocation83_spill] sm:$0xff] }
 0x550   :  { %v1936_v41 = vpop.permute.xlu0 %1935  ;;  %v1934_v19 = vpop.permute.xlu1 %1933 }
 0x551   :  { %v1944_v13 = vadd.f32 %v1936_v41, %v1900_v4  ;;  %v1943_v2 = vadd.f32 %v1934_v19, %v1899_v55  ;;  %v5592_v4 = vld [vmem:[#allocation85_spill] sm:$0xff] }
 0x554   :  { %v1976_v27 = vpop.permute.xlu0 %1975  ;;  %v1974_v5 = vpop.permute.xlu1 %1973 }
 0x555   :  { %v1986_v43 = vadd.f32 %v1976_v27, %v1942_v9  ;;  %v1985_v38 = vadd.f32 %v1974_v5, %v1941_v24 }
 0x557   :  { %v2011_v20 = vadd.f32 %v4885_v39, %v1986_v43  ;;  %v2010_v36 = vadd.f32 %v4888_v57, %v1985_v38 }
 0x558   :  { %v1980_v37 = vpop.permute.xlu0 %1979  ;;  %v1978_v3 = vpop.permute.xlu1 %1977 }
 0x559   :  { %v1988_v30 = vadd.f32 %v1980_v37, %v1944_v13  ;;  %v1987_v7 = vadd.f32 %v1978_v3, %v1943_v2  ;;  %v5593_v2 = vld [vmem:[#allocation86_spill] sm:$0xff] }
 0x55b   :  { %v2013_v10 = vadd.f32 %v4893_v49, %v1988_v30  ;;  %v2012_v18 = vadd.f32 %v4896_v11, %v1987_v7 }
 0x55c   :  { %v2045_v16 = vpop.permute.xlu0 %2044  ;;  %v2043_v25 = vpop.permute.xlu1 %2042 }
 0x55d   :  { %v2055_v63 = vadd.f32 %v2045_v16, %v2011_v20  ;;  %v2054_v21 = vadd.f32 %v2043_v25, %v2010_v36  ;;  %v5594_v36 = vld [vmem:[#allocation87_spill] sm:$0xff]  ;;  %v5596_v25 = vld [vmem:[#allocation89_spill] sm:$0xff] }
 0x560   :  { %v2049_v45 = vpop.permute.xlu0 %2048  ;;  %v2047_v62 = vpop.permute.xlu1 %2046 }
 0x561   :  { %v2057_v60 = vadd.f32 %v2049_v45, %v2013_v10  ;;  %v2056_v57 = vadd.f32 %v2047_v62, %v2012_v18  ;;  %v5595_v18 = vld [vmem:[#allocation88_spill] sm:$0xff] }
 0x564   :  { %v2089_v28 = vpop.permute.xlu0 %2088  ;;  %v2087_v58 = vpop.permute.xlu1 %2086 }
 0x565   :  { %v2099_v54 = vadd.f32 %v2089_v28, %v2055_v63  ;;  %v2098_v39 = vadd.f32 %v2087_v58, %v2054_v21 }
 0x567   :  { %v2124_v47 = vadd.f32 %v4899_v26, %v2099_v54  ;;  %v2123_v56 = vadd.f32 %v4902_v59, %v2098_v39 }
 0x568   :  { %v2093_v31 = vpop.permute.xlu0 %2092  ;;  %v2091_v49 = vpop.permute.xlu1 %2090 }
 0x569   :  { %v2101_v29 = vadd.f32 %v2093_v31, %v2057_v60  ;;  %v2100_v11 = vadd.f32 %v2091_v49, %v2056_v57  ;;  %v5597_v49 = vld [vmem:[#allocation90_spill] sm:$0xff] }
 0x56b   :  { %v2126_v12 = vadd.f32 %v4905_v8, %v2101_v29  ;;  %v2125_v15 = vadd.f32 %v4908_v46, %v2100_v11  ;;  %v5598_v11 = vld [vmem:[#allocation91_spill] sm:$0xff] }
 0x56c   :  { %v2158_v61 = vpop.permute.xlu0 %2157  ;;  %v2156_v50 = vpop.permute.xlu1 %2155 }
 0x56d   :  { %v2168_v22 = vadd.f32 %v2158_v61, %v2124_v47  ;;  %v2167_v33 = vadd.f32 %v2156_v50, %v2123_v56 }
 0x570   :  { %v2162_v6 = vpop.permute.xlu0 %2161  ;;  %v2160_v17 = vpop.permute.xlu1 %2159 }
 0x571   :  { %v2170_v44 = vadd.f32 %v2162_v6, %v2126_v12  ;;  %v2169_v59 = vadd.f32 %v2160_v17, %v2125_v15  ;;  %v5599_v17 = vld [vmem:[#allocation92_spill] sm:$0xff] }
 0x574   :  { %v2202_v14 = vpop.permute.xlu0 %2201  ;;  %v2200_v35 = vpop.permute.xlu1 %2199 }
 0x575   :  { %v2212_v34 = vadd.f32 %v2202_v14, %v2168_v22  ;;  %v2211_v26 = vadd.f32 %v2200_v35, %v2167_v33  ;;  %v5600_v33 = vld [vmem:[#allocation93_spill] sm:$0xff] }
 0x577   :  { %v2238_v23 = vadd.f32 %v5009_v32, %v2212_v34  ;;  %v2237_v0 = vadd.f32 %v5590_v53, %v2211_v26 }
 0x578   :  { %v2206_v52 = vpop.permute.xlu0 %2205  ;;  %v2204_v8 = vpop.permute.xlu1 %2203 }
 0x579   :  { %v2214_v48 = vadd.f32 %v2206_v52, %v2170_v44  ;;  %v2213_v46 = vadd.f32 %v2204_v8, %v2169_v59 }
 0x57b   :  { %v2240_v1 = vadd.f32 %v5591_v51, %v2214_v48  ;;  %v2239_v55 = vadd.f32 %v5592_v4, %v2213_v46  ;;  %v5601_v51 = vld [vmem:[#allocation16_spill] sm:$0xff]  ;;  %v5602_v4 = vld [vmem:[#allocation15_spill] sm:$0xff] }
 0x57c   :  { %v2272_v42 = vpop.permute.xlu0 %2271  ;;  %v2270_v40 = vpop.permute.xlu1 %2269 }
 0x57d   :  { %v2282_v9 = vadd.f32 %v2272_v42, %v2238_v23  ;;  %v2281_v24 = vadd.f32 %v2270_v40, %v2237_v0 }
 0x580   :  { %v2276_v41 = vpop.permute.xlu0 %2275  ;;  %v2274_v19 = vpop.permute.xlu1 %2273 }
 0x581   :  { %v2284_v38 = vadd.f32 %v2276_v41, %v2240_v1  ;;  %v2283_v13 = vadd.f32 %v2274_v19, %v2239_v55 }
 0x584   :  { %v2316_v27 = vpop.permute.xlu0 %2315  ;;  %v2314_v5 = vpop.permute.xlu1 %2313 }
 0x585   :  { %v2326_v43 = vadd.f32 %v2316_v27, %v2282_v9  ;;  %v2325_v32 = vadd.f32 %v2314_v5, %v2281_v24  ;;  %v5603_v27 = vld [vmem:[#allocation17_spill] sm:$0xff] }
 0x587   :  { %v2351_v20 = vadd.f32 %v5593_v2, %v2326_v43  ;;  %v2350_v37 = vadd.f32 %v5594_v36, %v2325_v32  ;;  %v5604_v43 = vld [vmem:[#allocation18_spill] sm:$0xff] }
 0x588   :  { %v2320_v3 = vpop.permute.xlu0 %2319  ;;  %v2318_v30 = vpop.permute.xlu1 %2317  ;;  %v2947_v2 = vld [vmem:[%s5605_s12 + $0x1] ss:$0 sm:$0xff]  ;;  %v2946_v36 = vld [vmem:[%s5605_s12] ss:$0 sm:$0xff] }
 0x589   :  { %v2328_v7 = vadd.f32 %v2320_v3, %v2284_v38  ;;  %v2327_v10 = vadd.f32 %v2318_v30, %v2283_v13 }
 0x58b   :  { %v2353_v16 = vadd.f32 %v5595_v18, %v2328_v7  ;;  %v2352_v45 = vadd.f32 %v5596_v25, %v2327_v10 }
 0x58c   :  { %v2385_v62 = vpop.permute.xlu0 %2384  ;;  %v2383_v63 = vpop.permute.xlu1 %2382 }
 0x58d   :  { %v2395_v58 = vadd.f32 %v2385_v62, %v2351_v20  ;;  %v2394_v54 = vadd.f32 %v2383_v63, %v2350_v37  ;;  %v2948_v20 = vld [vmem:[%s5605_s12 + $0x2] ss:$0 sm:$0xff] }
 0x590   :  { %v2389_v21 = vpop.permute.xlu0 %2388  ;;  %v2387_v28 = vpop.permute.xlu1 %2386 }
 0x591   :  { %v2397_v56 = vadd.f32 %v2389_v21, %v2353_v16  ;;  %v2396_v31 = vadd.f32 %v2387_v28, %v2352_v45 }
 0x594   :  { %v2429_v39 = vpop.permute.xlu0 %2428  ;;  %v2427_v60 = vpop.permute.xlu1 %2426 }
 0x595   :  { %v2439_v57 = vadd.f32 %v2429_v39, %v2395_v58  ;;  %v2438_v47 = vadd.f32 %v2427_v60, %v2394_v54 }
 0x597   :  { %v2464_v29 = vadd.f32 %v5597_v49, %v2439_v57  ;;  %v2463_v12 = vadd.f32 %v5598_v11, %v2438_v47 }
 0x598   :  { %v2433_v15 = vpop.permute.xlu0 %2432  ;;  %v2431_v61 = vpop.permute.xlu1 %2430 }
 0x599   :  { %v2441_v50 = vadd.f32 %v2433_v15, %v2397_v56  ;;  %v2440_v6 = vadd.f32 %v2431_v61, %v2396_v31 }
 0x59b   :  { %v2466_v22 = vadd.f32 %v5599_v17, %v2441_v50  ;;  %v2465_v14 = vadd.f32 %v5600_v33, %v2440_v6 }
 0x59c   :  { %v2498_v35 = vpop.permute.xlu0 %2497  ;;  %v2496_v34 = vpop.permute.xlu1 %2495 }
 0x59d   :  { %v2508_v59 = vadd.f32 %v2498_v35, %v2464_v29  ;;  %v2507_v23 = vadd.f32 %v2496_v34, %v2463_v12 }
 0x5a0   :  { %v2502_v26 = vpop.permute.xlu0 %2501  ;;  %v2500_v44 = vpop.permute.xlu1 %2499 }
 0x5a1   :  { %v2510_v48 = vadd.f32 %v2502_v26, %v2466_v22  ;;  %v2509_v46 = vadd.f32 %v2500_v44, %v2465_v14 }
 0x5a4   :  { %v2542_v53 = vpop.permute.xlu0 %2541  ;;  %v2540_v0 = vpop.permute.xlu1 %2539 }
 0x5a5   :  { %v2552_v52 = vadd.f32 %v2542_v53, %v2508_v59  ;;  %v2551_v8 = vadd.f32 %v2540_v0, %v2507_v23 }
 0x5a7   :  { %v2592_v1 = vadd.f32 %v5601_v51, %v2552_v52  ;;  %v2591_v55 = vadd.f32 %v5602_v4, %v2551_v8  ;;  %v2952_v51 = vld [vmem:[%s5606_s16 + $0x2] ss:$0 sm:$0xff]  ;;  %v2951_v4 = vld [vmem:[%s5606_s16 + $0x1] ss:$0 sm:$0xff] }
 0x5a8   :  { %v2546_v42 = vpop.permute.xlu0 %2545  ;;  %v2544_v40 = vpop.permute.xlu1 %2543 }
 0x5a9   :  { %v2554_v41 = vadd.f32 %v2546_v42, %v2510_v48  ;;  %v2553_v19 = vadd.f32 %v2544_v40, %v2509_v46  ;;  %v2599_v9 = vsel %vm2595_vm8, %v2592_v1, 0.0  ;;  %v2596_v24 = vsel %vm2595_vm8, %v2591_v55, 0.0  ;;  %v2950_v46 = vld [vmem:[%s5606_s16] ss:$0 sm:$0xff] }
 0x5aa   :  { %2600 = vadd.xlane.f32.xlu0 %v2599_v9  ;;  %2597 = vadd.xlane.f32.xlu1 %v2596_v24 }
 0x5ab   :  { %v2594_v5 = vadd.f32 %v5603_v27, %v2554_v41  ;;  %v2593_v32 = vadd.f32 %v5604_v43, %v2553_v19 }
 0x5ad   :  { %v2605_v38 = vsel %vm2595_vm8, %v2594_v5, 0.0  ;;  %v2602_v13 = vsel %vm2595_vm8, %v2593_v32, 0.0 }
 0x5ae   :  { %2606 = vadd.xlane.f32.xlu1 %v2605_v38  ;;  %2603 = vadd.xlane.f32.xlu0 %v2602_v13 }
 0x5bf   :  { %2710 = vperm.xlu1 %3328, %v2947_v2  }
 0x5c3   :  { %2714 = vperm.xlu1 %3328, %v2948_v20  }
 0x5c4   :  { %2706 = vperm.xlu0 %3327, %v2946_v36  }
 0x633   :  { %v2601_v37 = vpop.xlane.xlu0 %2600  ;;  %v2598_v3 = vpop.xlane.xlu1 %2597 }
 0x634   :  { %v2614_v30 = vrot.slane %v2601_v37, 4  ;;  %v2608_v7 = vrot.slane %v2598_v3, 4 }
 0x636   :  { %v2615_v10 = vadd.f32 %v2614_v30, %v2601_v37  ;;  %v2609_v18 = vadd.f32 %v2608_v7, %v2598_v3 }
 0x637   :  { %v2604_v16 = vpop.xlane.xlu0 %2603  ;;  %v2607_v25 = vpop.xlane.xlu1 %2606 }
 0x638   :  { %v2616_v45 = vrot.slane %v2615_v10, 2  ;;  %v2610_v62 = vrot.slane %v2609_v18, 2  ;;  %v2620_v63 = vrot.slane %v2604_v16, 4  ;;  %v2626_v21 = vrot.slane %v2607_v25, 4 }
 0x63a   :  { %v2617_v28 = vadd.f32 %v2616_v45, %v2615_v10  ;;  %v2611_v58 = vadd.f32 %v2610_v62, %v2609_v18  ;;  %v2621_v54 = vadd.f32 %v2620_v63, %v2604_v16  ;;  %v2627_v39 = vadd.f32 %v2626_v21, %v2607_v25 }
 0x63b   :  { %v2711_v42 = vpop.permute.xlu1 %2710 }
 0x63c   :  { %v2618_v60 = vrot.slane %v2617_v28, 1  ;;  %v2612_v57 = vrot.slane %v2611_v58, 1  ;;  %v2622_v47 = vrot.slane %v2621_v54, 2  ;;  %v2628_v56 = vrot.slane %v2627_v39, 2 }
 0x63e   :  { %v2623_v31 = vadd.f32 %v2622_v47, %v2621_v54  ;;  %v2629_v49 = vadd.f32 %v2628_v56, %v2627_v39  ;;  %v2619_v29 = vadd.f32 %v2618_v60, %v2617_v28  ;;  %v2613_v11 = vadd.f32 %v2612_v57, %v2611_v58 }
 0x63f   :  { %v2707_v40 = vpop.permute.xlu0 %2706  ;;  %v2715_v41 = vpop.permute.xlu1 %2714 }
 0x640   :  { %v2624_v12 = vrot.slane %v2623_v31, 1  ;;  %v2630_v15 = vrot.slane %v2629_v49, 1  ;;  %v2634_v61 = vmul.f32 0.015625, %v2619_v29  ;;  %v2633_v50 = vmul.f32 0.015625, %v2613_v11 }
 0x642   :  { %v2631_v6 = vadd.f32 %v2630_v15, %v2629_v49  ;;  %v5291_v17 = vsub.f32 %v2592_v1, %v2634_v61  ;;  %v5293_v22 = vsub.f32 %v2591_v55, %v2633_v50  ;;  %v2625_v33 = vadd.f32 %v2624_v12, %v2623_v31  ;;  %v2949_v1 = vld [vmem:[%s5605_s12 + $0x3] ss:$0 sm:$0xff] }
 0x643   :  { %v2953_v55 = vld [vmem:[%s5606_s16 + $0x3] ss:$0 sm:$0xff] }
 0x644   :  { %v2636_v14 = vmul.f32 0.015625, %v2631_v6  ;;  %v2635_v35 = vmul.f32 0.015625, %v2625_v33  ;;  %v2642_v34 = vmul.f32 %v5291_v17, %v5291_v17  ;;  %v2641_v26 = vmul.f32 %v5293_v22, %v5293_v22 }
 0x645   :  { %v2721_v15 = vmul.f32 %v2707_v40, %v5293_v22  ;;  %v2722_v50 = vmul.f32 %v2711_v42, %v5291_v17 }
 0x646   :  { %v5299_v44 = vsub.f32 %v2593_v32, %v2635_v35  ;;  %v5301_v59 = vsub.f32 %v2594_v5, %v2636_v14  ;;  %v2648_v23 = vsel %vm2595_vm8, %v2642_v34, 0.0  ;;  %v2645_v53 = vsel %vm2595_vm8, %v2641_v26, 0.0 }
 0x647   :  { %2649 = vadd.xlane.f32.xlu1 %v2648_v23  ;;  %2646 = vadd.xlane.f32.xlu0 %v2645_v53 }
 0x648   :  { %v2643_v0 = vmul.f32 %v5299_v44, %v5299_v44  ;;  %v2644_v52 = vmul.f32 %v5301_v59, %v5301_v59  ;;  %v2723_v26 = vmul.f32 %v2715_v41, %v5299_v44 }
 0x64a   :  { %v2651_v8 = vsel %vm2595_vm8, %v2643_v0, 0.0  ;;  %v2654_v48 = vsel %vm2595_vm8, %v2644_v52, 0.0 }
 0x64b   :  { %2652 = vadd.xlane.f32.xlu0 %v2651_v8  ;;  %2655 = vadd.xlane.f32.xlu1 %v2654_v48 }
 0x65c   :  { %2758 = vperm.xlu1 %3328, %v2950_v46  }
 0x660   :  { %2766 = vperm.xlu1 %3328, %v2952_v51  }
 0x661   :  { %2718 = vperm.xlu0 %3327, %v2949_v1  }
 0x665   :  { %2762 = vperm.xlu0 %3327, %v2951_v4  }
 0x669   :  { %2770 = vperm.xlu0 %3327, %v2953_v55  }
 0x6d0   :  { %v2647_v19 = vpop.xlane.xlu0 %2646  ;;  %v2650_v9 = vpop.xlane.xlu1 %2649 }
 0x6d1   :  { %v2657_v24 = vrot.slane %v2647_v19, 4  ;;  %v2663_v27 = vrot.slane %v2650_v9, 4 }
 0x6d3   :  { %v2658_v5 = vadd.f32 %v2657_v24, %v2647_v19  ;;  %v2664_v43 = vadd.f32 %v2663_v27, %v2650_v9 }
 0x6d4   :  { %v2653_v32 = vpop.xlane.xlu0 %2652  ;;  %v2656_v38 = vpop.xlane.xlu1 %2655 }
 0x6d5   :  { %v2659_v13 = vrot.slane %v2658_v5, 2  ;;  %v2665_v2 = vrot.slane %v2664_v43, 2  ;;  %v2669_v20 = vrot.slane %v2653_v32, 4  ;;  %v2675_v36 = vrot.slane %v2656_v38, 4 }
 0x6d7   :  { %v2660_v37 = vadd.f32 %v2659_v13, %v2658_v5  ;;  %v2666_v3 = vadd.f32 %v2665_v2, %v2664_v43  ;;  %v2670_v30 = vadd.f32 %v2669_v20, %v2653_v32  ;;  %v2676_v7 = vadd.f32 %v2675_v36, %v2656_v38 }
 0x6d8   :  { %v2759_v6 = vpop.permute.xlu1 %2758 }
 0x6d9   :  { %v2661_v10 = vrot.slane %v2660_v37, 1  ;;  %v2667_v18 = vrot.slane %v2666_v3, 1  ;;  %v2671_v16 = vrot.slane %v2670_v30, 2  ;;  %v2677_v25 = vrot.slane %v2676_v7, 2 }
 0x6db   :  { %v2662_v45 = vadd.f32 %v2661_v10, %v2660_v37  ;;  %v2668_v62 = vadd.f32 %v2667_v18, %v2666_v3  ;;  %v2672_v63 = vadd.f32 %v2671_v16, %v2670_v30  ;;  %v2678_v21 = vadd.f32 %v2677_v25, %v2676_v7 }
 0x6dc   :  { %v2719_v12 = vpop.permute.xlu0 %2718  ;;  %v2767_v51 = vpop.permute.xlu1 %2766 }
 0x6dd   :  { %v2681_v28 = vmul.f32 0.015625, %v2662_v45  ;;  %v2682_v58 = vmul.f32 0.015625, %v2668_v62  ;;  %v2673_v54 = vrot.slane %v2672_v63, 1  ;;  %v2679_v39 = vrot.slane %v2678_v21, 1 }
 0x6de   :  { %v2724_v0 = vmul.f32 %v2719_v12, %v5301_v59 }
 0x6df   :  { %v2725_v60 = vadd.f32 1e-05, %v2681_v28  ;;  %v2726_v57 = vadd.f32 1e-05, %v2682_v58  ;;  %v2674_v47 = vadd.f32 %v2673_v54, %v2672_v63  ;;  %v2680_v56 = vadd.f32 %v2679_v39, %v2678_v21 }
 0x6e0   :  { %v2763_v35 = vpop.permute.xlu0 %2762 }
 0x6e1   :  { %3337 = vrsqrt.f32 %v2725_v60  ;;  %v2683_v31 = vmul.f32 0.015625, %v2674_v47  ;;  %v2684_v49 = vmul.f32 0.015625, %v2680_v56 }
 0x6e2   :  { %3339 = vrsqrt.f32 %v2726_v57 }
 0x6e3   :  { %v2727_v29 = vadd.f32 1e-05, %v2683_v31  ;;  %v2728_v11 = vadd.f32 1e-05, %v2684_v49 }
 0x6e4   :  { %v2771_v55 = vpop.permute.xlu0 %2770 }
 0x6e5   :  { %3341 = vrsqrt.f32 %v2727_v29 }
 0x6e6   :  { %3343 = vrsqrt.f32 %v2728_v11 }
 0x6ee   :  { %v3338_v61 = vpop.eup %3337 }
 0x6ef   :  { %v3340_v33 = vpop.eup %3339  ;;  %v2733_v14 = vmul.f32 %v3338_v61, %v2721_v15 }
 0x6f0   :  { %v2734_v34 = vmul.f32 %v3340_v33, %v2722_v50 }
 0x6f1   :  { %v2773_v23 = vadd.f32 %v2759_v6, %v2733_v14 }
 0x6f2   :  { %v3342_v53 = vpop.eup %3341  ;;  %v2774_v52 = vadd.f32 %v2763_v35, %v2734_v34 }
 0x6f3   :  { %v3344_v8 = vpop.eup %3343  ;;  %v2777_v48 = vmax.f32 %v2773_v23, 0.0  ;;  %v2735_v46 = vmul.f32 %v3342_v53, %v2723_v26 }
 0x6f4   :  { %v2778_v22 = vmax.f32 %v2774_v52, 0.0  ;;  %v2736_v1 = vmul.f32 %v3344_v8, %v2724_v0 }
 0x6f5   :  { %v2785_v4 = vrot.slane %v2777_v48, 1  ;;  %v2775_v17 = vadd.f32 %v2767_v51, %v2735_v46 }
 0x6f6   :  { %v2786_v42 = vrot.slane %v2778_v22, 1  ;;  %v2776_v40 = vadd.f32 %v2771_v55, %v2736_v1 }
 0x6f7   :  { %v2793_v19 = vmax.f32 %v2777_v48, %v2785_v4  ;;  %v2779_v9 = vmax.f32 %v2775_v17, 0.0 }
 0x6f8   :  { %v2794_v24 = vmax.f32 %v2778_v22, %v2786_v42  ;;  %v2780_v44 = vmax.f32 %v2776_v40, 0.0 }
 0x6f9   :  { %v2801_v41 = vrot.slane %v2793_v19, 1  ;;  %v2787_v27 = vrot.slane %v2779_v9, 1  ;;  %v2809_v5 = vrot.slane %v2793_v19, 2  ;;  %v2817_v13 = vrot.slane %v2793_v19, 3 }
 0x6fa   :  { %v2802_v59 = vrot.slane %v2794_v24, 1  ;;  %v2788_v43 = vrot.slane %v2780_v44, 1  ;;  %v2810_v32 = vrot.slane %v2794_v24, 2  ;;  %v2818_v36 = vrot.slane %v2794_v24, 3 }
 0x6fb   :  { %v2795_v38 = vmax.f32 %v2779_v9, %v2787_v27  ;;  %v2825_v2 = vsel %vm987_vm4, %v2793_v19, %v2801_v41 }
 0x6fc   :  { %v2796_v20 = vmax.f32 %v2780_v44, %v2788_v43  ;;  %v2826_v37 = vsel %vm987_vm4, %v2794_v24, %v2802_v59  ;;  %v2829_v3 = vsel %vm992_vm5, %v2825_v2, %v2809_v5 }
 0x6fd   :  { %v2803_v30 = vrot.slane %v2795_v38, 1  ;;  %v2830_v7 = vsel %vm992_vm5, %v2826_v37, %v2810_v32  ;;  %v2833_v10 = vsel %vm997_vm6, %v2829_v3, %v2817_v13  ;;  %v2811_v18 = vrot.slane %v2795_v38, 2 }
 0x6fe   :  { %v2804_v16 = vrot.slane %v2796_v20, 1  ;;  %v2834_v25 = vsel %vm997_vm6, %v2830_v7, %v2818_v36  ;;  %2841 = vrot.lane.b32.xlu1 %v2833_v10, %s5401_s8  ;;  %v2812_v45 = vrot.slane %v2796_v20, 2  ;;  %v2819_v62 = vrot.slane %v2795_v38, 3 }
 0x6ff   :  { %2843 = vrot.lane.b32.xlu0 %v2834_v25, %s5401_s8  ;;  %v2827_v63 = vsel %vm987_vm4, %v2795_v38, %v2803_v30  ;;  %v2820_v21 = vrot.slane %v2796_v20, 3 }
 0x700   :  { %v2828_v28 = vsel %vm987_vm4, %v2796_v20, %v2804_v16  ;;  %v2831_v58 = vsel %vm992_vm5, %v2827_v63, %v2811_v18  ;;  %vm2909_vm4 = vcmask 27648  }
 0x701   :  { %v2832_v54 = vsel %vm992_vm5, %v2828_v28, %v2812_v45  ;;  %v2835_v39 = vsel %vm997_vm6, %v2831_v58, %v2819_v62 }
 0x702   :  { %v2836_v60 = vsel %vm997_vm6, %v2832_v54, %v2820_v21  ;;  %2845 = vrot.lane.b32.xlu1 %v2835_v39, %s5401_s8 }
 0x703   :  { %2847 = vrot.lane.b32.xlu0 %v2836_v60, %s5401_s8 }
 0x770   :  { %v2842_v57 = vpop.permute.xlu1 %2841 }
 0x771   :  { %v2844_v47 = vpop.permute.xlu0 %2843  ;;  %v2853_v56 = vmax.f32 %v2833_v10, %v2842_v57 }
 0x772   :  { %v2854_v31 = vmax.f32 %v2834_v25, %v2844_v47 }
 0x773   :  { %2861 = vrot.lane.b32.xlu1 %v2853_v56, %s5401_s8 }
 0x774   :  { %2863 = vrot.lane.b32.xlu0 %v2854_v31, %s5401_s8  ;;  %v2846_v49 = vpop.permute.xlu1 %2845 }
 0x775   :  { %v2848_v29 = vpop.permute.xlu0 %2847  ;;  %v2855_v11 = vmax.f32 %v2835_v39, %v2846_v49 }
 0x776   :  { %v2856_v12 = vmax.f32 %v2836_v60, %v2848_v29 }
 0x777   :  { %2865 = vrot.lane.b32.xlu1 %v2855_v11, %s5401_s8 }
 0x778   :  { %2867 = vrot.lane.b32.xlu0 %v2856_v12, %s5401_s8  ;;  %s3377_s8 = smov [#allocation4]  }
 0x77b   :  { %2873 = vrot.lane.b32.xlu1 %v2853_v56, %s5400_s28 }
 0x77c   :  { %2875 = vrot.lane.b32.xlu0 %v2854_v31, %s5400_s28 }
 0x77f   :  { %2877 = vrot.lane.b32.xlu1 %v2855_v11, %s5400_s28 }
 0x780   :  { %2879 = vrot.lane.b32.xlu0 %v2856_v12, %s5400_s28  ;;  %s2919_s28 = sshll.u32 %s3377_s8, 4  ;;  %s2920_s28 = int_to_ptr.vmem [resolvable:$true] %s2919_s28 }
 0x781   :  { %s3345_s21 = scalar_lea.vmem %s2920_s28, 256  ;;  %p3350_p1 = scmp.lt.s32.totalorder %s2920_s28, %s2920_s28 }
 0x782   :  { %p3346_p0 = scmp.ne.s32.totalorder %s2920_s28, %s3345_s21  ;;  %p3351_p2 = scmp.lt.s32.totalorder %s3345_s21, %s3345_s21 }
 0x783   :  { %2885 = vrot.lane.b32.xlu1 %v2853_v56, %s5607_s11 }
 0x784   :  { %2887 = vrot.lane.b32.xlu0 %v2854_v31, %s5607_s11  ;;  %p3352_p3 = por %p3351_p2, %p3350_p1 }
 0x786   :  { %p3353_p4 = pnand %p3352_p3, %p3346_p0 }
 0x787   :  { %2889 = vrot.lane.b32.xlu1 %v2855_v11, %s5607_s11 }
 0x788   :  { %2891 = vrot.lane.b32.xlu0 %v2856_v12, %s5607_s11 }
 0x7e5   :  { %v2862_v15 = vpop.permute.xlu1 %2861 }
 0x7e6   :  { %v2864_v61 = vpop.permute.xlu0 %2863  ;;  %v2897_v26 = vsel %vm1130_vm13, %v2853_v56, %v2862_v15 }
 0x7e7   :  { %v2898_v23 = vsel %vm1130_vm13, %v2854_v31, %v2864_v61 }
 0x7e9   :  { %v2866_v50 = vpop.permute.xlu1 %2865 }
 0x7ea   :  { %v2868_v6 = vpop.permute.xlu0 %2867  ;;  %v2899_v51 = vsel %vm1130_vm13, %v2855_v11, %v2866_v50 }
 0x7eb   :  { %v2900_v22 = vsel %vm1130_vm13, %v2856_v12, %v2868_v6 }
 0x7ed   :  { %v2874_v33 = vpop.permute.xlu1 %2873 }
 0x7ee   :  { %v2876_v14 = vpop.permute.xlu0 %2875  ;;  %v2901_v53 = vsel %vm1135_vm14, %v2897_v26, %v2874_v33 }
 0x7ef   :  { %v2902_v52 = vsel %vm1135_vm14, %v2898_v23, %v2876_v14 }
 0x7f1   :  { %v2878_v35 = vpop.permute.xlu1 %2877 }
 0x7f2   :  { %v2880_v34 = vpop.permute.xlu0 %2879  ;;  %v2903_v1 = vsel %vm1135_vm14, %v2899_v51, %v2878_v35 }
 0x7f3   :  { %v2904_v17 = vsel %vm1135_vm14, %v2900_v22, %v2880_v34 }
 0x7f5   :  { %v2886_v0 = vpop.permute.xlu1 %2885 }
 0x7f6   :  { %v2888_v8 = vpop.permute.xlu0 %2887  ;;  %v2905_v48 = vsel %vm1140_vm15, %v2901_v53, %v2886_v0 }
 0x7f7   :  { %v2906_v46 = vsel %vm1140_vm15, %v2902_v52, %v2888_v8  ;;  %2910 = vst.msk [vmem:[#allocation4] sm:$0xf] %vm2909_vm4, %v2905_v48 }
 0x7f8   :  { %2911 = vst.msk [vmem:[#allocation4 + $0x4] sm:$0xf] %vm2909_vm4, %v2906_v46 }
 0x7f9   :  { %v2890_v4 = vpop.permute.xlu1 %2889 }
 0x7fa   :  { %v2892_v55 = vpop.permute.xlu0 %2891  ;;  %v2907_v42 = vsel %vm1140_vm15, %v2903_v1, %v2890_v4 }
 0x7fb   :  { %v2908_v40 = vsel %vm1140_vm15, %v2904_v17, %v2892_v55  ;;  %2912 = vst.msk [vmem:[#allocation4 + $0x8] sm:$0xf] %vm2909_vm4, %v2907_v42 }
 0x7fc   :  { %2913 = vst.msk [vmem:[#allocation4 + $0xc] sm:$0xf] %vm2909_vm4, %v2908_v40 }
 0x7fd   :  { %3356 = shalt.err (!%p3353_p4)
}
 0x7fe   :  { %s3378_s25 = smov 64   ;;  %s3379_s27 = smov 4  }
 0x7ff   :  { %s5608_s18 = sld [smem:[#allocation96_spill]] }
 0x805   :  { %2925 = dma.vmem_to_hbm [thread:$0]  %s2920_s28, 256, %s5608_s18, [#allocation5], %s3378_s25, %s3378_s25, %s3379_s27  }
 0x806   :  { %3365 = dma.done.wait [#allocation5], 256  }
 0x807   :  { %3366 = vsyncadd [#allocation5], 4294967040 }
 0x808   :  { %2929 = vsyncpa [#allocation5], 1 }

</bundles_post_ra>
